<compile_context>
chip_gen: v7x
topology: tpu7x:2x2x1
jax: 0.10.0
libtpu: 0.0.40
codegen_flags: <defaults>
</compile_context>

<pallas_src>
import jax
import jax.numpy as jnp
from jax.experimental import pallas as pl
from jax.experimental.pallas import tpu as pltpu

N_FEATURE = 17
N_HIDDEN = 218
N_OUTPUT = 1
W_DEPTH = 6       # number of hidden Linear(218, 218) layers

F_PAD = 128       # input features padded so the layer-1 K dim is lane-dense
H_PAD = 256       # hidden dim padded to a full MXU tile
O_ROWS = 8        # output rows (1 -> 8); row 0 carries the prediction

_TB_MAX = 2048    # max batch rows (lanes) per grid step


def _mlp_kernel(x_ref, w1_ref, b1_ref, wh_ref, bh_ref, wp_ref, bp_ref, o_ref):
    # Layer 1: (H_PAD, F_PAD) @ (F_PAD, TB) -> f32; bias + ReLU in f32, then
    # keep the inter-layer activation in bf16 (MXU-native, halves live VMEM).
    h32 = jnp.dot(w1_ref[...], x_ref[...], preferred_element_type=jnp.float32)
    h = jnp.maximum(h32 + b1_ref[...], 0.0).astype(jnp.bfloat16)

    # Hidden layers, statically unrolled: bf16 MXU operands, f32 accumulation.
    for i in range(W_DEPTH):
        h32 = jnp.dot(wh_ref[i], h, preferred_element_type=jnp.float32)
        h = jnp.maximum(h32 + bh_ref[i], 0.0).astype(jnp.bfloat16)

    # Output head: (O_ROWS, H_PAD) @ (H_PAD, TB).  Only row 0 is meaningful;
    # the store is a small, lane-dense (O_ROWS, TB) f32 block.
    out = jnp.dot(wp_ref[...], h, preferred_element_type=jnp.float32)
    o_ref[...] = out + bp_ref[...]


def prepare_params(w1, b1, wh, bh, wp, bp):
    """Pad to MXU-friendly sizes and cast weights to bf16 once.

    Inputs are PyTorch-layout: w1 (218,17), b1 (218,), wh (6,218,218),
    bh (6,218), wp (1,218), bp (1,)."""
    hp = H_PAD - N_HIDDEN
    fp = F_PAD - N_FEATURE
    op = O_ROWS - N_OUTPUT
    w1p = jnp.pad(w1, ((0, hp), (0, fp))).astype(jnp.bfloat16)            # (H_PAD, F_PAD)
    b1p = jnp.pad(b1, (0, hp)).astype(jnp.float32).reshape(H_PAD, 1)
    whp = jnp.pad(wh, ((0, 0), (0, hp), (0, hp))).astype(jnp.bfloat16)    # (W, H_PAD, H_PAD)
    bhp = jnp.pad(bh, ((0, 0), (0, hp))).astype(jnp.float32).reshape(W_DEPTH, H_PAD, 1)
    wpp = jnp.pad(wp, ((0, op), (0, hp))).astype(jnp.bfloat16)            # (O_ROWS, H_PAD)
    bpp = jnp.pad(bp, (0, op)).astype(jnp.float32).reshape(O_ROWS, 1)
    return w1p, b1p, whp, bhp, wpp, bpp


def _round_up(n, m):
    return ((n + m - 1) // m) * m


def _choose_tiling(batch):
    """Batch tile (TB) and padded batch.  TB is a multiple of 256 (MXU-native
    M on v6e/v7x, 2x128 on v5e), up to 2048 rows; the grid is kept >= 2 steps
    when there is enough work so v7x's 2 TensorCores both get tiles."""
    padded = _round_up(max(batch, 1), 256)
    tb = min(_TB_MAX, padded)
    if padded > 256 and padded // tb < 2:
        tb = _round_up((padded + 1) // 2, 256)
        padded = _round_up(padded, tb)
    return tb, padded


@jax.jit
def net_forward(x, w1p, b1p, whp, bhp, wpp, bpp):
    batch = x.shape[0]
    tb, padded = _choose_tiling(batch)

    # Pad features 17->128 and batch->padded, cast to bf16, and transpose so
    # the batch rides the 128-lane axis (one fused pad/convert/copy in XLA).
    xt = jnp.pad(x.astype(jnp.bfloat16),
                 ((0, padded - batch), (0, F_PAD - N_FEATURE))).T   # (F_PAD, padded)

    grid = (padded // tb,)

    flops = 2 * padded * (H_PAD * F_PAD + W_DEPTH * H_PAD * H_PAD + O_ROWS * H_PAD)
    bytes_accessed = (
        xt.size * 2 + O_ROWS * padded * 4
        + (w1p.size + whp.size + wpp.size) * 2
        + (b1p.size + bhp.size + bpp.size) * 4
    )

    const2 = lambda i: (0, 0)
    const3 = lambda i: (0, 0, 0)

    out = pl.pallas_call(
        _mlp_kernel,
        out_shape=jax.ShapeDtypeStruct((O_ROWS, padded), jnp.float32),
        grid=grid,
        in_specs=[
            pl.BlockSpec((F_PAD, tb), lambda i: (0, i)),        # x^T: tiled over batch
            pl.BlockSpec((H_PAD, F_PAD), const2),               # w1: VMEM-resident
            pl.BlockSpec((H_PAD, 1), const2),                   # b1
            pl.BlockSpec((W_DEPTH, H_PAD, H_PAD), const3),      # hidden weights (stacked)
            pl.BlockSpec((W_DEPTH, H_PAD, 1), const3),          # hidden biases
            pl.BlockSpec((O_ROWS, H_PAD), const2),              # output weight
            pl.BlockSpec((O_ROWS, 1), const2),                  # output bias
        ],
        out_specs=pl.BlockSpec((O_ROWS, tb), lambda i: (0, i)),
        compiler_params=pltpu.CompilerParams(
            dimension_semantics=("parallel",),   # v7x: shard batch tiles over 2 TCs
            vmem_limit_bytes=32 << 20,
        ),
        cost_estimate=pl.CostEstimate(
            flops=flops, transcendentals=0, bytes_accessed=bytes_accessed),
    )(xt, w1p, b1p, whp, bhp, wpp, bpp)

    return out[:N_OUTPUT, :batch].T      # (batch, 1)


def init_params(key):
    """PyTorch-layout init: weights kaiming-normal (the module calls
    nn.init.kaiming_normal_ explicitly, fan_in mode); biases use torch Linear's
    default uniform(-1/sqrt(fan_in), 1/sqrt(fan_in))."""
    keys = jax.random.split(key, 2 * (2 + W_DEPTH))
    k = iter(keys)

    def kaiming(key, fan_out, fan_in):
        std = jnp.sqrt(2.0 / fan_in)
        return (std * jax.random.normal(key, (fan_out, fan_in))).astype(jnp.float32)

    def bias(key, fan_in, fan_out):
        bound = 1.0 / jnp.sqrt(fan_in)
        return jax.random.uniform(key, (fan_out,), minval=-bound,
                                  maxval=bound).astype(jnp.float32)

    w1 = kaiming(next(k), N_HIDDEN, N_FEATURE)
    b1 = bias(next(k), N_FEATURE, N_HIDDEN)
    wh = jnp.stack([kaiming(next(k), N_HIDDEN, N_HIDDEN) for _ in range(W_DEPTH)])
    bh = jnp.stack([bias(next(k), N_HIDDEN, N_HIDDEN) for _ in range(W_DEPTH)])
    wp = kaiming(next(k), N_OUTPUT, N_HIDDEN)
    bp = bias(next(k), N_HIDDEN, N_OUTPUT)
    return w1, b1, wh, bh, wp, bp


def reference_forward_f32(x, w1, b1, wh, bh, wp, bp):
    """Pure-f32 reference with the original module semantics."""
    h = jnp.maximum(x @ w1.T + b1, 0.0)
    for i in range(W_DEPTH):
        h = jnp.maximum(h @ wh[i].T + bh[i], 0.0)
    return x @ jnp.zeros((N_FEATURE, N_OUTPUT)) + h @ wp.T + bp  # keep shape (B, 1)


def reference_forward_prepared(x, w1p, b1p, whp, bhp, wpp, bpp):
    """Reference mirroring the kernel's transposed bf16/pad arithmetic."""
    xt = jnp.pad(x.astype(jnp.bfloat16), ((0, 0), (0, F_PAD - N_FEATURE))).T
    h = jnp.dot(w1p, xt, preferred_element_type=jnp.float32)
    h = jnp.maximum(h + b1p, 0.0).astype(jnp.bfloat16)
    for i in range(W_DEPTH):
        h32 = jnp.dot(whp[i], h, preferred_element_type=jnp.float32)
        h = jnp.maximum(h32 + bhp[i], 0.0).astype(jnp.bfloat16)
    out = jnp.dot(wpp, h, preferred_element_type=jnp.float32) + bpp
    return out[:N_OUTPUT, :].T


if __name__ == "__main__":
    key = jax.random.PRNGKey(0)
    pkey, xkey = jax.random.split(key)

    raw_params = init_params(pkey)
    params = prepare_params(*raw_params)

    batch = 32
    x = jax.random.normal(xkey, (batch, N_FEATURE), dtype=jnp.float32)

    out = net_forward(x, *params)
    jax.block_until_ready(out)
    assert out.shape == (batch, N_OUTPUT)

    # Check against a reference that mirrors the kernel's bf16 math exactly.
    ref_mirror = reference_forward_prepared(x, *params)
    assert jnp.allclose(out, ref_mirror, atol=1e-2, rtol=1e-2)

    # Sanity check against the full-f32 module semantics (bf16 rounding of
    # weights/activations is the only difference), loose tolerance.
    ref_f32 = reference_forward_f32(x, *raw_params)
    assert jnp.allclose(out, ref_f32, atol=0.1, rtol=0.1)

    print("KERNEL_OK")
</pallas_src>

<mosaic_0001>
module attributes {stable_mosaic.version = 11 : i64} {
  func.func @_mlp_kernel(%arg0: i32, %arg1: memref<128x256xbf16, #tpu.memory_space<vmem>>, %arg2: memref<256x128xbf16, #tpu.memory_space<vmem>>, %arg3: memref<256x1xf32, #tpu.memory_space<vmem>>, %arg4: memref<6x256x256xbf16, #tpu.memory_space<vmem>>, %arg5: memref<6x256x1xf32, #tpu.memory_space<vmem>>, %arg6: memref<8x256xbf16, #tpu.memory_space<vmem>>, %arg7: memref<8x1xf32, #tpu.memory_space<vmem>>, %arg8: memref<8x256xf32, #tpu.memory_space<vmem>>) attributes {dimension_semantics = [#tpu.dimension_semantics<parallel>], iteration_bounds = array<i64: 1>, scalar_prefetch = 0 : i64, scratch_operands = 0 : i64, tpu.core_type = #tpu.core_type<tc>, window_params = [{transform_indices = @transform_0, window_bounds = array<i64: 128, 256>}, {pipeline_mode = #tpu.pipeline_mode<synchronous>, transform_indices = @transform_1, window_bounds = array<i64: 256, 128>}, {pipeline_mode = #tpu.pipeline_mode<synchronous>, transform_indices = @transform_2, window_bounds = array<i64: 256, 1>}, {pipeline_mode = #tpu.pipeline_mode<synchronous>, transform_indices = @transform_3, window_bounds = array<i64: 6, 256, 256>}, {pipeline_mode = #tpu.pipeline_mode<synchronous>, transform_indices = @transform_4, window_bounds = array<i64: 6, 256, 1>}, {pipeline_mode = #tpu.pipeline_mode<synchronous>, transform_indices = @transform_5, window_bounds = array<i64: 8, 256>}, {pipeline_mode = #tpu.pipeline_mode<synchronous>, transform_indices = @transform_6, window_bounds = array<i64: 8, 1>}, {transform_indices = @transform_7, window_bounds = array<i64: 8, 256>}]} {
    %c0 = arith.constant 0 : index
    %c0_0 = arith.constant 0 : index
    %0 = vector.load %arg2[%c0, %c0_0] : memref<256x128xbf16, #tpu.memory_space<vmem>>, vector<256x128xbf16>
    %c0_1 = arith.constant 0 : index
    %c0_2 = arith.constant 0 : index
    %1 = vector.load %arg1[%c0_1, %c0_2] : memref<128x256xbf16, #tpu.memory_space<vmem>>, vector<128x256xbf16>
    %cst = arith.constant dense<0.000000e+00> : vector<256x256xf32>
    %2 = tpu.matmul %0, %1, %cst {dimension_numbers = #tpu.dot_dimension_numbers<[1], [0], [0], [1], [0, 0, 1, 1], [], []>} : vector<256x128xbf16>, vector<128x256xbf16>, vector<256x256xf32> -> vector<256x256xf32>
    %c0_3 = arith.constant 0 : index
    %c0_4 = arith.constant 0 : index
    %3 = vector.load %arg3[%c0_3, %c0_4] : memref<256x1xf32, #tpu.memory_space<vmem>>, vector<256x1xf32>
    %4 = vector.broadcast %3 : vector<256x1xf32> to vector<256x256xf32>
    %5 = arith.addf %2, %4 : vector<256x256xf32>
    %cst_5 = arith.constant 0.000000e+00 : f32
    %6 = vector.broadcast %cst_5 : f32 to vector<256x256xf32>
    %7 = arith.maximumf %5, %6 : vector<256x256xf32>
    %8 = arith.truncf %7 : vector<256x256xf32> to vector<256x256xbf16>
    %c0_6 = arith.constant 0 : index
    %c0_7 = arith.constant 0 : index
    %c0_8 = arith.constant 0 : index
    %9 = vector.load %arg4[%c0_6, %c0_7, %c0_8] : memref<6x256x256xbf16, #tpu.memory_space<vmem>>, vector<1x256x256xbf16>
    %10 = vector.shape_cast %9 : vector<1x256x256xbf16> to vector<256x256xbf16>
    %cst_9 = arith.constant dense<0.000000e+00> : vector<256x256xf32>
    %11 = tpu.matmul %10, %8, %cst_9 {dimension_numbers = #tpu.dot_dimension_numbers<[1], [0], [0], [1], [0, 0, 1, 1], [], []>} : vector<256x256xbf16>, vector<256x256xbf16>, vector<256x256xf32> -> vector<256x256xf32>
    %c0_10 = arith.constant 0 : index
    %c0_11 = arith.constant 0 : index
    %c0_12 = arith.constant 0 : index
    %12 = vector.load %arg5[%c0_10, %c0_11, %c0_12] : memref<6x256x1xf32, #tpu.memory_space<vmem>>, vector<1x256x1xf32>
    %13 = vector.shape_cast %12 : vector<1x256x1xf32> to vector<256x1xf32>
    %14 = vector.broadcast %13 : vector<256x1xf32> to vector<256x256xf32>
    %15 = arith.addf %11, %14 : vector<256x256xf32>
    %cst_13 = arith.constant 0.000000e+00 : f32
    %16 = vector.broadcast %cst_13 : f32 to vector<256x256xf32>
    %17 = arith.maximumf %15, %16 : vector<256x256xf32>
    %18 = arith.truncf %17 : vector<256x256xf32> to vector<256x256xbf16>
    %c1 = arith.constant 1 : index
    %c0_14 = arith.constant 0 : index
    %c0_15 = arith.constant 0 : index
    %19 = vector.load %arg4[%c1, %c0_14, %c0_15] : memref<6x256x256xbf16, #tpu.memory_space<vmem>>, vector<1x256x256xbf16>
    %20 = vector.shape_cast %19 : vector<1x256x256xbf16> to vector<256x256xbf16>
    %cst_16 = arith.constant dense<0.000000e+00> : vector<256x256xf32>
    %21 = tpu.matmul %20, %18, %cst_16 {dimension_numbers = #tpu.dot_dimension_numbers<[1], [0], [0], [1], [0, 0, 1, 1], [], []>} : vector<256x256xbf16>, vector<256x256xbf16>, vector<256x256xf32> -> vector<256x256xf32>
    %c1_17 = arith.constant 1 : index
    %c0_18 = arith.constant 0 : index
    %c0_19 = arith.constant 0 : index
    %22 = vector.load %arg5[%c1_17, %c0_18, %c0_19] : memref<6x256x1xf32, #tpu.memory_space<vmem>>, vector<1x256x1xf32>
    %23 = vector.shape_cast %22 : vector<1x256x1xf32> to vector<256x1xf32>
    %24 = vector.broadcast %23 : vector<256x1xf32> to vector<256x256xf32>
    %25 = arith.addf %21, %24 : vector<256x256xf32>
    %cst_20 = arith.constant 0.000000e+00 : f32
    %26 = vector.broadcast %cst_20 : f32 to vector<256x256xf32>
    %27 = arith.maximumf %25, %26 : vector<256x256xf32>
    %28 = arith.truncf %27 : vector<256x256xf32> to vector<256x256xbf16>
    %c2 = arith.constant 2 : index
    %c0_21 = arith.constant 0 : index
    %c0_22 = arith.constant 0 : index
    %29 = vector.load %arg4[%c2, %c0_21, %c0_22] : memref<6x256x256xbf16, #tpu.memory_space<vmem>>, vector<1x256x256xbf16>
    %30 = vector.shape_cast %29 : vector<1x256x256xbf16> to vector<256x256xbf16>
    %cst_23 = arith.constant dense<0.000000e+00> : vector<256x256xf32>
    %31 = tpu.matmul %30, %28, %cst_23 {dimension_numbers = #tpu.dot_dimension_numbers<[1], [0], [0], [1], [0, 0, 1, 1], [], []>} : vector<256x256xbf16>, vector<256x256xbf16>, vector<256x256xf32> -> vector<256x256xf32>
    %c2_24 = arith.constant 2 : index
    %c0_25 = arith.constant 0 : index
    %c0_26 = arith.constant 0 : index
    %32 = vector.load %arg5[%c2_24, %c0_25, %c0_26] : memref<6x256x1xf32, #tpu.memory_space<vmem>>, vector<1x256x1xf32>
    %33 = vector.shape_cast %32 : vector<1x256x1xf32> to vector<256x1xf32>
    %34 = vector.broadcast %33 : vector<256x1xf32> to vector<256x256xf32>
    %35 = arith.addf %31, %34 : vector<256x256xf32>
    %cst_27 = arith.constant 0.000000e+00 : f32
    %36 = vector.broadcast %cst_27 : f32 to vector<256x256xf32>
    %37 = arith.maximumf %35, %36 : vector<256x256xf32>
    %38 = arith.truncf %37 : vector<256x256xf32> to vector<256x256xbf16>
    %c3 = arith.constant 3 : index
    %c0_28 = arith.constant 0 : index
    %c0_29 = arith.constant 0 : index
    %39 = vector.load %arg4[%c3, %c0_28, %c0_29] : memref<6x256x256xbf16, #tpu.memory_space<vmem>>, vector<1x256x256xbf16>
    %40 = vector.shape_cast %39 : vector<1x256x256xbf16> to vector<256x256xbf16>
    %cst_30 = arith.constant dense<0.000000e+00> : vector<256x256xf32>
    %41 = tpu.matmul %40, %38, %cst_30 {dimension_numbers = #tpu.dot_dimension_numbers<[1], [0], [0], [1], [0, 0, 1, 1], [], []>} : vector<256x256xbf16>, vector<256x256xbf16>, vector<256x256xf32> -> vector<256x256xf32>
    %c3_31 = arith.constant 3 : index
    %c0_32 = arith.constant 0 : index
    %c0_33 = arith.constant 0 : index
    %42 = vector.load %arg5[%c3_31, %c0_32, %c0_33] : memref<6x256x1xf32, #tpu.memory_space<vmem>>, vector<1x256x1xf32>
    %43 = vector.shape_cast %42 : vector<1x256x1xf32> to vector<256x1xf32>
    %44 = vector.broadcast %43 : vector<256x1xf32> to vector<256x256xf32>
    %45 = arith.addf %41, %44 : vector<256x256xf32>
    %cst_34 = arith.constant 0.000000e+00 : f32
    %46 = vector.broadcast %cst_34 : f32 to vector<256x256xf32>
    %47 = arith.maximumf %45, %46 : vector<256x256xf32>
    %48 = arith.truncf %47 : vector<256x256xf32> to vector<256x256xbf16>
    %c4 = arith.constant 4 : index
    %c0_35 = arith.constant 0 : index
    %c0_36 = arith.constant 0 : index
    %49 = vector.load %arg4[%c4, %c0_35, %c0_36] : memref<6x256x256xbf16, #tpu.memory_space<vmem>>, vector<1x256x256xbf16>
    %50 = vector.shape_cast %49 : vector<1x256x256xbf16> to vector<256x256xbf16>
    %cst_37 = arith.constant dense<0.000000e+00> : vector<256x256xf32>
    %51 = tpu.matmul %50, %48, %cst_37 {dimension_numbers = #tpu.dot_dimension_numbers<[1], [0], [0], [1], [0, 0, 1, 1], [], []>} : vector<256x256xbf16>, vector<256x256xbf16>, vector<256x256xf32> -> vector<256x256xf32>
    %c4_38 = arith.constant 4 : index
    %c0_39 = arith.constant 0 : index
    %c0_40 = arith.constant 0 : index
    %52 = vector.load %arg5[%c4_38, %c0_39, %c0_40] : memref<6x256x1xf32, #tpu.memory_space<vmem>>, vector<1x256x1xf32>
    %53 = vector.shape_cast %52 : vector<1x256x1xf32> to vector<256x1xf32>
    %54 = vector.broadcast %53 : vector<256x1xf32> to vector<256x256xf32>
    %55 = arith.addf %51, %54 : vector<256x256xf32>
    %cst_41 = arith.constant 0.000000e+00 : f32
    %56 = vector.broadcast %cst_41 : f32 to vector<256x256xf32>
    %57 = arith.maximumf %55, %56 : vector<256x256xf32>
    %58 = arith.truncf %57 : vector<256x256xf32> to vector<256x256xbf16>
    %c5 = arith.constant 5 : index
    %c0_42 = arith.constant 0 : index
    %c0_43 = arith.constant 0 : index
    %59 = vector.load %arg4[%c5, %c0_42, %c0_43] : memref<6x256x256xbf16, #tpu.memory_space<vmem>>, vector<1x256x256xbf16>
    %60 = vector.shape_cast %59 : vector<1x256x256xbf16> to vector<256x256xbf16>
    %cst_44 = arith.constant dense<0.000000e+00> : vector<256x256xf32>
    %61 = tpu.matmul %60, %58, %cst_44 {dimension_numbers = #tpu.dot_dimension_numbers<[1], [0], [0], [1], [0, 0, 1, 1], [], []>} : vector<256x256xbf16>, vector<256x256xbf16>, vector<256x256xf32> -> vector<256x256xf32>
    %c5_45 = arith.constant 5 : index
    %c0_46 = arith.constant 0 : index
    %c0_47 = arith.constant 0 : index
    %62 = vector.load %arg5[%c5_45, %c0_46, %c0_47] : memref<6x256x1xf32, #tpu.memory_space<vmem>>, vector<1x256x1xf32>
    %63 = vector.shape_cast %62 : vector<1x256x1xf32> to vector<256x1xf32>
    %64 = vector.broadcast %63 : vector<256x1xf32> to vector<256x256xf32>
    %65 = arith.addf %61, %64 : vector<256x256xf32>
    %cst_48 = arith.constant 0.000000e+00 : f32
    %66 = vector.broadcast %cst_48 : f32 to vector<256x256xf32>
    %67 = arith.maximumf %65, %66 : vector<256x256xf32>
    %68 = arith.truncf %67 : vector<256x256xf32> to vector<256x256xbf16>
    %c0_49 = arith.constant 0 : index
    %c0_50 = arith.constant 0 : index
    %69 = vector.load %arg6[%c0_49, %c0_50] : memref<8x256xbf16, #tpu.memory_space<vmem>>, vector<8x256xbf16>
    %cst_51 = arith.constant dense<0.000000e+00> : vector<8x256xf32>
    %70 = tpu.matmul %69, %68, %cst_51 {dimension_numbers = #tpu.dot_dimension_numbers<[1], [0], [0], [1], [0, 0, 1, 1], [], []>} : vector<8x256xbf16>, vector<256x256xbf16>, vector<8x256xf32> -> vector<8x256xf32>
    %c0_52 = arith.constant 0 : index
    %c0_53 = arith.constant 0 : index
    %71 = vector.load %arg7[%c0_52, %c0_53] : memref<8x1xf32, #tpu.memory_space<vmem>>, vector<8x1xf32>
    %72 = vector.broadcast %71 : vector<8x1xf32> to vector<8x256xf32>
    %73 = arith.addf %70, %72 : vector<8x256xf32>
    %c0_54 = arith.constant 0 : index
    %c0_55 = arith.constant 0 : index
    %74 = vector.load %arg8[%c0_54, %c0_55] : memref<8x256xf32, #tpu.memory_space<vmem>>, vector<8x256xf32>
    tpu.vector_store %arg8[%c0_54, %c0_55], %73 {strides = array<i32>} : memref<8x256xf32, #tpu.memory_space<vmem>>, vector<8x256xf32>,
    return
  }
  func.func @transform_0(%arg0: i32) -> (i32, i32) {
    %c0_i32 = arith.constant 0 : i32
    %c0_i32_0 = arith.constant 0 : i32
    return %c0_i32, %arg0 : i32, i32
  }
  func.func @transform_1(%arg0: i32) -> (i32, i32) {
    %c0_i32 = arith.constant 0 : i32
    %c0_i32_0 = arith.constant 0 : i32
    %c0_i32_1 = arith.constant 0 : i32
    return %c0_i32, %c0_i32_0 : i32, i32
  }
  func.func @transform_2(%arg0: i32) -> (i32, i32) {
    %c0_i32 = arith.constant 0 : i32
    %c0_i32_0 = arith.constant 0 : i32
    %c0_i32_1 = arith.constant 0 : i32
    return %c0_i32, %c0_i32_0 : i32, i32
  }
  func.func @transform_3(%arg0: i32) -> (i32, i32, i32) {
    %c0_i32 = arith.constant 0 : i32
    %c0_i32_0 = arith.constant 0 : i32
    %c0_i32_1 = arith.constant 0 : i32
    %c0_i32_2 = arith.constant 0 : i32
    return %c0_i32, %c0_i32_0, %c0_i32_1 : i32, i32, i32
  }
  func.func @transform_4(%arg0: i32) -> (i32, i32, i32) {
    %c0_i32 = arith.constant 0 : i32
    %c0_i32_0 = arith.constant 0 : i32
    %c0_i32_1 = arith.constant 0 : i32
    %c0_i32_2 = arith.constant 0 : i32
    return %c0_i32, %c0_i32_0, %c0_i32_1 : i32, i32, i32
  }
  func.func @transform_5(%arg0: i32) -> (i32, i32) {
    %c0_i32 = arith.constant 0 : i32
    %c0_i32_0 = arith.constant 0 : i32
    %c0_i32_1 = arith.constant 0 : i32
    return %c0_i32, %c0_i32_0 : i32, i32
  }
  func.func @transform_6(%arg0: i32) -> (i32, i32) {
    %c0_i32 = arith.constant 0 : i32
    %c0_i32_0 = arith.constant 0 : i32
    %c0_i32_1 = arith.constant 0 : i32
    return %c0_i32, %c0_i32_0 : i32, i32
  }
  func.func @transform_7(%arg0: i32) -> (i32, i32) {
    %c0_i32 = arith.constant 0 : i32
    %c0_i32_0 = arith.constant 0 : i32
    return %c0_i32, %arg0 : i32, i32
  }
}

</mosaic_0001>

<bundles_post_ra>
// kernel: net_forward.1
= control target key start
LH: loop header
LB: loop body
LE: loop exit
PB: predicated region body
PF: predicated region fallthrough
CT: control target
= control target key end

     0   :  { %v5736_v0 = vmov 0   ;;  %s7710_s2 = inlined_call_operand.vmem [shape: f32[256,1], index: 2, kind: input, shape index: {}]   ;;  %s7711_s0 = inlined_call_operand.vmem [shape: bf16[128,256], index: 0, kind: input, shape index: {}]   ;;  %s7712_s1 = inlined_call_operand.vmem [shape: bf16[256,128], index: 1, kind: input, shape index: {}]   ;;  %s7713_s4 = inlined_call_operand.vmem [shape: f32[6,256,1], index: 4, kind: input, shape index: {}]   ;;  %s7714_s3 = inlined_call_operand.vmem [shape: bf16[6,256,256], index: 3, kind: input, shape index: {}]   ;;  %s7715_s6 = inlined_call_operand.vmem [shape: f32[8,1], index: 6, kind: input, shape index: {}]   ;;  %s7716_s5 = inlined_call_operand.vmem [shape: bf16[8,256], index: 5, kind: input, shape index: {}]   ;;  %s7717_s7 = inlined_call_operand.vmem [shape: f32[8,256], index: 7, kind: output, shape index: {}]  }
   0x1   :  { %5405 = vset.pattern.permute.xlu1 %v5736_v0  ;;  %5404 = vset.pattern.permute.xlu0 %v5736_v0  ;;  %v77_v1 = vld [vmem:[%s7710_s2 + $0x10] sm:$0xff]  ;;  %v75_v2 = vld [vmem:[%s7710_s2] sm:$0xff]  ;;  %v78_v5 = vld [vmem:[%s7710_s2 + $0x18] sm:$0xff] }
   0x2   :  { %119 = vperm.xlu1 %5405, %v77_v1   ;;  %109 = vperm.xlu0 %5404, %v75_v2   ;;  %v5406_v3 = vld [vmem:[%s7711_s0 + $0x4] ss:$8 sps:$4 sm:$0xff]   ;;  %v5408_v4 = vld [vmem:[%s7711_s0] ss:$8 sps:$4 sm:$0xff]   ;;  %v5409_v7 = vld [vmem:[%s7711_s0 + $0x14] ss:$8 sps:$4 sm:$0xff]  }
   0x3   :  { %v76_v6 = vld [vmem:[%s7710_s2 + $0x8] sm:$0xff]  ;;  %475 = vmatprep.mubr.bf16.mxu0 %v5736_v0  ;;  %555 = vmatprep.mubr.bf16.mxu1 %v5736_v0  ;;  %v5411_v8 = vld [vmem:[%s7711_s0 + $0x10] ss:$8 sps:$4 sm:$0xff]   ;;  %v79_v10 = vld [vmem:[%s7710_s2 + $0x20] sm:$0xff] }
   0x4   :  { %443 = vmatprep.subr.bf16.mxu0 %v5406_v3  ;;  %5387 = vmatprep.subr.bf16.mxu1 %v5406_v3  ;;  %v80_v9 = vld [vmem:[%s7710_s2 + $0x28] sm:$0xff]  ;;  %v82_v13 = vld [vmem:[%s7710_s2 + $0x38] sm:$0xff]  ;;  %v81_v14 = vld [vmem:[%s7710_s2 + $0x30] sm:$0xff] }
   0x5   :  { %444 = vmatpush1.bf16.msra.mxu0 %v5408_v4  ;;  %5395 = vmatpush1.bf16.msra.mxu1 %v5408_v4  ;;  %v5412_v11 = vld [vmem:[%s7711_s0 + $0x24] ss:$8 sps:$4 sm:$0xff]   ;;  %v5414_v12 = vld [vmem:[%s7711_s0 + $0x20] ss:$8 sps:$4 sm:$0xff]   ;;  %v5415_v15 = vld [vmem:[%s7711_s0 + $0x34] ss:$8 sps:$4 sm:$0xff]  }
   0x6   :  { %124 = vperm.xlu1 %5405, %v78_v5   ;;  %114 = vperm.xlu0 %5404, %v76_v6   ;;  %v5417_v16 = vld [vmem:[%s7711_s0 + $0x30] ss:$8 sps:$4 sm:$0xff]   ;;  %v84_v17 = vld [vmem:[%s7710_s2 + $0x48] sm:$0xff]  ;;  %v83_v18 = vld [vmem:[%s7710_s2 + $0x40] sm:$0xff] }
   0x7   :  { %445 = vmatprep.subr.bf16.mxu0 %v5409_v7  ;;  %5388 = vmatprep.subr.bf16.mxu1 %v5409_v7  ;;  %v5418_v19 = vld [vmem:[%s7711_s0 + $0x44] ss:$8 sps:$4 sm:$0xff]   ;;  %v5420_v20 = vld [vmem:[%s7711_s0 + $0x40] ss:$8 sps:$4 sm:$0xff]   ;;  %v86_v21 = vld [vmem:[%s7710_s2 + $0x58] sm:$0xff] }
   0x8   :  { %v85_v22 = vld [vmem:[%s7710_s2 + $0x50] sm:$0xff]  ;;  %v88_v25 = vld [vmem:[%s7710_s2 + $0x68] sm:$0xff]  ;;  %v87_v26 = vld [vmem:[%s7710_s2 + $0x60] sm:$0xff] }
   0x9   :  { %446 = vmatpush1.bf16.msra.mxu0 %v5411_v8  ;;  %5396 = vmatpush1.bf16.msra.mxu1 %v5411_v8  ;;  %v5421_v23 = vld [vmem:[%s7711_s0 + $0x54] ss:$8 sps:$4 sm:$0xff]   ;;  %v5423_v24 = vld [vmem:[%s7711_s0 + $0x50] ss:$8 sps:$4 sm:$0xff]   ;;  %v5424_v27 = vld [vmem:[%s7711_s0 + $0x64] ss:$8 sps:$4 sm:$0xff]  }
   0xa   :  { %134 = vperm.xlu1 %5405, %v80_v9   ;;  %129 = vperm.xlu0 %5404, %v79_v10   ;;  %v5426_v28 = vld [vmem:[%s7711_s0 + $0x60] ss:$8 sps:$4 sm:$0xff]   ;;  %v90_v29 = vld [vmem:[%s7710_s2 + $0x78] sm:$0xff]  ;;  %v89_v30 = vld [vmem:[%s7710_s2 + $0x70] sm:$0xff] }
   0xb   :  { %447 = vmatprep.subr.bf16.mxu0 %v5412_v11  ;;  %5389 = vmatprep.subr.bf16.mxu1 %v5412_v11  ;;  %v5427_v31 = vld [vmem:[%s7711_s0 + $0x74] ss:$8 sps:$4 sm:$0xff]   ;;  %v5429_v32 = vld [vmem:[%s7711_s0 + $0x70] ss:$8 sps:$4 sm:$0xff]   ;;  %v92_v33 = vld [vmem:[%s7710_s2 + $0x88] sm:$0xff] }
   0xc   :  { %v91_v34 = vld [vmem:[%s7710_s2 + $0x80] sm:$0xff]  ;;  %v94_v37 = vld [vmem:[%s7710_s2 + $0x98] sm:$0xff]  ;;  %v93_v38 = vld [vmem:[%s7710_s2 + $0x90] sm:$0xff] }
   0xd   :  { %448 = vmatpush1.bf16.msra.mxu0 %v5414_v12  ;;  %5397 = vmatpush1.bf16.msra.mxu1 %v5414_v12  ;;  %v5430_v35 = vld [vmem:[%s7712_s1] sm:$0xff]   ;;  %v96_v39 = vld [vmem:[%s7710_s2 + $0xa8] sm:$0xff]  ;;  %v98_v43 = vld [vmem:[%s7710_s2 + $0xb8] sm:$0xff] }
   0xe   :  { %144 = vperm.xlu1 %5405, %v82_v13   ;;  %139 = vperm.xlu0 %5404, %v81_v14   ;;  %v5431_v36 = vld [vmem:[%s7712_s1 + $0x40] sm:$0xff]   ;;  %v5432_v41 = vld [vmem:[%s7712_s1 + $0x8] sm:$0xff]   ;;  %v97_v44 = vld [vmem:[%s7710_s2 + $0xb0] sm:$0xff] }
   0xf   :  { %449 = vmatprep.subr.bf16.mxu0 %v5415_v15  ;;  %5390 = vmatprep.subr.bf16.mxu1 %v5415_v15  ;;  %v95_v40 = vld [vmem:[%s7710_s2 + $0xa0] sm:$0xff]  ;;  %v5433_v42 = vld [vmem:[%s7712_s1 + $0x48] sm:$0xff]   ;;  %v5434_v47 = vld [vmem:[%s7712_s1 + $0x10] sm:$0xff]  }
  0x10   :  { %v100_v45 = vld [vmem:[%s7710_s2 + $0xc8] sm:$0xff]  ;;  %v99_v46 = vld [vmem:[%s7710_s2 + $0xc0] sm:$0xff]  ;;  %v5435_v48 = vld [vmem:[%s7712_s1 + $0x50] sm:$0xff]  }
  0x11   :  { %450 = vmatpush1.bf16.msra.mxu0 %v5417_v16  ;;  %5398 = vmatpush1.bf16.msra.mxu1 %v5417_v16  ;;  %v102_v49 = vld [vmem:[%s7710_s2 + $0xd8] sm:$0xff]  ;;  %v101_v50 = vld [vmem:[%s7710_s2 + $0xd0] sm:$0xff]  ;;  %v104_v51 = vld [vmem:[%s7710_s2 + $0xe8] sm:$0xff] }
  0x12   :  { %154 = vperm.xlu1 %5405, %v84_v17   ;;  %149 = vperm.xlu0 %5404, %v83_v18   ;;  %v103_v52 = vld [vmem:[%s7710_s2 + $0xe0] sm:$0xff]  ;;  %v5436_v53 = vld [vmem:[%s7712_s1 + $0x18] sm:$0xff]   ;;  %v105_v56 = vld [vmem:[%s7710_s2 + $0xf0] sm:$0xff] }
  0x13   :  { %451 = vmatprep.subr.bf16.mxu0 %v5418_v19  ;;  %5391 = vmatprep.subr.bf16.mxu1 %v5418_v19  ;;  %v5437_v54 = vld [vmem:[%s7712_s1 + $0x58] sm:$0xff]   ;;  %v765_v57 = vld [vmem:[%s7713_s4 + $0x8] sm:$0xff]  ;;  %v764_v58 = vld [vmem:[%s7713_s4] sm:$0xff] }
  0x14   :  { %v106_v55 = vld [vmem:[%s7710_s2 + $0xf8] sm:$0xff]  ;;  %v5438_v59 = vld [vmem:[%s7712_s1 + $0x20] sm:$0xff]   ;;  %v766_v62 = vld [vmem:[%s7713_s4 + $0x10] sm:$0xff] }
  0x15   :  { %452 = vmatpush1.bf16.msra.mxu0 %v5420_v20  ;;  %5399 = vmatpush1.bf16.msra.mxu1 %v5420_v20  ;;  %v5439_v60 = vld [vmem:[%s7712_s1 + $0x60] sm:$0xff]   ;;  %v767_v61 = vld [vmem:[%s7713_s4 + $0x18] sm:$0xff]  ;;  %v769_v63 = vld [vmem:[%s7713_s4 + $0x28] sm:$0xff] }
  0x16   :  { %164 = vperm.xlu1 %5405, %v86_v21   ;;  %159 = vperm.xlu0 %5404, %v85_v22   ;;  %v768_v1 = vld [vmem:[%s7713_s4 + $0x20] sm:$0xff]  ;;  %v5440_v2 = vld [vmem:[%s7712_s1 + $0x28] sm:$0xff]   ;;  %v771_v4 = vld [vmem:[%s7713_s4 + $0x38] sm:$0xff] }
  0x17   :  { %453 = vmatprep.subr.bf16.mxu0 %v5421_v23  ;;  %5392 = vmatprep.subr.bf16.mxu1 %v5421_v23  ;;  %v5441_v3 = vld [vmem:[%s7712_s1 + $0x68] sm:$0xff]   ;;  %v770_v5 = vld [vmem:[%s7713_s4 + $0x30] sm:$0xff]  ;;  %v772_v7 = vld [vmem:[%s7713_s4 + $0x40] sm:$0xff] }
  0x18   :  { %v773_v6 = vld [vmem:[%s7713_s4 + $0x48] sm:$0xff]  ;;  %v5442_v8 = vld [vmem:[%s7712_s1 + $0x30] sm:$0xff]   ;;  %v775_v10 = vld [vmem:[%s7713_s4 + $0x58] sm:$0xff] }
  0x19   :  { %454 = vmatpush1.bf16.msra.mxu0 %v5423_v24  ;;  %5400 = vmatpush1.bf16.msra.mxu1 %v5423_v24  ;;  %v5443_v9 = vld [vmem:[%s7712_s1 + $0x70] sm:$0xff]   ;;  %v777_v12 = vld [vmem:[%s7713_s4 + $0x68] sm:$0xff]  ;;  %v776_v13 = vld [vmem:[%s7713_s4 + $0x60] sm:$0xff] }
  0x1a   :  { %174 = vperm.xlu1 %5405, %v88_v25   ;;  %169 = vperm.xlu0 %5404, %v87_v26   ;;  %v774_v11 = vld [vmem:[%s7713_s4 + $0x50] sm:$0xff]  ;;  %v5444_v14 = vld [vmem:[%s7712_s1 + $0x38] sm:$0xff]   ;;  %v781_v17 = vld [vmem:[%s7713_s4 + $0x88] sm:$0xff] }
  0x1b   :  { %455 = vmatprep.subr.bf16.mxu0 %v5424_v27  ;;  %5393 = vmatprep.subr.bf16.mxu1 %v5424_v27  ;;  %v5445_v15 = vld [vmem:[%s7712_s1 + $0x78] sm:$0xff]   ;;  %v778_v16 = vld [vmem:[%s7713_s4 + $0x70] sm:$0xff]  ;;  %v780_v18 = vld [vmem:[%s7713_s4 + $0x80] sm:$0xff] }
  0x1c   :  { %v783_v19 = vld [vmem:[%s7713_s4 + $0x98] sm:$0xff]  ;;  %v782_v20 = vld [vmem:[%s7713_s4 + $0x90] sm:$0xff]  ;;  %v785_v21 = vld [vmem:[%s7713_s4 + $0xa8] sm:$0xff] }
  0x1d   :  { %456 = vmatpush1.bf16.msra.mxu0 %v5426_v28  ;;  %5401 = vmatpush1.bf16.msra.mxu1 %v5426_v28  ;;  %v784_v22 = vld [vmem:[%s7713_s4 + $0xa0] sm:$0xff]  ;;  %v787_v23 = vld [vmem:[%s7713_s4 + $0xb8] sm:$0xff]  ;;  %v786_v24 = vld [vmem:[%s7713_s4 + $0xb0] sm:$0xff] }
  0x1e   :  { %184 = vperm.xlu1 %5405, %v90_v29   ;;  %179 = vperm.xlu0 %5404, %v89_v30   ;;  %v789_v25 = vld [vmem:[%s7713_s4 + $0xc8] sm:$0xff]  ;;  %v788_v26 = vld [vmem:[%s7713_s4 + $0xc0] sm:$0xff]  ;;  %v791_v27 = vld [vmem:[%s7713_s4 + $0xd8] sm:$0xff] }
  0x1f   :  { %457 = vmatprep.subr.bf16.mxu0 %v5427_v31  ;;  %5394 = vmatprep.subr.bf16.mxu1 %v5427_v31  ;;  %v790_v28 = vld [vmem:[%s7713_s4 + $0xd0] sm:$0xff]  ;;  %v793_v29 = vld [vmem:[%s7713_s4 + $0xe8] sm:$0xff]  ;;  %v792_v30 = vld [vmem:[%s7713_s4 + $0xe0] sm:$0xff] }
  0x20   :  { %v795_v31 = vld [vmem:[%s7713_s4 + $0xf8] sm:$0xff] }
  0x21   :  { %458 = vmatpush1.bf16.msra.mxu0 %v5429_v32  ;;  %5402 = vmatpush1.bf16.msra.mxu1 %v5429_v32  ;;  %v794_v32 = vld [vmem:[%s7713_s4 + $0xf0] sm:$0xff] }
  0x22   :  { %194 = vperm.xlu1 %5405, %v92_v33   ;;  %189 = vperm.xlu0 %5404, %v91_v34   ;;  %v4938_v33 = vld [vmem:[%s7713_s4 + $0x108] sm:$0xff]  ;;  %v4937_v34 = vld [vmem:[%s7713_s4 + $0x100] sm:$0xff] }
  0x24   :  { %476 = vmatmul.mubr.bf16.vlgmr.msra.gmra.mrb[0].mxu0 %v5430_v35  ;;  %556 = vmatmul.mubr.bf16.vlgmr.msra.gmra.mrb[0].mxu1 %v5431_v36 }
  0x25   :  { %485 = vmatprep.mubr.bf16.mxu0 %v5736_v0  ;;  %565 = vmatprep.mubr.bf16.mxu1 %v5736_v0 }
  0x26   :  { %204 = vperm.xlu1 %5405, %v94_v37   ;;  %199 = vperm.xlu0 %5404, %v93_v38   ;;  %v4940_v37 = vld [vmem:[%s7713_s4 + $0x118] sm:$0xff]  ;;  %v4939_v38 = vld [vmem:[%s7713_s4 + $0x110] sm:$0xff] }
  0x2a   :  { %214 = vperm.xlu1 %5405, %v96_v39   ;;  %209 = vperm.xlu0 %5404, %v95_v40  }
  0x2c   :  { %486 = vmatmul.mubr.bf16.gmra.mrb[4].mxu0 %v5432_v41  ;;  %566 = vmatmul.mubr.bf16.gmra.mrb[4].mxu1 %v5433_v42  ;;  %v4942_v41 = vld [vmem:[%s7713_s4 + $0x128] sm:$0xff]  ;;  %v4941_v42 = vld [vmem:[%s7713_s4 + $0x120] sm:$0xff] }
  0x2d   :  { %495 = vmatprep.mubr.bf16.mxu0 %v5736_v0  ;;  %575 = vmatprep.mubr.bf16.mxu1 %v5736_v0 }
  0x2e   :  { %224 = vperm.xlu1 %5405, %v98_v43   ;;  %219 = vperm.xlu0 %5404, %v97_v44  }
  0x32   :  { %234 = vperm.xlu1 %5405, %v100_v45   ;;  %229 = vperm.xlu0 %5404, %v99_v46   ;;  %v4944_v45 = vld [vmem:[%s7713_s4 + $0x138] sm:$0xff]  ;;  %v4943_v46 = vld [vmem:[%s7713_s4 + $0x130] sm:$0xff] }
  0x34   :  { %496 = vmatmul.mubr.bf16.gmra.mrb[8].mxu0 %v5434_v47  ;;  %576 = vmatmul.mubr.bf16.gmra.mrb[8].mxu1 %v5435_v48 }
  0x35   :  { %505 = vmatprep.mubr.bf16.mxu0 %v5736_v0  ;;  %585 = vmatprep.mubr.bf16.mxu1 %v5736_v0 }
  0x36   :  { %244 = vperm.xlu1 %5405, %v102_v49   ;;  %239 = vperm.xlu0 %5404, %v101_v50   ;;  %v4946_v49 = vld [vmem:[%s7713_s4 + $0x148] sm:$0xff]  ;;  %v4945_v50 = vld [vmem:[%s7713_s4 + $0x140] sm:$0xff] }
  0x3a   :  { %254 = vperm.xlu1 %5405, %v104_v51   ;;  %249 = vperm.xlu0 %5404, %v103_v52  }
  0x3c   :  { %506 = vmatmul.mubr.bf16.gmra.mrb[12].mxu0 %v5436_v53  ;;  %586 = vmatmul.mubr.bf16.gmra.mrb[12].mxu1 %v5437_v54  ;;  %v4948_v53 = vld [vmem:[%s7713_s4 + $0x158] sm:$0xff]  ;;  %v4947_v54 = vld [vmem:[%s7713_s4 + $0x150] sm:$0xff] }
  0x3d   :  { %515 = vmatprep.mubr.bf16.mxu0 %v5736_v0  ;;  %595 = vmatprep.mubr.bf16.mxu1 %v5736_v0 }
  0x3e   :  { %264 = vperm.xlu1 %5405, %v106_v55   ;;  %259 = vperm.xlu0 %5404, %v105_v56  }
  0x42   :  { %803 = vperm.xlu1 %5405, %v765_v57   ;;  %798 = vperm.xlu0 %5404, %v764_v58   ;;  %v4950_v57 = vld [vmem:[%s7713_s4 + $0x168] sm:$0xff]  ;;  %v4949_v58 = vld [vmem:[%s7713_s4 + $0x160] sm:$0xff] }
  0x44   :  { %516 = vmatmul.mubr.bf16.gmra.mrb[16].mxu0 %v5438_v59  ;;  %596 = vmatmul.mubr.bf16.gmra.mrb[16].mxu1 %v5439_v60 }
  0x45   :  { %525 = vmatprep.mubr.bf16.mxu0 %v5736_v0  ;;  %605 = vmatprep.mubr.bf16.mxu1 %v5736_v0 }
  0x46   :  { %813 = vperm.xlu1 %5405, %v767_v61   ;;  %808 = vperm.xlu0 %5404, %v766_v62   ;;  %v4952_v61 = vld [vmem:[%s7713_s4 + $0x178] sm:$0xff]  ;;  %v4951_v62 = vld [vmem:[%s7713_s4 + $0x170] sm:$0xff] }
  0x4a   :  { %823 = vperm.xlu1 %5405, %v769_v63   ;;  %818 = vperm.xlu0 %5404, %v768_v1  }
  0x4c   :  { %526 = vmatmul.mubr.bf16.gmra.mrb[20].mxu0 %v5440_v2  ;;  %606 = vmatmul.mubr.bf16.gmra.mrb[20].mxu1 %v5441_v3  ;;  %v4954_v2 = vld [vmem:[%s7713_s4 + $0x188] sm:$0xff]  ;;  %v4953_v3 = vld [vmem:[%s7713_s4 + $0x180] sm:$0xff] }
  0x4d   :  { %535 = vmatprep.mubr.bf16.mxu0 %v5736_v0  ;;  %615 = vmatprep.mubr.bf16.mxu1 %v5736_v0 }
  0x4e   :  { %833 = vperm.xlu1 %5405, %v771_v4   ;;  %828 = vperm.xlu0 %5404, %v770_v5  }
  0x52   :  { %843 = vperm.xlu1 %5405, %v773_v6   ;;  %838 = vperm.xlu0 %5404, %v772_v7   ;;  %v4956_v6 = vld [vmem:[%s7713_s4 + $0x198] sm:$0xff]  ;;  %v4955_v7 = vld [vmem:[%s7713_s4 + $0x190] sm:$0xff] }
  0x54   :  { %536 = vmatmul.mubr.bf16.gmra.mrb[24].mxu0 %v5442_v8  ;;  %616 = vmatmul.mubr.bf16.gmra.mrb[24].mxu1 %v5443_v9 }
  0x55   :  { %545 = vmatprep.mubr.bf16.mxu0 %v5736_v0  ;;  %625 = vmatprep.mubr.bf16.mxu1 %v5736_v0  ;;  %v779_v0 = vld [vmem:[%s7713_s4 + $0x78] sm:$0xff] }
  0x56   :  { %853 = vperm.xlu1 %5405, %v775_v10   ;;  %848 = vperm.xlu0 %5404, %v774_v11   ;;  %v4958_v10 = vld [vmem:[%s7713_s4 + $0x1a8] sm:$0xff]  ;;  %v4957_v11 = vld [vmem:[%s7713_s4 + $0x1a0] sm:$0xff] }
  0x5a   :  { %863 = vperm.xlu1 %5405, %v777_v12   ;;  %858 = vperm.xlu0 %5404, %v776_v13  }
  0x5c   :  { %546 = vmatmul.mubr.bf16.gmra.mrb[28].mxu0 %v5444_v14  ;;  %626 = vmatmul.mubr.bf16.gmra.mrb[28].mxu1 %v5445_v15  ;;  %v4960_v14 = vld [vmem:[%s7713_s4 + $0x1b8] sm:$0xff]  ;;  %v4959_v15 = vld [vmem:[%s7713_s4 + $0x1b0] sm:$0xff] }
  0x5e   :  { %873 = vperm.xlu1 %5405, %v779_v0   ;;  %868 = vperm.xlu0 %5404, %v778_v16  }
  0x62   :  { %883 = vperm.xlu1 %5405, %v781_v17   ;;  %878 = vperm.xlu0 %5404, %v780_v18   ;;  %v4962_v17 = vld [vmem:[%s7713_s4 + $0x1c8] sm:$0xff]  ;;  %v4961_v18 = vld [vmem:[%s7713_s4 + $0x1c0] sm:$0xff] }
  0x66   :  { %893 = vperm.xlu1 %5405, %v783_v19   ;;  %888 = vperm.xlu0 %5404, %v782_v20  }
  0x6a   :  { %903 = vperm.xlu1 %5405, %v785_v21   ;;  %898 = vperm.xlu0 %5404, %v784_v22   ;;  %v4964_v21 = vld [vmem:[%s7713_s4 + $0x1d8] sm:$0xff]  ;;  %v4963_v22 = vld [vmem:[%s7713_s4 + $0x1d0] sm:$0xff] }
  0x6e   :  { %913 = vperm.xlu1 %5405, %v787_v23   ;;  %908 = vperm.xlu0 %5404, %v786_v24  }
  0x72   :  { %923 = vperm.xlu1 %5405, %v789_v25   ;;  %918 = vperm.xlu0 %5404, %v788_v26   ;;  %v4966_v25 = vld [vmem:[%s7713_s4 + $0x1e8] sm:$0xff]  ;;  %v4965_v26 = vld [vmem:[%s7713_s4 + $0x1e0] sm:$0xff] }
  0x76   :  { %933 = vperm.xlu1 %5405, %v791_v27   ;;  %928 = vperm.xlu0 %5404, %v790_v28  }
  0x7a   :  { %943 = vperm.xlu1 %5405, %v793_v29   ;;  %938 = vperm.xlu0 %5404, %v792_v30   ;;  %v4968_v29 = vld [vmem:[%s7713_s4 + $0x1f8] sm:$0xff]  ;;  %v4967_v30 = vld [vmem:[%s7713_s4 + $0x1f0] sm:$0xff] }
  0x7e   :  { %953 = vperm.xlu1 %5405, %v795_v31   ;;  %948 = vperm.xlu0 %5404, %v794_v32  }
  0x81   :  { %v6089_v35 = vpop.permute.xlu1 %119  ;;  %v6091_v36 = vpop.permute.xlu0 %109 }
  0x82   :  { %1478 = vperm.xlu1 %5405, %v4938_v33   ;;  %1473 = vperm.xlu0 %5404, %v4937_v34   ;;  %v5034_v33 = vld [vmem:[%s7713_s4 + $0x208] sm:$0xff]  ;;  %v5033_v34 = vld [vmem:[%s7713_s4 + $0x200] sm:$0xff] }
  0x85   :  { %v6099_v39 = vpop.permute.xlu1 %124  ;;  %v6101_v40 = vpop.permute.xlu0 %114 }
  0x86   :  { %1488 = vperm.xlu1 %5405, %v4940_v37   ;;  %1483 = vperm.xlu0 %5404, %v4939_v38  }
  0x89   :  { %v6109_v43 = vpop.permute.xlu1 %134  ;;  %v6111_v44 = vpop.permute.xlu0 %129 }
  0x8a   :  { %1498 = vperm.xlu1 %5405, %v4942_v41   ;;  %1493 = vperm.xlu0 %5404, %v4941_v42   ;;  %v5036_v41 = vld [vmem:[%s7713_s4 + $0x218] sm:$0xff]  ;;  %v5035_v42 = vld [vmem:[%s7713_s4 + $0x210] sm:$0xff] }
  0x8d   :  { %v6119_v47 = vpop.permute.xlu1 %144  ;;  %v6121_v48 = vpop.permute.xlu0 %139 }
  0x8e   :  { %1508 = vperm.xlu1 %5405, %v4944_v45   ;;  %1503 = vperm.xlu0 %5404, %v4943_v46  }
  0x91   :  { %v6129_v51 = vpop.permute.xlu1 %154  ;;  %v6131_v52 = vpop.permute.xlu0 %149 }
  0x92   :  { %1518 = vperm.xlu1 %5405, %v4946_v49   ;;  %1513 = vperm.xlu0 %5404, %v4945_v50   ;;  %v5038_v49 = vld [vmem:[%s7713_s4 + $0x228] sm:$0xff]  ;;  %v5037_v50 = vld [vmem:[%s7713_s4 + $0x220] sm:$0xff] }
  0x95   :  { %v6139_v55 = vpop.permute.xlu1 %164  ;;  %v6141_v56 = vpop.permute.xlu0 %159 }
  0x96   :  { %1528 = vperm.xlu1 %5405, %v4948_v53   ;;  %1523 = vperm.xlu0 %5404, %v4947_v54  }
  0x99   :  { %v6149_v59 = vpop.permute.xlu1 %174  ;;  %v6151_v60 = vpop.permute.xlu0 %169 }
  0x9a   :  { %1538 = vperm.xlu1 %5405, %v4950_v57   ;;  %1533 = vperm.xlu0 %5404, %v4949_v58   ;;  %v5040_v57 = vld [vmem:[%s7713_s4 + $0x238] sm:$0xff]  ;;  %v5039_v58 = vld [vmem:[%s7713_s4 + $0x230] sm:$0xff] }
  0x9d   :  { %v6159_v63 = vpop.permute.xlu1 %184  ;;  %v6161_v1 = vpop.permute.xlu0 %179 }
  0x9e   :  { %1548 = vperm.xlu1 %5405, %v4952_v61   ;;  %1543 = vperm.xlu0 %5404, %v4951_v62  }
  0xa1   :  { %v6169_v4 = vpop.permute.xlu1 %194  ;;  %v6171_v5 = vpop.permute.xlu0 %189 }
  0xa2   :  { %1558 = vperm.xlu1 %5405, %v4954_v2   ;;  %1553 = vperm.xlu0 %5404, %v4953_v3   ;;  %v5042_v2 = vld [vmem:[%s7713_s4 + $0x248] sm:$0xff]  ;;  %v5041_v3 = vld [vmem:[%s7713_s4 + $0x240] sm:$0xff] }
  0xa5   :  { %v6179_v8 = vpop.permute.xlu1 %204  ;;  %v6181_v9 = vpop.permute.xlu0 %199 }
  0xa6   :  { %1568 = vperm.xlu1 %5405, %v4956_v6   ;;  %1563 = vperm.xlu0 %5404, %v4955_v7  }
  0xa9   :  { %v6189_v12 = vpop.permute.xlu1 %214  ;;  %v6191_v13 = vpop.permute.xlu0 %209 }
  0xaa   :  { %1578 = vperm.xlu1 %5405, %v4958_v10   ;;  %1573 = vperm.xlu0 %5404, %v4957_v11   ;;  %v5044_v10 = vld [vmem:[%s7713_s4 + $0x258] sm:$0xff]  ;;  %v5043_v11 = vld [vmem:[%s7713_s4 + $0x250] sm:$0xff] }
  0xad   :  { %v6199_v0 = vpop.permute.xlu1 %224  ;;  %v6201_v16 = vpop.permute.xlu0 %219 }
  0xae   :  { %1588 = vperm.xlu1 %5405, %v4960_v14   ;;  %1583 = vperm.xlu0 %5404, %v4959_v15  }
  0xb1   :  { %v6209_v19 = vpop.permute.xlu1 %234  ;;  %v6211_v20 = vpop.permute.xlu0 %229 }
  0xb2   :  { %1598 = vperm.xlu1 %5405, %v4962_v17   ;;  %1593 = vperm.xlu0 %5404, %v4961_v18   ;;  %v5046_v17 = vld [vmem:[%s7713_s4 + $0x268] sm:$0xff]  ;;  %v5045_v18 = vld [vmem:[%s7713_s4 + $0x260] sm:$0xff] }
  0xb5   :  { %v6219_v23 = vpop.permute.xlu1 %244  ;;  %v6221_v24 = vpop.permute.xlu0 %239 }
  0xb6   :  { %1608 = vperm.xlu1 %5405, %v4964_v21   ;;  %1603 = vperm.xlu0 %5404, %v4963_v22  }
  0xb9   :  { %v6229_v27 = vpop.permute.xlu1 %254  ;;  %v6231_v28 = vpop.permute.xlu0 %249 }
  0xba   :  { %1618 = vperm.xlu1 %5405, %v4966_v25   ;;  %1613 = vperm.xlu0 %5404, %v4965_v26   ;;  %v5048_v25 = vld [vmem:[%s7713_s4 + $0x278] sm:$0xff]  ;;  %v5047_v26 = vld [vmem:[%s7713_s4 + $0x270] sm:$0xff] }
  0xbd   :  { %v6239_v31 = vpop.permute.xlu1 %264  ;;  %v6241_v32 = vpop.permute.xlu0 %259 }
  0xbe   :  { %1628 = vperm.xlu1 %5405, %v4968_v29   ;;  %1623 = vperm.xlu0 %5404, %v4967_v30   ;;  %v5448_v29 = vld [vmem:[%s7714_s3 + $0x4] ss:$8 sps:$4 sm:$0xff]  }
  0xbf   :  { %1148 = vmatprep.mubr.bf16.mxu1 %v5448_v29 }
  0xc1   :  { %v6249_v37 = vpop.permute.xlu1 %803  ;;  %v6251_v38 = vpop.permute.xlu0 %798 }
  0xc2   :  { %2153 = vperm.xlu1 %5405, %v5034_v33   ;;  %2148 = vperm.xlu0 %5404, %v5033_v34   ;;  %v5050_v34 = vld [vmem:[%s7713_s4 + $0x288] sm:$0xff] }
  0xc5   :  { %v6259_v45 = vpop.permute.xlu1 %813  ;;  %v6261_v46 = vpop.permute.xlu0 %808 }
  0xc6   :  { %2163 = vperm.xlu1 %5405, %v5036_v41   ;;  %2158 = vperm.xlu0 %5404, %v5035_v42   ;;  %v5049_v41 = vld [vmem:[%s7713_s4 + $0x280] sm:$0xff] }
  0xc9   :  { %v6269_v53 = vpop.permute.xlu1 %823  ;;  %v6271_v54 = vpop.permute.xlu0 %818 }
  0xca   :  { %2173 = vperm.xlu1 %5405, %v5038_v49   ;;  %2168 = vperm.xlu0 %5404, %v5037_v50   ;;  %v5052_v50 = vld [vmem:[%s7713_s4 + $0x298] sm:$0xff] }
  0xcd   :  { %v6279_v61 = vpop.permute.xlu1 %833  ;;  %v6281_v62 = vpop.permute.xlu0 %828 }
  0xce   :  { %2183 = vperm.xlu1 %5405, %v5040_v57   ;;  %2178 = vperm.xlu0 %5404, %v5039_v58   ;;  %v5051_v57 = vld [vmem:[%s7713_s4 + $0x290] sm:$0xff] }
  0xd1   :  { %v6289_v6 = vpop.permute.xlu1 %843  ;;  %v6291_v7 = vpop.permute.xlu0 %838 }
  0xd2   :  { %2193 = vperm.xlu1 %5405, %v5042_v2   ;;  %2188 = vperm.xlu0 %5404, %v5041_v3   ;;  %v5054_v3 = vld [vmem:[%s7713_s4 + $0x2a8] sm:$0xff] }
  0xd5   :  { %v6299_v14 = vpop.permute.xlu1 %853  ;;  %v6301_v15 = vpop.permute.xlu0 %848 }
  0xd6   :  { %2203 = vperm.xlu1 %5405, %v5044_v10   ;;  %2198 = vperm.xlu0 %5404, %v5043_v11   ;;  %v5053_v10 = vld [vmem:[%s7713_s4 + $0x2a0] sm:$0xff] }
  0xd9   :  { %v6309_v21 = vpop.permute.xlu1 %863  ;;  %v6311_v22 = vpop.permute.xlu0 %858 }
  0xda   :  { %7767 = vst [vmem:[#allocation2_spill] sm:$0xff] %v6309_v21  ;;  %7768 = vst [vmem:[#allocation3_spill] sm:$0xff] %v6311_v22  ;;  %2213 = vperm.xlu1 %5405, %v5046_v17   ;;  %2208 = vperm.xlu0 %5404, %v5045_v18   ;;  %v5056_v18 = vld [vmem:[%s7713_s4 + $0x2b8] sm:$0xff] }
  0xdd   :  { %v6322_v30 = vpop.permute.xlu1 %873  ;;  %v6324_v33 = vpop.permute.xlu0 %868 }
  0xde   :  { %7769 = vst [vmem:[#allocation4_spill] sm:$0xff] %v6322_v30  ;;  %7770 = vst [vmem:[#allocation5_spill] sm:$0xff] %v6324_v33  ;;  %2223 = vperm.xlu1 %5405, %v5048_v25   ;;  %2218 = vperm.xlu0 %5404, %v5047_v26   ;;  %v5055_v25 = vld [vmem:[%s7713_s4 + $0x2b0] sm:$0xff] }
  0xe1   :  { %v6332_v42 = vpop.permute.xlu1 %883  ;;  %v6334_v49 = vpop.permute.xlu0 %878 }
  0xe2   :  { %7771 = vst [vmem:[#allocation6_spill] sm:$0xff] %v6332_v42  ;;  %7772 = vst [vmem:[#allocation7_spill] sm:$0xff] %v6334_v49  ;;  %2233 = vperm.xlu1 %5405, %v5050_v34   ;;  %2228 = vperm.xlu0 %5404, %v5049_v41   ;;  %v5058_v34 = vld [vmem:[%s7713_s4 + $0x2c8] sm:$0xff]  ;;  %v5057_v41 = vld [vmem:[%s7713_s4 + $0x2c0] sm:$0xff] }
  0xe5   :  { %v6342_v58 = vpop.permute.xlu1 %893  ;;  %v6344_v2 = vpop.permute.xlu0 %888 }
  0xe6   :  { %7773 = vst [vmem:[#allocation8_spill] sm:$0xff] %v6342_v58  ;;  %7774 = vst [vmem:[#allocation9_spill] sm:$0xff] %v6344_v2  ;;  %2243 = vperm.xlu1 %5405, %v5052_v50   ;;  %2238 = vperm.xlu0 %5404, %v5051_v57  }
  0xe9   :  { %v6352_v11 = vpop.permute.xlu1 %903  ;;  %v6354_v17 = vpop.permute.xlu0 %898 }
  0xea   :  { %7775 = vst [vmem:[#allocation10_spill] sm:$0xff] %v6352_v11  ;;  %7776 = vst [vmem:[#allocation11_spill] sm:$0xff] %v6354_v17  ;;  %2253 = vperm.xlu1 %5405, %v5054_v3   ;;  %2248 = vperm.xlu0 %5404, %v5053_v10   ;;  %v5060_v3 = vld [vmem:[%s7713_s4 + $0x2d8] sm:$0xff]  ;;  %v5059_v10 = vld [vmem:[%s7713_s4 + $0x2d0] sm:$0xff] }
  0xed   :  { %v6362_v26 = vpop.permute.xlu1 %913  ;;  %v6364_v29 = vpop.permute.xlu0 %908 }
  0xee   :  { %7777 = vst [vmem:[#allocation12_spill] sm:$0xff] %v6362_v26  ;;  %7778 = vst [vmem:[#allocation13_spill] sm:$0xff] %v6364_v29  ;;  %2263 = vperm.xlu1 %5405, %v5056_v18   ;;  %2258 = vperm.xlu0 %5404, %v5055_v25  }
  0xf1   :  { %v6372_v50 = vpop.permute.xlu1 %923  ;;  %v6374_v57 = vpop.permute.xlu0 %918 }
  0xf2   :  { %7779 = vst [vmem:[#allocation14_spill] sm:$0xff] %v6372_v50  ;;  %7780 = vst [vmem:[#allocation15_spill] sm:$0xff] %v6374_v57  ;;  %2273 = vperm.xlu1 %5405, %v5058_v34   ;;  %2268 = vperm.xlu0 %5404, %v5057_v41   ;;  %v5062_v50 = vld [vmem:[%s7713_s4 + $0x2e8] sm:$0xff]  ;;  %v5061_v34 = vld [vmem:[%s7713_s4 + $0x2e0] sm:$0xff] }
  0xf5   :  { %v6382_v18 = vpop.permute.xlu1 %933  ;;  %v6384_v25 = vpop.permute.xlu0 %928 }
  0xf6   :  { %7781 = vst [vmem:[#allocation16_spill] sm:$0xff] %v6382_v18  ;;  %7782 = vst [vmem:[#allocation17_spill] sm:$0xff] %v6384_v25  ;;  %2283 = vperm.xlu1 %5405, %v5060_v3   ;;  %2278 = vperm.xlu0 %5404, %v5059_v10  }
  0xf7   :  { %v477_v41 = vpop.f32.mrb[0].mxu0  ;;  %v557_v57 = vpop.f32.mrb[0].mxu1 }
  0xf8   :  { %v479_v26 = vpop.f32.mrb[1].mxu0  ;;  %v558_v29 = vadd.f32 %v557_v57, %v6171_v5  ;;  %v559_v11 = vpop.f32.mrb[1].mxu1  ;;  %v478_v18 = vadd.f32 %v477_v41, %v6091_v36  ;;  %v5064_v57 = vld [vmem:[%s7713_s4 + $0x2f8] sm:$0xff]  ;;  %v5063_v41 = vld [vmem:[%s7713_s4 + $0x2f0] sm:$0xff] }
  0xf9   :  { %v6394_v17 = vpop.permute.xlu1 %943  ;;  %v6396_v3 = vpop.permute.xlu0 %938  ;;  %v560_v10 = vadd.f32 %v559_v11, %v6171_v5  ;;  %v480_v25 = vadd.f32 %v479_v26, %v6091_v36 }
  0xfa   :  { %7783 = vst [vmem:[#allocation18_spill] sm:$0xff] %v6394_v17  ;;  %7784 = vst [vmem:[#allocation19_spill] sm:$0xff] %v6396_v3  ;;  %v481_v58 = vpop.f32.mrb[2].mxu0  ;;  %2293 = vperm.xlu1 %5405, %v5062_v50   ;;  %2288 = vperm.xlu0 %5404, %v5061_v34   ;;  %v561_v2 = vpop.f32.mrb[2].mxu1  ;;  %v668_v17 = vmax.f32 %v558_v29, 0.0  ;;  %v636_v34 = vmax.f32 %v478_v18, 0.0 }
  0xfb   :  { %v482_v42 = vadd.f32 %v481_v58, %v6101_v40  ;;  %v483_v49 = vpop.f32.mrb[3].mxu0  ;;  %v562_v5 = vadd.f32 %v561_v2, %v6169_v4  ;;  %v563_v11 = vpop.f32.mrb[3].mxu1  ;;  %v669_v26 = vmax.f32 %v560_v10, 0.0  ;;  %v637_v21 = vmax.f32 %v480_v25, 0.0  ;;  %v5130_v2 = vld [vmem:[%s7713_s4 + $0x308] sm:$0xff] }
  0xfc   :  { %v484_v36 = vadd.f32 %v483_v49, %v6101_v40  ;;  %v564_v50 = vadd.f32 %v563_v11, %v6169_v4  ;;  %v5129_v40 = vld [vmem:[%s7713_s4 + $0x300] sm:$0xff] }
  0xfd   :  { %v638_v58 = vmax.f32 %v482_v42, 0.0  ;;  %v6410_v3 = vpop.permute.xlu1 %953  ;;  %v6412_v30 = vpop.permute.xlu0 %948  ;;  %v670_v33 = vmax.f32 %v562_v5, 0.0 }
  0xfe   :  { %7785 = vst [vmem:[#allocation20_spill] sm:$0xff] %v6410_v3  ;;  %v639_v22 = vmax.f32 %v484_v36, 0.0  ;;  %2303 = vperm.xlu1 %5405, %v5064_v57   ;;  %2298 = vperm.xlu0 %5404, %v5063_v41   ;;  %v671_v4 = vmax.f32 %v564_v50, 0.0 }
  0xff   :  { %v700_v49 = vpack.c.bf16 %v638_v58, %v636_v34  ;;  %v487_v42 = vpop.f32.mrb[4].mxu0  ;;  %v6420_v29 = vpack.c.bf16 %v670_v33, %v668_v17  ;;  %v567_v18 = vpop.f32.mrb[4].mxu1 }
 0x100   :  { %v701_v10 = vpack.c.bf16 %v639_v22, %v637_v21  ;;  %v489_v5 = vpop.f32.mrb[5].mxu0  ;;  %v6422_v25 = vpack.c.bf16 %v671_v4, %v669_v26  ;;  %v568_v57 = vadd.f32 %v567_v18, %v6181_v9  ;;  %v569_v41 = vpop.f32.mrb[5].mxu1  ;;  %v488_v11 = vadd.f32 %v487_v42, %v6089_v35  ;;  %v5132_v26 = vld [vmem:[%s7713_s4 + $0x318] sm:$0xff] }
 0x101   :  { %v6426_v36 = vpop.permute.xlu1 %1478  ;;  %v6428_v3 = vpop.permute.xlu0 %1473  ;;  %v570_v50 = vadd.f32 %v569_v41, %v6181_v9  ;;  %v490_v34 = vadd.f32 %v489_v5, %v6089_v35  ;;  %v5131_v35 = vld [vmem:[%s7713_s4 + $0x310] sm:$0xff] }
 0x102   :  { %7786 = vst [vmem:[#allocation21_spill] sm:$0xff] %v6426_v36  ;;  %v491_v33 = vpop.f32.mrb[6].mxu0  ;;  %1116 = vmatprep.subr.bf16.mxu1 %v701_v10  ;;  %2828 = vperm.xlu1 %5405, %v5130_v2   ;;  %v571_v21 = vpop.f32.mrb[6].mxu1  ;;  %v672_v58 = vmax.f32 %v568_v57, 0.0 }
 0x103   :  { %v492_v22 = vadd.f32 %v491_v33, %v6099_v39  ;;  %2823 = vperm.xlu0 %5404, %v5129_v40   ;;  %v493_v17 = vpop.f32.mrb[7].mxu0  ;;  %1117 = vmatpush1.bf16.msra.mxu1 %v700_v49  ;;  %v572_v4 = vadd.f32 %v571_v21, %v6179_v8  ;;  %v573_v42 = vpop.f32.mrb[7].mxu1  ;;  %v673_v2 = vmax.f32 %v570_v50, 0.0  ;;  %v640_v40 = vmax.f32 %v488_v11, 0.0  ;;  %v5133_v50 = vld [vmem:[%s7713_s4 + $0x320] sm:$0xff] }
 0x104   :  { %v494_v9 = vadd.f32 %v493_v17, %v6099_v39  ;;  %v574_v18 = vadd.f32 %v573_v42, %v6179_v8  ;;  %v641_v41 = vmax.f32 %v490_v34, 0.0  ;;  %v5134_v39 = vld [vmem:[%s7713_s4 + $0x328] sm:$0xff] }
 0x105   :  { %v642_v10 = vmax.f32 %v492_v22, 0.0  ;;  %v6442_v49 = vpop.permute.xlu0 %1483  ;;  %v674_v5 = vmax.f32 %v572_v4, 0.0  ;;  %v6444_v57 = vpop.permute.xlu1 %1488 }
 0x106   :  { %7787 = vst [vmem:[#allocation22_spill] sm:$0xff] %v6442_v49  ;;  %v643_v33 = vmax.f32 %v494_v9, 0.0  ;;  %7788 = vst [vmem:[#allocation23_spill] sm:$0xff] %v6444_v57  ;;  %2838 = vperm.xlu1 %5405, %v5132_v26   ;;  %v675_v21 = vmax.f32 %v574_v18, 0.0 }
 0x107   :  { %v702_v8 = vpack.c.bf16 %v642_v10, %v640_v40  ;;  %2833 = vperm.xlu0 %5404, %v5131_v35   ;;  %v497_v11 = vpop.f32.mrb[8].mxu0  ;;  %v6452_v22 = vpack.c.bf16 %v674_v5, %v672_v58  ;;  %v577_v17 = vpop.f32.mrb[8].mxu1 }
 0x108   :  { %v703_v34 = vpack.c.bf16 %v643_v33, %v641_v41  ;;  %v499_v4 = vpop.f32.mrb[9].mxu0  ;;  %v6454_v42 = vpack.c.bf16 %v675_v21, %v673_v2  ;;  %v578_v26 = vadd.f32 %v577_v17, %v6191_v13  ;;  %v579_v9 = vpop.f32.mrb[9].mxu1  ;;  %v498_v57 = vadd.f32 %v497_v11, %v6111_v44  ;;  %v5136_v41 = vld [vmem:[%s7713_s4 + $0x338] sm:$0xff] }
 0x109   :  { %v6458_v49 = vpop.permute.xlu0 %1493  ;;  %v580_v36 = vadd.f32 %v579_v9, %v6191_v13  ;;  %v500_v18 = vadd.f32 %v499_v4, %v6111_v44  ;;  %v501_v35 = vpop.f32.mrb[10].mxu0 }
 0x10a   :  { %1118 = vmatprep.subr.bf16.mxu1 %v703_v34  ;;  %2848 = vperm.xlu1 %5405, %v5134_v39   ;;  %v581_v58 = vpop.f32.mrb[10].mxu1  ;;  %v502_v40 = vadd.f32 %v501_v35, %v6109_v43  ;;  %v503_v2 = vpop.f32.mrb[11].mxu0  ;;  %v676_v10 = vmax.f32 %v578_v26, 0.0  ;;  %v5135_v39 = vld [vmem:[%s7713_s4 + $0x330] sm:$0xff] }
 0x10b   :  { %2843 = vperm.xlu0 %5404, %v5133_v50   ;;  %1119 = vmatpush1.bf16.msra.mxu1 %v702_v8  ;;  %v582_v5 = vadd.f32 %v581_v58, %v6189_v12  ;;  %v583_v33 = vpop.f32.mrb[11].mxu1  ;;  %v504_v13 = vadd.f32 %v503_v2, %v6109_v43  ;;  %v677_v44 = vmax.f32 %v580_v36, 0.0  ;;  %v644_v50 = vmax.f32 %v498_v57, 0.0  ;;  %v6472_v34 = vpop.permute.xlu1 %1498  ;;  %v5138_v43 = vld [vmem:[%s7713_s4 + $0x348] sm:$0xff]  ;;  %v5137_v36 = vld [vmem:[%s7713_s4 + $0x340] sm:$0xff] }
 0x10c   :  { %v584_v21 = vadd.f32 %v583_v33, %v6189_v12  ;;  %v646_v11 = vmax.f32 %v502_v40, 0.0  ;;  %v645_v17 = vmax.f32 %v500_v18, 0.0 }
 0x10d   :  { %v678_v8 = vmax.f32 %v582_v5, 0.0  ;;  %v647_v4 = vmax.f32 %v504_v13, 0.0 }
 0x10e   :  { %2858 = vperm.xlu1 %5405, %v5136_v41   ;;  %v679_v26 = vmax.f32 %v584_v21, 0.0  ;;  %v704_v9 = vpack.c.bf16 %v646_v11, %v644_v50  ;;  %v6485_v41 = vpop.permute.xlu0 %1503 }
 0x10f   :  { %v6480_v35 = vpack.c.bf16 %v678_v8, %v676_v10  ;;  %2853 = vperm.xlu0 %5404, %v5135_v39   ;;  %v507_v12 = vpop.f32.mrb[12].mxu0  ;;  %v587_v57 = vpop.f32.mrb[12].mxu1  ;;  %v705_v18 = vpack.c.bf16 %v647_v4, %v645_v17  ;;  %v5140_v4 = vld [vmem:[%s7713_s4 + $0x358] sm:$0xff] }
 0x110   :  { %v6482_v58 = vpack.c.bf16 %v679_v26, %v677_v44  ;;  %v588_v40 = vadd.f32 %v587_v57, %v6201_v16  ;;  %v509_v2 = vpop.f32.mrb[13].mxu0  ;;  %v589_v5 = vpop.f32.mrb[13].mxu1  ;;  %v508_v33 = vadd.f32 %v507_v12, %v6121_v48 }
 0x111   :  { %v590_v13 = vadd.f32 %v589_v5, %v6201_v16  ;;  %v510_v21 = vadd.f32 %v509_v2, %v6121_v48  ;;  %v511_v10 = vpop.f32.mrb[14].mxu0  ;;  %v591_v50 = vpop.f32.mrb[14].mxu1  ;;  %1120 = vmatprep.subr.bf16.mxu1 %v705_v18  ;;  %v5142_v5 = vld [vmem:[%s7713_s4 + $0x368] sm:$0xff] }
 0x112   :  { %2868 = vperm.xlu1 %5405, %v5138_v43   ;;  %v680_v39 = vmax.f32 %v588_v40, 0.0  ;;  %v512_v44 = vadd.f32 %v511_v10, %v6119_v47  ;;  %v592_v11 = vadd.f32 %v591_v50, %v6199_v0  ;;  %v513_v8 = vpop.f32.mrb[15].mxu0  ;;  %v593_v17 = vpop.f32.mrb[15].mxu1  ;;  %1121 = vmatpush1.bf16.msra.mxu1 %v704_v9  ;;  %v5139_v43 = vld [vmem:[%s7713_s4 + $0x350] sm:$0xff]  ;;  %v648_v12 = vmax.f32 %v508_v33, 0.0 }
 0x113   :  { %2863 = vperm.xlu0 %5404, %v5137_v36   ;;  %v681_v16 = vmax.f32 %v590_v13, 0.0  ;;  %v514_v48 = vadd.f32 %v513_v8, %v6119_v47  ;;  %v594_v26 = vadd.f32 %v593_v17, %v6199_v0  ;;  %v6500_v36 = vpop.permute.xlu1 %1508  ;;  %v649_v40 = vmax.f32 %v510_v21, 0.0  ;;  %v5141_v47 = vld [vmem:[%s7713_s4 + $0x360] sm:$0xff]  ;;  %v6513_v17 = vpop.permute.xlu0 %1513 }
 0x114   :  { %v650_v57 = vmax.f32 %v512_v44, 0.0  ;;  %v682_v18 = vmax.f32 %v592_v11, 0.0 }
 0x115   :  { %v651_v9 = vmax.f32 %v514_v48, 0.0  ;;  %v683_v2 = vmax.f32 %v594_v26, 0.0 }
 0x116   :  { %2878 = vperm.xlu1 %5405, %v5140_v4   ;;  %v706_v0 = vpack.c.bf16 %v650_v57, %v648_v12  ;;  %v6508_v13 = vpack.c.bf16 %v682_v18, %v680_v39 }
 0x117   :  { %2873 = vperm.xlu0 %5404, %v5139_v43   ;;  %v517_v33 = vpop.f32.mrb[16].mxu0  ;;  %v597_v10 = vpop.f32.mrb[16].mxu1  ;;  %v707_v50 = vpack.c.bf16 %v651_v9, %v649_v40  ;;  %v6510_v44 = vpack.c.bf16 %v683_v2, %v681_v16  ;;  %v5144_v40 = vld [vmem:[%s7713_s4 + $0x378] sm:$0xff]  ;;  %v5143_v2 = vld [vmem:[%s7713_s4 + $0x370] sm:$0xff] }
 0x118   :  { %v518_v21 = vadd.f32 %v517_v33, %v6131_v52  ;;  %v519_v11 = vpop.f32.mrb[17].mxu0  ;;  %v599_v8 = vpop.f32.mrb[17].mxu1  ;;  %v598_v4 = vadd.f32 %v597_v10, %v6211_v20 }
 0x119   :  { %v520_v48 = vadd.f32 %v519_v11, %v6131_v52  ;;  %v600_v26 = vadd.f32 %v599_v8, %v6211_v20  ;;  %v521_v39 = vpop.f32.mrb[18].mxu0  ;;  %v601_v12 = vpop.f32.mrb[18].mxu1  ;;  %1122 = vmatprep.subr.bf16.mxu1 %v707_v50 }
 0x11a   :  { %2888 = vperm.xlu1 %5405, %v5142_v5   ;;  %v522_v43 = vadd.f32 %v521_v39, %v6129_v51  ;;  %v602_v16 = vadd.f32 %v601_v12, %v6209_v19  ;;  %v523_v57 = vpop.f32.mrb[19].mxu0  ;;  %v603_v18 = vpop.f32.mrb[19].mxu1  ;;  %1123 = vmatpush1.bf16.msra.mxu1 %v706_v0  ;;  %v652_v9 = vmax.f32 %v518_v21, 0.0  ;;  %v684_v5 = vmax.f32 %v598_v4, 0.0 }
 0x11b   :  { %2883 = vperm.xlu0 %5404, %v5141_v47   ;;  %v524_v52 = vadd.f32 %v523_v57, %v6129_v51  ;;  %v604_v20 = vadd.f32 %v603_v18, %v6209_v19  ;;  %v5146_v47 = vld [vmem:[%s7713_s4 + $0x388] sm:$0xff]  ;;  %v6531_v0 = vpop.permute.xlu1 %1518  ;;  %v653_v50 = vmax.f32 %v520_v48, 0.0  ;;  %v685_v11 = vmax.f32 %v600_v26, 0.0  ;;  %v5145_v51 = vld [vmem:[%s7713_s4 + $0x380] sm:$0xff]  ;;  %v6541_v18 = vpop.permute.xlu0 %1523 }
 0x11c   :  { %v654_v33 = vmax.f32 %v522_v43, 0.0  ;;  %v686_v10 = vmax.f32 %v602_v16, 0.0 }
 0x11d   :  { %v655_v21 = vmax.f32 %v524_v52, 0.0  ;;  %v687_v8 = vmax.f32 %v604_v20, 0.0 }
 0x11e   :  { %2898 = vperm.xlu1 %5405, %v5144_v40   ;;  %v708_v19 = vpack.c.bf16 %v654_v33, %v652_v9  ;;  %v6536_v39 = vpack.c.bf16 %v686_v10, %v684_v5 }
 0x11f   :  { %2893 = vperm.xlu0 %5404, %v5143_v2   ;;  %v527_v4 = vpop.f32.mrb[20].mxu0  ;;  %v607_v12 = vpop.f32.mrb[20].mxu1  ;;  %v709_v43 = vpack.c.bf16 %v655_v21, %v653_v50  ;;  %v6538_v16 = vpack.c.bf16 %v687_v8, %v685_v11  ;;  %v5148_v11 = vld [vmem:[%s7713_s4 + $0x398] sm:$0xff] }
 0x120   :  { %v528_v57 = vadd.f32 %v527_v4, %v6141_v56  ;;  %v529_v48 = vpop.f32.mrb[21].mxu0  ;;  %v609_v26 = vpop.f32.mrb[21].mxu1  ;;  %v608_v40 = vadd.f32 %v607_v12, %v6221_v24 }
 0x121   :  { %v530_v52 = vadd.f32 %v529_v48, %v6141_v56  ;;  %v610_v9 = vadd.f32 %v609_v26, %v6221_v24  ;;  %v531_v20 = vpop.f32.mrb[22].mxu0  ;;  %v611_v5 = vpop.f32.mrb[22].mxu1  ;;  %1124 = vmatprep.subr.bf16.mxu1 %v709_v43 }
 0x122   :  { %2908 = vperm.xlu1 %5405, %v5146_v47   ;;  %v532_v2 = vadd.f32 %v531_v20, %v6139_v55  ;;  %v612_v33 = vadd.f32 %v611_v5, %v6219_v23  ;;  %v533_v10 = vpop.f32.mrb[23].mxu0  ;;  %v613_v50 = vpop.f32.mrb[23].mxu1  ;;  %1125 = vmatpush1.bf16.msra.mxu1 %v708_v19  ;;  %v656_v21 = vmax.f32 %v528_v57, 0.0  ;;  %v5147_v47 = vld [vmem:[%s7713_s4 + $0x390] sm:$0xff]  ;;  %v688_v8 = vmax.f32 %v608_v40, 0.0 }
 0x123   :  { %2903 = vperm.xlu0 %5404, %v5145_v51   ;;  %v534_v56 = vadd.f32 %v533_v10, %v6139_v55  ;;  %v614_v24 = vadd.f32 %v613_v50, %v6219_v23  ;;  %v5150_v51 = vld [vmem:[%s7713_s4 + $0x3a8] sm:$0xff]  ;;  %v6559_v19 = vpop.permute.xlu1 %1528  ;;  %v657_v43 = vmax.f32 %v530_v52, 0.0  ;;  %v689_v48 = vmax.f32 %v610_v9, 0.0  ;;  %v5149_v55 = vld [vmem:[%s7713_s4 + $0x3a0] sm:$0xff]  ;;  %v6569_v50 = vpop.permute.xlu0 %1533 }
 0x124   :  { %v658_v4 = vmax.f32 %v532_v2, 0.0  ;;  %v690_v12 = vmax.f32 %v612_v33, 0.0 }
 0x125   :  { %v659_v57 = vmax.f32 %v534_v56, 0.0  ;;  %v691_v26 = vmax.f32 %v614_v24, 0.0 }
 0x126   :  { %2918 = vperm.xlu1 %5405, %v5148_v11   ;;  %v710_v23 = vpack.c.bf16 %v658_v4, %v656_v21  ;;  %v6564_v20 = vpack.c.bf16 %v690_v12, %v688_v8 }
 0x127   :  { %2913 = vperm.xlu0 %5404, %v5147_v47   ;;  %v537_v40 = vpop.f32.mrb[24].mxu0  ;;  %v617_v5 = vpop.f32.mrb[24].mxu1  ;;  %v711_v2 = vpack.c.bf16 %v659_v57, %v657_v43  ;;  %v6566_v33 = vpack.c.bf16 %v691_v26, %v689_v48  ;;  %v5152_v48 = vld [vmem:[%s7713_s4 + $0x3b8] sm:$0xff] }
 0x128   :  { %v538_v10 = vadd.f32 %v537_v40, %v6151_v60  ;;  %v539_v52 = vpop.f32.mrb[25].mxu0  ;;  %v619_v9 = vpop.f32.mrb[25].mxu1  ;;  %v618_v11 = vadd.f32 %v617_v5, %v6231_v28 }
 0x129   :  { %v540_v56 = vadd.f32 %v539_v52, %v6151_v60  ;;  %v620_v21 = vadd.f32 %v619_v9, %v6231_v28  ;;  %v541_v24 = vpop.f32.mrb[26].mxu0  ;;  %v621_v8 = vpop.f32.mrb[26].mxu1  ;;  %1126 = vmatprep.subr.bf16.mxu1 %v711_v2 }
 0x12a   :  { %2928 = vperm.xlu1 %5405, %v5150_v51   ;;  %v542_v47 = vadd.f32 %v541_v24, %v6149_v59  ;;  %v622_v4 = vadd.f32 %v621_v8, %v6229_v27  ;;  %v543_v12 = vpop.f32.mrb[27].mxu0  ;;  %v623_v43 = vpop.f32.mrb[27].mxu1  ;;  %1127 = vmatpush1.bf16.msra.mxu1 %v710_v23  ;;  %v660_v57 = vmax.f32 %v538_v10, 0.0  ;;  %v5151_v51 = vld [vmem:[%s7713_s4 + $0x3b0] sm:$0xff]  ;;  %v692_v26 = vmax.f32 %v618_v11, 0.0 }
 0x12b   :  { %2923 = vperm.xlu0 %5404, %v5149_v55   ;;  %v544_v60 = vadd.f32 %v543_v12, %v6149_v59  ;;  %v624_v28 = vadd.f32 %v623_v43, %v6229_v27  ;;  %v5154_v55 = vld [vmem:[%s7713_s4 + $0x3c8] sm:$0xff]  ;;  %v6587_v23 = vpop.permute.xlu1 %1538  ;;  %v661_v2 = vmax.f32 %v540_v56, 0.0  ;;  %v693_v52 = vmax.f32 %v620_v21, 0.0  ;;  %v5153_v59 = vld [vmem:[%s7713_s4 + $0x3c0] sm:$0xff]  ;;  %v6597_v43 = vpop.permute.xlu0 %1543 }
 0x12c   :  { %v662_v40 = vmax.f32 %v542_v47, 0.0  ;;  %v694_v5 = vmax.f32 %v622_v4, 0.0 }
 0x12d   :  { %v663_v10 = vmax.f32 %v544_v60, 0.0  ;;  %v695_v9 = vmax.f32 %v624_v28, 0.0 }
 0x12e   :  { %2938 = vperm.xlu1 %5405, %v5152_v48   ;;  %v712_v27 = vpack.c.bf16 %v662_v40, %v660_v57  ;;  %v6592_v24 = vpack.c.bf16 %v694_v5, %v692_v26 }
 0x12f   :  { %2933 = vperm.xlu0 %5404, %v5151_v51   ;;  %v547_v11 = vpop.f32.mrb[28].mxu0  ;;  %v627_v8 = vpop.f32.mrb[28].mxu1  ;;  %v713_v47 = vpack.c.bf16 %v663_v10, %v661_v2  ;;  %v6594_v4 = vpack.c.bf16 %v695_v9, %v693_v52  ;;  %v5156_v52 = vld [vmem:[%s7713_s4 + $0x3d8] sm:$0xff] }
 0x130   :  { %v548_v12 = vadd.f32 %v547_v11, %v6161_v1  ;;  %v549_v56 = vpop.f32.mrb[29].mxu0  ;;  %v629_v21 = vpop.f32.mrb[29].mxu1  ;;  %v628_v48 = vadd.f32 %v627_v8, %v6241_v32 }
 0x131   :  { %v550_v60 = vadd.f32 %v549_v56, %v6161_v1  ;;  %v630_v57 = vadd.f32 %v629_v21, %v6241_v32  ;;  %v551_v28 = vpop.f32.mrb[30].mxu0  ;;  %v631_v26 = vpop.f32.mrb[30].mxu1  ;;  %1128 = vmatprep.subr.bf16.mxu1 %v713_v47 }
 0x132   :  { %2948 = vperm.xlu1 %5405, %v5154_v55   ;;  %v552_v51 = vadd.f32 %v551_v28, %v6159_v63  ;;  %v632_v40 = vadd.f32 %v631_v26, %v6239_v31  ;;  %v553_v5 = vpop.f32.mrb[31].mxu0  ;;  %v633_v2 = vpop.f32.mrb[31].mxu1  ;;  %1129 = vmatpush1.bf16.msra.mxu1 %v712_v27  ;;  %v664_v1 = vmax.f32 %v548_v12, 0.0  ;;  %v5155_v55 = vld [vmem:[%s7713_s4 + $0x3d0] sm:$0xff]  ;;  %v696_v11 = vmax.f32 %v628_v48, 0.0  ;;  %v5158_v27 = vld [vmem:[%s7713_s4 + $0x3e8] sm:$0xff] }
 0x133   :  { %2943 = vperm.xlu0 %5404, %v5153_v59   ;;  %v6607_v10 = vpop.permute.xlu1 %1548  ;;  %v554_v32 = vadd.f32 %v553_v5, %v6159_v63  ;;  %v634_v9 = vadd.f32 %v633_v2, %v6239_v31  ;;  %v665_v47 = vmax.f32 %v550_v60, 0.0  ;;  %v697_v56 = vmax.f32 %v630_v57, 0.0  ;;  %v5157_v63 = vld [vmem:[%s7713_s4 + $0x3e0] sm:$0xff]  ;;  %v5160_v60 = vld [vmem:[%s7713_s4 + $0x3f8] sm:$0xff]  ;;  %v5159_v57 = vld [vmem:[%s7713_s4 + $0x3f0] sm:$0xff] }
 0x134   :  { %v666_v59 = vmax.f32 %v552_v51, 0.0  ;;  %v698_v8 = vmax.f32 %v632_v40, 0.0  ;;  %v6622_v51 = vpop.permute.xlu0 %1553  ;;  %v5226_v2 = vld [vmem:[%s7713_s4 + $0x408] sm:$0xff] }
 0x135   :  { %v667_v21 = vmax.f32 %v554_v32, 0.0  ;;  %v699_v28 = vmax.f32 %v634_v9, 0.0 }
 0x136   :  { %2958 = vperm.xlu1 %5405, %v5156_v52   ;;  %v714_v31 = vpack.c.bf16 %v666_v59, %v664_v1  ;;  %v6620_v12 = vpack.c.bf16 %v698_v8, %v696_v11  ;;  %v5227_v1 = vld [vmem:[%s7713_s4 + $0x410] sm:$0xff]  ;;  %v5233_v11 = vld [vmem:[%s7713_s4 + $0x440] sm:$0xff] }
 0x137   :  { %2953 = vperm.xlu0 %5404, %v5155_v55   ;;  %v715_v48 = vpack.c.bf16 %v667_v21, %v665_v47  ;;  %v731_v26 = vpack.c.bf16 %v699_v28, %v697_v56  ;;  %v6624_v40 = vpop.permute.xlu1 %1558  ;;  %v5446_v47 = vld [vmem:[%s7714_s3] ss:$8 sps:$4 sm:$0xff]   ;;  %v5449_v56 = vld [vmem:[%s7714_s3 + $0x14] ss:$8 sps:$4 sm:$0xff]  }
 0x138   :  { %v6633_v5 = vpop.permute.xlu0 %1563  ;;  %v5239_v21 = vld [vmem:[%s7713_s4 + $0x470] sm:$0xff] }
 0x139   :  { %1130 = vmatprep.subr.bf16.mxu1 %v715_v48  ;;  %v5451_v48 = vld [vmem:[%s7714_s3 + $0x10] ss:$8 sps:$4 sm:$0xff]  }
 0x13a   :  { %2968 = vperm.xlu1 %5405, %v5158_v27   ;;  %1131 = vmatpush1.bf16.msra.mxu1 %v714_v31  ;;  %v5242_v31 = vld [vmem:[%s7713_s4 + $0x488] sm:$0xff] }
 0x13b   :  { %2963 = vperm.xlu0 %5404, %v5157_v63   ;;  %1132 = vmatprep.subr.bf16.mxu1 %v6422_v25  ;;  %v6639_v52 = vpop.permute.xlu1 %1568  ;;  %v5225_v25 = vld [vmem:[%s7713_s4 + $0x400] sm:$0xff] }
 0x13c   :  { %v6653_v32 = vpop.permute.xlu0 %1573 }
 0x13e   :  { %2978 = vperm.xlu1 %5405, %v5160_v60   ;;  %1133 = vmatpush1.bf16.msra.mxu1 %v6420_v29  ;;  %v5228_v29 = vld [vmem:[%s7713_s4 + $0x418] sm:$0xff] }
 0x13f   :  { %2973 = vperm.xlu0 %5404, %v5159_v57   ;;  %1134 = vmatprep.subr.bf16.mxu1 %v6454_v42  ;;  %v6655_v42 = vpop.permute.xlu1 %1578  ;;  %v5244_v60 = vld [vmem:[%s7713_s4 + $0x498] sm:$0xff]  ;;  %v5452_v57 = vld [vmem:[%s7714_s3 + $0x24] ss:$8 sps:$4 sm:$0xff]  }
 0x140   :  { %v6665_v9 = vpop.permute.xlu0 %1583 }
 0x142   :  { %3503 = vperm.xlu1 %5405, %v5226_v2   ;;  %1135 = vmatpush1.bf16.msra.mxu1 %v6452_v22  ;;  %v5230_v22 = vld [vmem:[%s7713_s4 + $0x428] sm:$0xff] }
 0x143   :  { %3498 = vperm.xlu0 %5404, %v5225_v25   ;;  %1136 = vmatprep.subr.bf16.mxu1 %v6482_v58  ;;  %v5229_v58 = vld [vmem:[%s7713_s4 + $0x420] sm:$0xff]  ;;  %v6671_v55 = vpop.permute.xlu1 %1588  ;;  %v5243_v25 = vld [vmem:[%s7713_s4 + $0x490] sm:$0xff] }
 0x144   :  { %v6685_v59 = vpop.permute.xlu0 %1593 }
 0x146   :  { %3513 = vperm.xlu1 %5405, %v5228_v29   ;;  %1137 = vmatpush1.bf16.msra.mxu1 %v6480_v35  ;;  %v5232_v35 = vld [vmem:[%s7713_s4 + $0x438] sm:$0xff]  ;;  %v5246_v29 = vld [vmem:[%s7713_s4 + $0x4a8] sm:$0xff] }
 0x147   :  { %3508 = vperm.xlu0 %5404, %v5227_v1   ;;  %1138 = vmatprep.subr.bf16.mxu1 %v6510_v44  ;;  %v5231_v44 = vld [vmem:[%s7713_s4 + $0x430] sm:$0xff]  ;;  %v5245_v1 = vld [vmem:[%s7713_s4 + $0x4a0] sm:$0xff] }
 0x148   :  { %v6697_v8 = vpop.permute.xlu0 %1603 }
 0x14a   :  { %3523 = vperm.xlu1 %5405, %v5230_v22   ;;  %1139 = vmatpush1.bf16.msra.mxu1 %v6508_v13  ;;  %v5234_v13 = vld [vmem:[%s7713_s4 + $0x448] sm:$0xff] }
 0x14b   :  { %3518 = vperm.xlu0 %5404, %v5229_v58   ;;  %1140 = vmatprep.subr.bf16.mxu1 %v6538_v16  ;;  %v6687_v16 = vpop.permute.xlu1 %1598 }
 0x14c   :  { %v6721_v28 = vpop.permute.xlu0 %1613 }
 0x14e   :  { %3533 = vperm.xlu1 %5405, %v5232_v35   ;;  %1141 = vmatpush1.bf16.msra.mxu1 %v6536_v39  ;;  %v5236_v39 = vld [vmem:[%s7713_s4 + $0x458] sm:$0xff]  ;;  %v5454_v35 = vld [vmem:[%s7714_s3 + $0x20] ss:$8 sps:$4 sm:$0xff]  }
 0x14f   :  { %3528 = vperm.xlu0 %5404, %v5231_v44   ;;  %1142 = vmatprep.subr.bf16.mxu1 %v6566_v33  ;;  %v5235_v33 = vld [vmem:[%s7713_s4 + $0x450] sm:$0xff]  ;;  %v6703_v27 = vpop.permute.xlu1 %1608  ;;  %v5248_v44 = vld [vmem:[%s7713_s4 + $0x4b8] sm:$0xff] }
 0x152   :  { %3543 = vperm.xlu1 %5405, %v5234_v13   ;;  %1143 = vmatpush1.bf16.msra.mxu1 %v6564_v20  ;;  %v5238_v20 = vld [vmem:[%s7713_s4 + $0x468] sm:$0xff]  ;;  %v5455_v13 = vld [vmem:[%s7714_s3 + $0x34] ss:$8 sps:$4 sm:$0xff]  }
 0x153   :  { %3538 = vperm.xlu0 %5404, %v5233_v11   ;;  %1144 = vmatprep.subr.bf16.mxu1 %v6594_v4  ;;  %v5237_v4 = vld [vmem:[%s7713_s4 + $0x460] sm:$0xff]  ;;  %v6723_v63 = vpop.permute.xlu1 %1618  ;;  %v5247_v11 = vld [vmem:[%s7713_s4 + $0x4b0] sm:$0xff] }
 0x156   :  { %3553 = vperm.xlu1 %5405, %v5236_v39   ;;  %1145 = vmatpush1.bf16.msra.mxu1 %v6592_v24  ;;  %v5240_v24 = vld [vmem:[%s7713_s4 + $0x478] sm:$0xff] }
 0x157   :  { %3548 = vperm.xlu0 %5404, %v5235_v33   ;;  %1146 = vmatprep.subr.bf16.mxu1 %v731_v26  ;;  %v6734_v26 = vpop.permute.xlu0 %1623  ;;  %v6742_v2 = vpop.permute.xlu1 %1628  ;;  %v5250_v33 = vld [vmem:[%s7713_s4 + $0x4c8] sm:$0xff] }
 0x15a   :  { %3563 = vperm.xlu1 %5405, %v5238_v20   ;;  %1147 = vmatpush1.bf16.msra.mxu1 %v6620_v12  ;;  %v5241_v12 = vld [vmem:[%s7713_s4 + $0x480] sm:$0xff] }
 0x15b   :  { %3558 = vperm.xlu0 %5404, %v5237_v4   ;;  %v6753_v22 = vpop.permute.xlu0 %2148  ;;  %v6755_v58 = vpop.permute.xlu1 %2153  ;;  %v5249_v4 = vld [vmem:[%s7713_s4 + $0x4c0] sm:$0xff] }
 0x15d   :  { %1149 = vmatmul.mubr.bf16.vlgmr.msra.gmra.mrb[32].mxu1 %v5446_v47  ;;  %v5457_v47 = vld [vmem:[%s7714_s3 + $0x30] ss:$8 sps:$4 sm:$0xff]  }
 0x15e   :  { %3573 = vperm.xlu1 %5405, %v5240_v24   ;;  %1158 = vmatprep.mubr.bf16.mxu1 %v5449_v56  ;;  %v5252_v24 = vld [vmem:[%s7713_s4 + $0x4d8] sm:$0xff]  ;;  %v5458_v56 = vld [vmem:[%s7714_s3 + $0x44] ss:$8 sps:$4 sm:$0xff]  }
 0x15f   :  { %3568 = vperm.xlu0 %5404, %v5239_v21   ;;  %v6769_v39 = vpop.permute.xlu0 %2158  ;;  %v6774_v20 = vpop.permute.xlu1 %2163  ;;  %v5251_v21 = vld [vmem:[%s7713_s4 + $0x4d0] sm:$0xff] }
 0x162   :  { %3583 = vperm.xlu1 %5405, %v5242_v31  }
 0x163   :  { %3578 = vperm.xlu0 %5404, %v5241_v12   ;;  %v6791_v31 = vpop.permute.xlu0 %2168  ;;  %v6793_v12 = vpop.permute.xlu1 %2173 }
 0x164   :  { %7789 = vst [vmem:[#allocation24_spill] sm:$0xff] %v6791_v31  ;;  %7790 = vst [vmem:[#allocation25_spill] sm:$0xff] %v6793_v12 }
 0x165   :  { %1159 = vmatmul.mubr.bf16.gmra.mrb[36].mxu1 %v5451_v48  ;;  %v5254_v48 = vld [vmem:[%s7713_s4 + $0x4e8] sm:$0xff] }
 0x166   :  { %3593 = vperm.xlu1 %5405, %v5244_v60   ;;  %1168 = vmatprep.mubr.bf16.mxu1 %v5452_v57  ;;  %v5253_v60 = vld [vmem:[%s7713_s4 + $0x4e0] sm:$0xff] }
 0x167   :  { %3588 = vperm.xlu0 %5404, %v5243_v25   ;;  %v5460_v57 = vld [vmem:[%s7714_s3 + $0x40] ss:$8 sps:$4 sm:$0xff]   ;;  %v6804_v25 = vpop.permute.xlu0 %2178 }
 0x168   :  { %7791 = vst [vmem:[#allocation26_spill] sm:$0xff] %v6804_v25 }
 0x16a   :  { %3603 = vperm.xlu1 %5405, %v5246_v29   ;;  %v5256_v29 = vld [vmem:[%s7713_s4 + $0x4f8] sm:$0xff] }
 0x16b   :  { %3598 = vperm.xlu0 %5404, %v5245_v1   ;;  %v5461_v1 = vld [vmem:[%s7714_s3 + $0x54] ss:$8 sps:$4 sm:$0xff]  }
 0x16d   :  { %1169 = vmatmul.mubr.bf16.gmra.mrb[40].mxu1 %v5454_v35  ;;  %v6812_v35 = vpop.permute.xlu1 %2183 }
 0x16e   :  { %3613 = vperm.xlu1 %5405, %v5248_v44   ;;  %1178 = vmatprep.mubr.bf16.mxu1 %v5455_v13  ;;  %7792 = vst [vmem:[#allocation27_spill] sm:$0xff] %v6812_v35  ;;  %v5255_v44 = vld [vmem:[%s7713_s4 + $0x4f0] sm:$0xff]  ;;  %v5322_v13 = vld [vmem:[%s7713_s4 + $0x508] sm:$0xff] }
 0x16f   :  { %3608 = vperm.xlu0 %5404, %v5247_v11   ;;  %v5321_v11 = vld [vmem:[%s7713_s4 + $0x500] sm:$0xff] }
 0x172   :  { %3623 = vperm.xlu1 %5405, %v5250_v33   ;;  %v6823_v33 = vpop.permute.xlu0 %2188 }
 0x173   :  { %3618 = vperm.xlu0 %5404, %v5249_v4   ;;  %7793 = vst [vmem:[#allocation28_spill] sm:$0xff] %v6823_v33  ;;  %v6825_v4 = vpop.permute.xlu1 %2193 }
 0x174   :  { %7794 = vst [vmem:[#allocation29_spill] sm:$0xff] %v6825_v4 }
 0x175   :  { %1179 = vmatmul.mubr.bf16.gmra.mrb[44].mxu1 %v5457_v47  ;;  %v5463_v47 = vld [vmem:[%s7714_s3 + $0x50] ss:$8 sps:$4 sm:$0xff]  }
 0x176   :  { %3633 = vperm.xlu1 %5405, %v5252_v24   ;;  %1188 = vmatprep.mubr.bf16.mxu1 %v5458_v56  ;;  %v5324_v24 = vld [vmem:[%s7713_s4 + $0x518] sm:$0xff]  ;;  %v5464_v56 = vld [vmem:[%s7714_s3 + $0x64] ss:$8 sps:$4 sm:$0xff]  }
 0x177   :  { %3628 = vperm.xlu0 %5404, %v5251_v21   ;;  %v5323_v21 = vld [vmem:[%s7713_s4 + $0x510] sm:$0xff] }
 0x17a   :  { %3643 = vperm.xlu1 %5405, %v5254_v48   ;;  %v6839_v48 = vpop.permute.xlu0 %2198 }
 0x17b   :  { %3638 = vperm.xlu0 %5404, %v5253_v60   ;;  %7795 = vst [vmem:[#allocation30_spill] sm:$0xff] %v6839_v48  ;;  %v5326_v60 = vld [vmem:[%s7713_s4 + $0x528] sm:$0xff] }
 0x17d   :  { %1189 = vmatmul.mubr.bf16.gmra.mrb[48].mxu1 %v5460_v57  ;;  %v6844_v57 = vpop.permute.xlu1 %2203 }
 0x17e   :  { %3653 = vperm.xlu1 %5405, %v5256_v29   ;;  %1198 = vmatprep.mubr.bf16.mxu1 %v5461_v1  ;;  %7796 = vst [vmem:[#allocation31_spill] sm:$0xff] %v6844_v57  ;;  %v5325_v29 = vld [vmem:[%s7713_s4 + $0x520] sm:$0xff] }
 0x17f   :  { %3648 = vperm.xlu0 %5404, %v5255_v44   ;;  %v5466_v1 = vld [vmem:[%s7714_s3 + $0x60] ss:$8 sps:$4 sm:$0xff]   ;;  %v5328_v44 = vld [vmem:[%s7713_s4 + $0x538] sm:$0xff] }
 0x182   :  { %4178 = vperm.xlu1 %5405, %v5322_v13   ;;  %v5467_v13 = vld [vmem:[%s7714_s3 + $0x74] ss:$8 sps:$4 sm:$0xff]  }
 0x183   :  { %4173 = vperm.xlu0 %5404, %v5321_v11   ;;  %v5327_v11 = vld [vmem:[%s7713_s4 + $0x530] sm:$0xff] }
 0x185   :  { %1199 = vmatmul.mubr.bf16.gmra.mrb[52].mxu1 %v5463_v47  ;;  %v6861_v47 = vpop.permute.xlu0 %2208 }
 0x186   :  { %4188 = vperm.xlu1 %5405, %v5324_v24   ;;  %1208 = vmatprep.mubr.bf16.mxu1 %v5464_v56  ;;  %7797 = vst [vmem:[#allocation32_spill] sm:$0xff] %v6861_v47  ;;  %v6863_v24 = vpop.permute.xlu1 %2213  ;;  %v5330_v56 = vld [vmem:[%s7713_s4 + $0x548] sm:$0xff] }
 0x187   :  { %4183 = vperm.xlu0 %5404, %v5323_v21   ;;  %7798 = vst [vmem:[#allocation33_spill] sm:$0xff] %v6863_v24  ;;  %v5329_v21 = vld [vmem:[%s7713_s4 + $0x540] sm:$0xff] }
 0x18a   :  { %4198 = vperm.xlu1 %5405, %v5326_v60   ;;  %v5469_v60 = vld [vmem:[%s7714_s3 + $0x70] ss:$8 sps:$4 sm:$0xff]  }
 0x18b   :  { %4193 = vperm.xlu0 %5404, %v5325_v29   ;;  %v6874_v29 = vpop.permute.xlu0 %2218 }
 0x18c   :  { %7799 = vst [vmem:[#allocation34_spill] sm:$0xff] %v6874_v29 }
 0x18d   :  { %1209 = vmatmul.mubr.bf16.gmra.mrb[56].mxu1 %v5466_v1  ;;  %v5332_v1 = vld [vmem:[%s7713_s4 + $0x558] sm:$0xff] }
 0x18e   :  { %4208 = vperm.xlu1 %5405, %v5328_v44   ;;  %1218 = vmatprep.mubr.bf16.mxu1 %v5467_v13  ;;  %v5470_v44 = vld [vmem:[%s7714_s3 + $0x84] ss:$8 sps:$4 sm:$0xff]   ;;  %v6882_v13 = vpop.permute.xlu1 %2223 }
 0x18f   :  { %4203 = vperm.xlu0 %5404, %v5327_v11   ;;  %7800 = vst [vmem:[#allocation35_spill] sm:$0xff] %v6882_v13  ;;  %v5331_v11 = vld [vmem:[%s7713_s4 + $0x550] sm:$0xff]  ;;  %v6893_v29 = vpop.permute.xlu0 %2228  ;;  %v5478_v13 = vld [vmem:[%s7714_s3 + $0xa0] ss:$8 sps:$4 sm:$0xff]  }
 0x190   :  { %7801 = vst [vmem:[#allocation36_spill] sm:$0xff] %v6893_v29  ;;  %v5337_v29 = vld [vmem:[%s7713_s4 + $0x580] sm:$0xff] }
 0x192   :  { %4218 = vperm.xlu1 %5405, %v5330_v56   ;;  %v5334_v56 = vld [vmem:[%s7713_s4 + $0x568] sm:$0xff]  ;;  %v6895_v24 = vpop.permute.xlu1 %2233 }
 0x193   :  { %4213 = vperm.xlu0 %5404, %v5329_v21   ;;  %v5333_v21 = vld [vmem:[%s7713_s4 + $0x560] sm:$0xff]  ;;  %7802 = vst [vmem:[#allocation37_spill] sm:$0xff] %v6895_v24 }
 0x195   :  { %1219 = vmatmul.mubr.bf16.gmra.mrb[60].mxu1 %v5469_v60  ;;  %v5472_v60 = vld [vmem:[%s7714_s3 + $0x80] ss:$8 sps:$4 sm:$0xff]  }
 0x196   :  { %4228 = vperm.xlu1 %5405, %v5332_v1   ;;  %1228 = vmatprep.mubr.bf16.mxu1 %v5470_v44  ;;  %v5336_v1 = vld [vmem:[%s7713_s4 + $0x578] sm:$0xff]  ;;  %v6914_v24 = vpop.permute.xlu1 %2243 }
 0x197   :  { %4223 = vperm.xlu0 %5404, %v5331_v11   ;;  %v5473_v44 = vld [vmem:[%s7714_s3 + $0x94] ss:$8 sps:$4 sm:$0xff]   ;;  %7804 = vst [vmem:[#allocation39_spill] sm:$0xff] %v6914_v24 }
 0x198   :  { %v5335_v11 = vld [vmem:[%s7713_s4 + $0x570] sm:$0xff] }
 0x19a   :  { %4238 = vperm.xlu1 %5405, %v5334_v56   ;;  %v6909_v56 = vpop.permute.xlu0 %2238 }
 0x19b   :  { %4233 = vperm.xlu0 %5404, %v5333_v21   ;;  %7803 = vst [vmem:[#allocation38_spill] sm:$0xff] %v6909_v56  ;;  %v5338_v21 = vld [vmem:[%s7713_s4 + $0x588] sm:$0xff]  ;;  %v5341_v56 = vld [vmem:[%s7713_s4 + $0x5a0] sm:$0xff] }
 0x19d   :  { %1229 = vmatmul.mubr.bf16.gmra.mrb[64].mxu1 %v5472_v60  ;;  %v5475_v60 = vld [vmem:[%s7714_s3 + $0x90] ss:$8 sps:$4 sm:$0xff]  }
 0x19e   :  { %4248 = vperm.xlu1 %5405, %v5336_v1   ;;  %1238 = vmatprep.mubr.bf16.mxu1 %v5473_v44  ;;  %v5340_v1 = vld [vmem:[%s7713_s4 + $0x598] sm:$0xff]  ;;  %v5476_v44 = vld [vmem:[%s7714_s3 + $0xa4] ss:$8 sps:$4 sm:$0xff]   ;;  %v6931_v24 = vpop.permute.xlu0 %2248 }
 0x19f   :  { %4243 = vperm.xlu0 %5404, %v5335_v11   ;;  %v5339_v11 = vld [vmem:[%s7713_s4 + $0x590] sm:$0xff]  ;;  %7805 = vst [vmem:[#allocation40_spill] sm:$0xff] %v6931_v24 }
 0x1a2   :  { %4258 = vperm.xlu1 %5405, %v5338_v21   ;;  %v6933_v21 = vpop.permute.xlu1 %2253  ;;  %v6944_v24 = vpop.permute.xlu0 %2258 }
 0x1a3   :  { %4253 = vperm.xlu0 %5404, %v5337_v29   ;;  %7806 = vst [vmem:[#allocation41_spill] sm:$0xff] %v6933_v21  ;;  %v5342_v29 = vld [vmem:[%s7713_s4 + $0x5a8] sm:$0xff]  ;;  %7807 = vst [vmem:[#allocation42_spill] sm:$0xff] %v6944_v24 }
 0x1a5   :  { %1239 = vmatmul.mubr.bf16.gmra.mrb[68].mxu1 %v5475_v60  ;;  %v5344_v60 = vld [vmem:[%s7713_s4 + $0x5b8] sm:$0xff] }
 0x1a6   :  { %4268 = vperm.xlu1 %5405, %v5340_v1   ;;  %1248 = vmatprep.mubr.bf16.mxu1 %v5476_v44  ;;  %v5479_v1 = vld [vmem:[%s7714_s3 + $0xb4] ss:$8 sps:$4 sm:$0xff]   ;;  %v6952_v44 = vpop.permute.xlu1 %2263  ;;  %v6963_v24 = vpop.permute.xlu0 %2268 }
 0x1a7   :  { %4263 = vperm.xlu0 %5404, %v5339_v11   ;;  %7808 = vst [vmem:[#allocation43_spill] sm:$0xff] %v6952_v44  ;;  %v5343_v11 = vld [vmem:[%s7713_s4 + $0x5b0] sm:$0xff]  ;;  %7809 = vst [vmem:[#allocation44_spill] sm:$0xff] %v6963_v24  ;;  %v5349_v24 = vld [vmem:[%s7713_s4 + $0x5e0] sm:$0xff] }
 0x1aa   :  { %4278 = vperm.xlu1 %5405, %v5342_v29   ;;  %v5345_v29 = vld [vmem:[%s7713_s4 + $0x5c0] sm:$0xff]  ;;  %v6965_v21 = vpop.permute.xlu1 %2273 }
 0x1ab   :  { %4273 = vperm.xlu0 %5404, %v5341_v56   ;;  %v5346_v56 = vld [vmem:[%s7713_s4 + $0x5c8] sm:$0xff]  ;;  %7810 = vst [vmem:[#allocation45_spill] sm:$0xff] %v6965_v21 }
 0x1ad   :  { %1249 = vmatmul.mubr.bf16.gmra.mrb[72].mxu1 %v5478_v13  ;;  %v5481_v13 = vld [vmem:[%s7714_s3 + $0xb0] ss:$8 sps:$4 sm:$0xff]  }
 0x1ae   :  { %4288 = vperm.xlu1 %5405, %v5344_v60   ;;  %1258 = vmatprep.mubr.bf16.mxu1 %v5479_v1  ;;  %v5348_v60 = vld [vmem:[%s7713_s4 + $0x5d8] sm:$0xff]  ;;  %v5482_v1 = vld [vmem:[%s7714_s3 + $0xc4] ss:$8 sps:$4 sm:$0xff]   ;;  %v6984_v21 = vpop.permute.xlu1 %2283 }
 0x1af   :  { %4283 = vperm.xlu0 %5404, %v5343_v11   ;;  %v5347_v11 = vld [vmem:[%s7713_s4 + $0x5d0] sm:$0xff]  ;;  %7812 = vst [vmem:[#allocation47_spill] sm:$0xff] %v6984_v21 }
 0x1b2   :  { %4298 = vperm.xlu1 %5405, %v5346_v56   ;;  %v6979_v56 = vpop.permute.xlu0 %2278 }
 0x1b3   :  { %4293 = vperm.xlu0 %5404, %v5345_v29   ;;  %7811 = vst [vmem:[#allocation46_spill] sm:$0xff] %v6979_v56  ;;  %v5350_v29 = vld [vmem:[%s7713_s4 + $0x5e8] sm:$0xff]  ;;  %v5487_v56 = vld [vmem:[%s7714_s3 + $0xd0] ss:$8 sps:$4 sm:$0xff]  }
 0x1b5   :  { %1259 = vmatmul.mubr.bf16.gmra.mrb[76].mxu1 %v5481_v13  ;;  %v5484_v13 = vld [vmem:[%s7714_s3 + $0xc0] ss:$8 sps:$4 sm:$0xff]  }
 0x1b6   :  { %4308 = vperm.xlu1 %5405, %v5348_v60   ;;  %1268 = vmatprep.mubr.bf16.mxu1 %v5482_v1  ;;  %v5352_v60 = vld [vmem:[%s7713_s4 + $0x5f8] sm:$0xff]  ;;  %v7001_v21 = vpop.permute.xlu0 %2288 }
 0x1b7   :  { %4303 = vperm.xlu0 %5404, %v5347_v11   ;;  %v5485_v1 = vld [vmem:[%s7714_s3 + $0xd4] ss:$8 sps:$4 sm:$0xff]   ;;  %7813 = vst [vmem:[#allocation48_spill] sm:$0xff] %v7001_v21  ;;  %v5488_v21 = vld [vmem:[%s7714_s3 + $0xe4] ss:$8 sps:$4 sm:$0xff]  }
 0x1b8   :  { %v5351_v11 = vld [vmem:[%s7713_s4 + $0x5f0] sm:$0xff] }
 0x1ba   :  { %4318 = vperm.xlu1 %5405, %v5350_v29   ;;  %v7003_v29 = vpop.permute.xlu1 %2293  ;;  %v7011_v44 = vpop.permute.xlu0 %2298 }
 0x1bb   :  { %4313 = vperm.xlu0 %5404, %v5349_v24   ;;  %7814 = vst [vmem:[#allocation49_spill] sm:$0xff] %v7003_v29  ;;  %v4781_v24 = vld [vmem:[%s7715_s6] sm:$0xff]  ;;  %7815 = vst [vmem:[#allocation50_spill] sm:$0xff] %v7011_v44 }
 0x1bd   :  { %1269 = vmatmul.mubr.bf16.gmra.mrb[80].mxu1 %v5484_v13  ;;  %v5490_v13 = vld [vmem:[%s7714_s3 + $0xe0] ss:$8 sps:$4 sm:$0xff]  }
 0x1be   :  { %4328 = vperm.xlu1 %5405, %v5352_v60   ;;  %1278 = vmatprep.mubr.bf16.mxu1 %v5485_v1  ;;  %v5491_v60 = vld [vmem:[%s7714_s3 + $0xf4] ss:$8 sps:$4 sm:$0xff]   ;;  %v5493_v1 = vld [vmem:[%s7714_s3 + $0xf0] ss:$8 sps:$4 sm:$0xff]  }
 0x1bf   :  { %4323 = vperm.xlu0 %5404, %v5351_v11  }
 0x1c3   :  { %4784 = vperm.xlu0 %5404, %v4781_v24  }
 0x1c5   :  { %1279 = vmatmul.mubr.bf16.gmra.mrb[84].mxu1 %v5487_v56 }
 0x1c6   :  { %1288 = vmatprep.mubr.bf16.mxu1 %v5488_v21 }
 0x1cd   :  { %1289 = vmatmul.mubr.bf16.gmra.mrb[88].mxu1 %v5490_v13  ;;  %v5496_v13 = vld [vmem:[%s7714_s3 + $0x104] ss:$8 sps:$4 sm:$0xff]  }
 0x1ce   :  { %1298 = vmatprep.mubr.bf16.mxu1 %v5491_v60  ;;  %1823 = vmatprep.mubr.bf16.mxu0 %v5496_v13 }
 0x1d5   :  { %1299 = vmatmul.mubr.bf16.gmra.mrb[92].mxu1 %v5493_v1 }
 0x230   :  { %v1150_v11 = vpop.f32.mrb[32].mxu1 }
 0x231   :  { %v1151_v24 = vadd.f32 %v1150_v11, %v6251_v38  ;;  %v1152_v56 = vpop.f32.mrb[33].mxu1 }
 0x232   :  { %v1153_v21 = vadd.f32 %v1152_v56, %v6251_v38  ;;  %v1154_v44 = vpop.f32.mrb[34].mxu1 }
 0x233   :  { %v1155_v29 = vadd.f32 %v1154_v44, %v6249_v37  ;;  %v1156_v47 = vpop.f32.mrb[35].mxu1  ;;  %v1309_v57 = vmax.f32 %v1151_v24, 0.0 }
 0x234   :  { %v1157_v60 = vadd.f32 %v1156_v47, %v6249_v37  ;;  %v1310_v1 = vmax.f32 %v1153_v21, 0.0 }
 0x235   :  { %v1311_v48 = vmax.f32 %v1155_v29, 0.0 }
 0x236   :  { %v1312_v4 = vmax.f32 %v1157_v60, 0.0 }
 0x237   :  { %v1373_v33 = vpack.c.bf16 %v1311_v48, %v1309_v57 }
 0x238   :  { %v1374_v11 = vpack.c.bf16 %v1312_v4, %v1310_v1  ;;  %v1160_v35 = vpop.f32.mrb[36].mxu1 }
 0x239   :  { %v1161_v38 = vadd.f32 %v1160_v35, %v6261_v46  ;;  %v1162_v56 = vpop.f32.mrb[37].mxu1 }
 0x23a   :  { %v1163_v44 = vadd.f32 %v1162_v56, %v6261_v46  ;;  %v1164_v25 = vpop.f32.mrb[38].mxu1  ;;  %1791 = vmatprep.subr.bf16.mxu0 %v1374_v11 }
 0x23b   :  { %v1165_v12 = vadd.f32 %v1164_v25, %v6259_v45  ;;  %v1166_v31 = vpop.f32.mrb[39].mxu1  ;;  %1792 = vmatpush1.bf16.msra.mxu0 %v1373_v33  ;;  %v1313_v47 = vmax.f32 %v1161_v38, 0.0 }
 0x23c   :  { %v1167_v37 = vadd.f32 %v1166_v31, %v6259_v45  ;;  %v1314_v24 = vmax.f32 %v1163_v44, 0.0 }
 0x23d   :  { %v1315_v29 = vmax.f32 %v1165_v12, 0.0 }
 0x23e   :  { %v1316_v21 = vmax.f32 %v1167_v37, 0.0 }
 0x23f   :  { %v1375_v48 = vpack.c.bf16 %v1315_v29, %v1313_v47 }
 0x240   :  { %v1376_v4 = vpack.c.bf16 %v1316_v21, %v1314_v24  ;;  %v1170_v57 = vpop.f32.mrb[40].mxu1 }
 0x241   :  { %v1171_v35 = vadd.f32 %v1170_v57, %v6271_v54  ;;  %v1172_v13 = vpop.f32.mrb[41].mxu1 }
 0x242   :  { %v1173_v46 = vadd.f32 %v1172_v13, %v6271_v54  ;;  %v1174_v60 = vpop.f32.mrb[42].mxu1  ;;  %1793 = vmatprep.subr.bf16.mxu0 %v1376_v4 }
 0x243   :  { %v1175_v25 = vadd.f32 %v1174_v60, %v6269_v53  ;;  %v1176_v1 = vpop.f32.mrb[43].mxu1  ;;  %1794 = vmatpush1.bf16.msra.mxu0 %v1375_v48  ;;  %v1317_v31 = vmax.f32 %v1171_v35, 0.0 }
 0x244   :  { %v1177_v45 = vadd.f32 %v1176_v1, %v6269_v53  ;;  %v1318_v33 = vmax.f32 %v1173_v46, 0.0 }
 0x245   :  { %v1319_v12 = vmax.f32 %v1175_v25, 0.0 }
 0x246   :  { %v1320_v11 = vmax.f32 %v1177_v45, 0.0 }
 0x247   :  { %v1377_v38 = vpack.c.bf16 %v1319_v12, %v1317_v31 }
 0x248   :  { %v1378_v56 = vpack.c.bf16 %v1320_v11, %v1318_v33  ;;  %v1180_v44 = vpop.f32.mrb[44].mxu1 }
 0x249   :  { %v1181_v37 = vadd.f32 %v1180_v44, %v6281_v62  ;;  %v1182_v47 = vpop.f32.mrb[45].mxu1 }
 0x24a   :  { %v1183_v54 = vadd.f32 %v1182_v47, %v6281_v62  ;;  %v1184_v29 = vpop.f32.mrb[46].mxu1  ;;  %1795 = vmatprep.subr.bf16.mxu0 %v1378_v56 }
 0x24b   :  { %v1185_v24 = vadd.f32 %v1184_v29, %v6279_v61  ;;  %v1186_v21 = vpop.f32.mrb[47].mxu1  ;;  %1796 = vmatpush1.bf16.msra.mxu0 %v1377_v38  ;;  %v1321_v48 = vmax.f32 %v1181_v37, 0.0 }
 0x24c   :  { %v1187_v53 = vadd.f32 %v1186_v21, %v6279_v61  ;;  %v1322_v57 = vmax.f32 %v1183_v54, 0.0 }
 0x24d   :  { %v1323_v4 = vmax.f32 %v1185_v24, 0.0 }
 0x24e   :  { %v1324_v35 = vmax.f32 %v1187_v53, 0.0 }
 0x24f   :  { %v1379_v13 = vpack.c.bf16 %v1323_v4, %v1321_v48 }
 0x250   :  { %v1380_v46 = vpack.c.bf16 %v1324_v35, %v1322_v57  ;;  %v1190_v60 = vpop.f32.mrb[48].mxu1 }
 0x251   :  { %v1191_v25 = vadd.f32 %v1190_v60, %v6291_v7  ;;  %v1192_v1 = vpop.f32.mrb[49].mxu1 }
 0x252   :  { %v1193_v62 = vadd.f32 %v1192_v1, %v6291_v7  ;;  %v1194_v45 = vpop.f32.mrb[50].mxu1  ;;  %1797 = vmatprep.subr.bf16.mxu0 %v1380_v46 }
 0x253   :  { %v1195_v31 = vadd.f32 %v1194_v45, %v6289_v6  ;;  %v1196_v12 = vpop.f32.mrb[51].mxu1  ;;  %1798 = vmatpush1.bf16.msra.mxu0 %v1379_v13  ;;  %v1325_v33 = vmax.f32 %v1191_v25, 0.0  ;;  %v7816_v25 = vld [vmem:[#allocation3_spill] sm:$0xff] }
 0x254   :  { %v1197_v61 = vadd.f32 %v1196_v12, %v6289_v6  ;;  %v1326_v38 = vmax.f32 %v1193_v62, 0.0 }
 0x255   :  { %v1327_v11 = vmax.f32 %v1195_v31, 0.0  ;;  %v7817_v31 = vld [vmem:[#allocation2_spill] sm:$0xff] }
 0x256   :  { %v1328_v56 = vmax.f32 %v1197_v61, 0.0 }
 0x257   :  { %v1381_v44 = vpack.c.bf16 %v1327_v11, %v1325_v33 }
 0x258   :  { %v1382_v37 = vpack.c.bf16 %v1328_v56, %v1326_v38  ;;  %v1200_v47 = vpop.f32.mrb[52].mxu1 }
 0x259   :  { %v1201_v54 = vadd.f32 %v1200_v47, %v6301_v15  ;;  %v1202_v29 = vpop.f32.mrb[53].mxu1 }
 0x25a   :  { %v1203_v7 = vadd.f32 %v1202_v29, %v6301_v15  ;;  %v1204_v24 = vpop.f32.mrb[54].mxu1  ;;  %1799 = vmatprep.subr.bf16.mxu0 %v1382_v37 }
 0x25b   :  { %v1205_v21 = vadd.f32 %v1204_v24, %v6299_v14  ;;  %v1206_v53 = vpop.f32.mrb[55].mxu1  ;;  %1800 = vmatpush1.bf16.msra.mxu0 %v1381_v44  ;;  %v1329_v48 = vmax.f32 %v1201_v54, 0.0  ;;  %v7818_v54 = vld [vmem:[#allocation5_spill] sm:$0xff] }
 0x25c   :  { %v1207_v6 = vadd.f32 %v1206_v53, %v6299_v14  ;;  %v1330_v57 = vmax.f32 %v1203_v7, 0.0  ;;  %v7819_v53 = vld [vmem:[#allocation4_spill] sm:$0xff] }
 0x25d   :  { %v1331_v4 = vmax.f32 %v1205_v21, 0.0 }
 0x25e   :  { %v1332_v35 = vmax.f32 %v1207_v6, 0.0 }
 0x25f   :  { %v1383_v13 = vpack.c.bf16 %v1331_v4, %v1329_v48 }
 0x260   :  { %v1384_v46 = vpack.c.bf16 %v1332_v35, %v1330_v57  ;;  %v1210_v60 = vpop.f32.mrb[56].mxu1 }
 0x261   :  { %v1211_v1 = vadd.f32 %v1210_v60, %v7816_v25  ;;  %v1212_v62 = vpop.f32.mrb[57].mxu1 }
 0x262   :  { %v1213_v15 = vadd.f32 %v1212_v62, %v7816_v25  ;;  %v1214_v45 = vpop.f32.mrb[58].mxu1  ;;  %1801 = vmatprep.subr.bf16.mxu0 %v1384_v46  ;;  %v7820_v62 = vld [vmem:[#allocation7_spill] sm:$0xff] }
 0x263   :  { %v1215_v12 = vadd.f32 %v1214_v45, %v7817_v31  ;;  %v1216_v61 = vpop.f32.mrb[59].mxu1  ;;  %1802 = vmatpush1.bf16.msra.mxu0 %v1383_v13  ;;  %v1333_v33 = vmax.f32 %v1211_v1, 0.0 }
 0x264   :  { %v1217_v14 = vadd.f32 %v1216_v61, %v7817_v31  ;;  %v1334_v38 = vmax.f32 %v1213_v15, 0.0  ;;  %v7821_v61 = vld [vmem:[#allocation6_spill] sm:$0xff] }
 0x265   :  { %v1335_v11 = vmax.f32 %v1215_v12, 0.0 }
 0x266   :  { %v1336_v56 = vmax.f32 %v1217_v14, 0.0 }
 0x267   :  { %v1385_v44 = vpack.c.bf16 %v1335_v11, %v1333_v33 }
 0x268   :  { %v1386_v37 = vpack.c.bf16 %v1336_v56, %v1334_v38  ;;  %v1220_v47 = vpop.f32.mrb[60].mxu1 }
 0x269   :  { %v1221_v29 = vadd.f32 %v1220_v47, %v7818_v54  ;;  %v1222_v7 = vpop.f32.mrb[61].mxu1 }
 0x26a   :  { %v1223_v24 = vadd.f32 %v1222_v7, %v7818_v54  ;;  %v1224_v21 = vpop.f32.mrb[62].mxu1  ;;  %1803 = vmatprep.subr.bf16.mxu0 %v1386_v37  ;;  %v7822_v7 = vld [vmem:[#allocation9_spill] sm:$0xff] }
 0x26b   :  { %v1225_v6 = vadd.f32 %v1224_v21, %v7819_v53  ;;  %v1226_v48 = vpop.f32.mrb[63].mxu1  ;;  %1804 = vmatpush1.bf16.msra.mxu0 %v1385_v44  ;;  %v1337_v57 = vmax.f32 %v1221_v29, 0.0 }
 0x26c   :  { %v1227_v4 = vadd.f32 %v1226_v48, %v7819_v53  ;;  %v1338_v13 = vmax.f32 %v1223_v24, 0.0  ;;  %v7823_v48 = vld [vmem:[#allocation8_spill] sm:$0xff] }
 0x26d   :  { %v1339_v35 = vmax.f32 %v1225_v6, 0.0 }
 0x26e   :  { %v1340_v46 = vmax.f32 %v1227_v4, 0.0 }
 0x26f   :  { %v1387_v60 = vpack.c.bf16 %v1339_v35, %v1337_v57 }
 0x270   :  { %v1388_v25 = vpack.c.bf16 %v1340_v46, %v1338_v13  ;;  %v1230_v1 = vpop.f32.mrb[64].mxu1 }
 0x271   :  { %v1231_v15 = vadd.f32 %v1230_v1, %v7820_v62  ;;  %v1232_v45 = vpop.f32.mrb[65].mxu1 }
 0x272   :  { %v1233_v31 = vadd.f32 %v1232_v45, %v7820_v62  ;;  %v1234_v12 = vpop.f32.mrb[66].mxu1  ;;  %1805 = vmatprep.subr.bf16.mxu0 %v1388_v25  ;;  %v7824_v45 = vld [vmem:[#allocation11_spill] sm:$0xff] }
 0x273   :  { %v1235_v14 = vadd.f32 %v1234_v12, %v7821_v61  ;;  %v1236_v33 = vpop.f32.mrb[67].mxu1  ;;  %1806 = vmatpush1.bf16.msra.mxu0 %v1387_v60  ;;  %v1341_v38 = vmax.f32 %v1231_v15, 0.0 }
 0x274   :  { %v1237_v11 = vadd.f32 %v1236_v33, %v7821_v61  ;;  %v1342_v44 = vmax.f32 %v1233_v31, 0.0  ;;  %v7825_v33 = vld [vmem:[#allocation10_spill] sm:$0xff] }
 0x275   :  { %v1343_v56 = vmax.f32 %v1235_v14, 0.0 }
 0x276   :  { %v1344_v37 = vmax.f32 %v1237_v11, 0.0 }
 0x277   :  { %v1389_v47 = vpack.c.bf16 %v1343_v56, %v1341_v38 }
 0x278   :  { %v1390_v54 = vpack.c.bf16 %v1344_v37, %v1342_v44  ;;  %v1240_v29 = vpop.f32.mrb[68].mxu1 }
 0x279   :  { %v1241_v24 = vadd.f32 %v1240_v29, %v7822_v7  ;;  %v1242_v21 = vpop.f32.mrb[69].mxu1 }
 0x27a   :  { %v1243_v53 = vadd.f32 %v1242_v21, %v7822_v7  ;;  %v1244_v6 = vpop.f32.mrb[70].mxu1  ;;  %1807 = vmatprep.subr.bf16.mxu0 %v1390_v54  ;;  %v7826_v21 = vld [vmem:[#allocation13_spill] sm:$0xff] }
 0x27b   :  { %v1245_v4 = vadd.f32 %v1244_v6, %v7823_v48  ;;  %v1246_v57 = vpop.f32.mrb[71].mxu1  ;;  %1808 = vmatpush1.bf16.msra.mxu0 %v1389_v47  ;;  %v1345_v13 = vmax.f32 %v1241_v24, 0.0 }
 0x27c   :  { %v1247_v35 = vadd.f32 %v1246_v57, %v7823_v48  ;;  %v1346_v60 = vmax.f32 %v1243_v53, 0.0  ;;  %v7827_v57 = vld [vmem:[#allocation12_spill] sm:$0xff] }
 0x27d   :  { %v1347_v46 = vmax.f32 %v1245_v4, 0.0 }
 0x27e   :  { %v1348_v25 = vmax.f32 %v1247_v35, 0.0 }
 0x27f   :  { %v1391_v1 = vpack.c.bf16 %v1347_v46, %v1345_v13 }
 0x280   :  { %v1392_v62 = vpack.c.bf16 %v1348_v25, %v1346_v60  ;;  %v1250_v15 = vpop.f32.mrb[72].mxu1 }
 0x281   :  { %v1251_v31 = vadd.f32 %v1250_v15, %v7824_v45  ;;  %v1252_v12 = vpop.f32.mrb[73].mxu1 }
 0x282   :  { %v1253_v61 = vadd.f32 %v1252_v12, %v7824_v45  ;;  %v1254_v14 = vpop.f32.mrb[74].mxu1  ;;  %1809 = vmatprep.subr.bf16.mxu0 %v1392_v62  ;;  %v7828_v12 = vld [vmem:[#allocation15_spill] sm:$0xff] }
 0x283   :  { %v1255_v11 = vadd.f32 %v1254_v14, %v7825_v33  ;;  %v1256_v38 = vpop.f32.mrb[75].mxu1  ;;  %1810 = vmatpush1.bf16.msra.mxu0 %v1391_v1  ;;  %v1349_v44 = vmax.f32 %v1251_v31, 0.0 }
 0x284   :  { %v1257_v56 = vadd.f32 %v1256_v38, %v7825_v33  ;;  %v1350_v47 = vmax.f32 %v1253_v61, 0.0  ;;  %v7829_v38 = vld [vmem:[#allocation14_spill] sm:$0xff] }
 0x285   :  { %v1351_v37 = vmax.f32 %v1255_v11, 0.0 }
 0x286   :  { %v1352_v54 = vmax.f32 %v1257_v56, 0.0 }
 0x287   :  { %v1393_v29 = vpack.c.bf16 %v1351_v37, %v1349_v44 }
 0x288   :  { %v1394_v7 = vpack.c.bf16 %v1352_v54, %v1350_v47  ;;  %v1260_v24 = vpop.f32.mrb[76].mxu1 }
 0x289   :  { %v1261_v53 = vadd.f32 %v1260_v24, %v7826_v21  ;;  %v1262_v6 = vpop.f32.mrb[77].mxu1 }
 0x28a   :  { %v1263_v48 = vadd.f32 %v1262_v6, %v7826_v21  ;;  %v1264_v4 = vpop.f32.mrb[78].mxu1  ;;  %1811 = vmatprep.subr.bf16.mxu0 %v1394_v7  ;;  %v7830_v6 = vld [vmem:[#allocation17_spill] sm:$0xff] }
 0x28b   :  { %v1265_v35 = vadd.f32 %v1264_v4, %v7827_v57  ;;  %v1266_v13 = vpop.f32.mrb[79].mxu1  ;;  %1812 = vmatpush1.bf16.msra.mxu0 %v1393_v29  ;;  %v1353_v60 = vmax.f32 %v1261_v53, 0.0 }
 0x28c   :  { %v1267_v46 = vadd.f32 %v1266_v13, %v7827_v57  ;;  %v1354_v1 = vmax.f32 %v1263_v48, 0.0  ;;  %v7831_v13 = vld [vmem:[#allocation16_spill] sm:$0xff] }
 0x28d   :  { %v1355_v25 = vmax.f32 %v1265_v35, 0.0 }
 0x28e   :  { %v1356_v62 = vmax.f32 %v1267_v46, 0.0 }
 0x28f   :  { %v1395_v15 = vpack.c.bf16 %v1355_v25, %v1353_v60 }
 0x290   :  { %v1396_v45 = vpack.c.bf16 %v1356_v62, %v1354_v1  ;;  %v1270_v31 = vpop.f32.mrb[80].mxu1 }
 0x291   :  { %v1271_v61 = vadd.f32 %v1270_v31, %v7828_v12  ;;  %v1272_v14 = vpop.f32.mrb[81].mxu1 }
 0x292   :  { %v1273_v33 = vadd.f32 %v1272_v14, %v7828_v12  ;;  %v1274_v11 = vpop.f32.mrb[82].mxu1  ;;  %1813 = vmatprep.subr.bf16.mxu0 %v1396_v45  ;;  %v7832_v14 = vld [vmem:[#allocation19_spill] sm:$0xff] }
 0x293   :  { %v1275_v56 = vadd.f32 %v1274_v11, %v7829_v38  ;;  %v1276_v44 = vpop.f32.mrb[83].mxu1  ;;  %1814 = vmatpush1.bf16.msra.mxu0 %v1395_v15  ;;  %v1357_v47 = vmax.f32 %v1271_v61, 0.0 }
 0x294   :  { %v1277_v37 = vadd.f32 %v1276_v44, %v7829_v38  ;;  %v1358_v29 = vmax.f32 %v1273_v33, 0.0  ;;  %v7833_v44 = vld [vmem:[#allocation18_spill] sm:$0xff] }
 0x295   :  { %v1359_v54 = vmax.f32 %v1275_v56, 0.0 }
 0x296   :  { %v1360_v7 = vmax.f32 %v1277_v37, 0.0 }
 0x297   :  { %v1397_v24 = vpack.c.bf16 %v1359_v54, %v1357_v47 }
 0x298   :  { %v1398_v21 = vpack.c.bf16 %v1360_v7, %v1358_v29  ;;  %v1280_v53 = vpop.f32.mrb[84].mxu1 }
 0x299   :  { %v1281_v48 = vadd.f32 %v1280_v53, %v7830_v6  ;;  %v1282_v4 = vpop.f32.mrb[85].mxu1 }
 0x29a   :  { %v1283_v57 = vadd.f32 %v1282_v4, %v7830_v6  ;;  %v1284_v35 = vpop.f32.mrb[86].mxu1  ;;  %1815 = vmatprep.subr.bf16.mxu0 %v1398_v21 }
 0x29b   :  { %v1285_v46 = vadd.f32 %v1284_v35, %v7831_v13  ;;  %v1286_v60 = vpop.f32.mrb[87].mxu1  ;;  %1816 = vmatpush1.bf16.msra.mxu0 %v1397_v24  ;;  %v1361_v1 = vmax.f32 %v1281_v48, 0.0 }
 0x29c   :  { %v1287_v25 = vadd.f32 %v1286_v60, %v7831_v13  ;;  %v1362_v15 = vmax.f32 %v1283_v57, 0.0 }
 0x29d   :  { %v1363_v62 = vmax.f32 %v1285_v46, 0.0  ;;  %v7834_v46 = vld [vmem:[#allocation20_spill] sm:$0xff] }
 0x29e   :  { %v1364_v45 = vmax.f32 %v1287_v25, 0.0 }
 0x29f   :  { %v1399_v31 = vpack.c.bf16 %v1363_v62, %v1361_v1 }
 0x2a0   :  { %v1400_v12 = vpack.c.bf16 %v1364_v45, %v1362_v15  ;;  %v1290_v61 = vpop.f32.mrb[88].mxu1 }
 0x2a1   :  { %v1291_v33 = vadd.f32 %v1290_v61, %v7832_v14  ;;  %v1292_v11 = vpop.f32.mrb[89].mxu1 }
 0x2a2   :  { %v1293_v38 = vadd.f32 %v1292_v11, %v7832_v14  ;;  %v1294_v56 = vpop.f32.mrb[90].mxu1  ;;  %1817 = vmatprep.subr.bf16.mxu0 %v1400_v12  ;;  %v5494_v14 = vld [vmem:[%s7714_s3 + $0x100] ss:$8 sps:$4 sm:$0xff]   ;;  %v5500_v11 = vld [vmem:[%s7714_s3 + $0x124] ss:$8 sps:$4 sm:$0xff]  }
 0x2a3   :  { %v1295_v37 = vadd.f32 %v1294_v56, %v7833_v44  ;;  %v1296_v47 = vpop.f32.mrb[91].mxu1  ;;  %1818 = vmatpush1.bf16.msra.mxu0 %v1399_v31  ;;  %v1365_v29 = vmax.f32 %v1291_v33, 0.0  ;;  %v5499_v33 = vld [vmem:[%s7714_s3 + $0x110] ss:$8 sps:$4 sm:$0xff]   ;;  %v5503_v56 = vld [vmem:[%s7714_s3 + $0x134] ss:$8 sps:$4 sm:$0xff]  }
 0x2a4   :  { %v1297_v54 = vadd.f32 %v1296_v47, %v7833_v44  ;;  %v1366_v24 = vmax.f32 %v1293_v38, 0.0  ;;  %v5502_v38 = vld [vmem:[%s7714_s3 + $0x120] ss:$8 sps:$4 sm:$0xff]   ;;  %v5505_v44 = vld [vmem:[%s7714_s3 + $0x130] ss:$8 sps:$4 sm:$0xff]  }
 0x2a5   :  { %v1367_v7 = vmax.f32 %v1295_v37, 0.0  ;;  %v5506_v37 = vld [vmem:[%s7714_s3 + $0x144] ss:$8 sps:$4 sm:$0xff]   ;;  %v5508_v47 = vld [vmem:[%s7714_s3 + $0x140] ss:$8 sps:$4 sm:$0xff]  }
 0x2a6   :  { %v1368_v21 = vmax.f32 %v1297_v54, 0.0  ;;  %v5509_v54 = vld [vmem:[%s7714_s3 + $0x154] ss:$8 sps:$4 sm:$0xff]  }
 0x2a7   :  { %v1401_v53 = vpack.c.bf16 %v1367_v7, %v1365_v29  ;;  %v5511_v29 = vld [vmem:[%s7714_s3 + $0x150] ss:$8 sps:$4 sm:$0xff]   ;;  %v5512_v7 = vld [vmem:[%s7714_s3 + $0x164] ss:$8 sps:$4 sm:$0xff]  }
 0x2a8   :  { %v1402_v6 = vpack.c.bf16 %v1368_v21, %v1366_v24  ;;  %v1300_v48 = vpop.f32.mrb[92].mxu1  ;;  %v5514_v24 = vld [vmem:[%s7714_s3 + $0x160] ss:$8 sps:$4 sm:$0xff]   ;;  %v5515_v21 = vld [vmem:[%s7714_s3 + $0x174] ss:$8 sps:$4 sm:$0xff]  }
 0x2a9   :  { %v1301_v4 = vadd.f32 %v1300_v48, %v6412_v30  ;;  %v1302_v57 = vpop.f32.mrb[93].mxu1  ;;  %v5520_v48 = vld [vmem:[%s7714_s3 + $0x180] ss:$8 sps:$4 sm:$0xff]  }
 0x2aa   :  { %v1303_v35 = vadd.f32 %v1302_v57, %v6412_v30  ;;  %v1304_v13 = vpop.f32.mrb[94].mxu1  ;;  %1819 = vmatprep.subr.bf16.mxu0 %v1402_v6  ;;  %v5497_v30 = vld [vmem:[%s7714_s3 + $0x114] ss:$8 sps:$4 sm:$0xff]   ;;  %v5518_v6 = vld [vmem:[%s7714_s3 + $0x184] ss:$8 sps:$4 sm:$0xff]  }
 0x2ab   :  { %v1305_v60 = vadd.f32 %v1304_v13, %v7834_v46  ;;  %v1306_v25 = vpop.f32.mrb[95].mxu1  ;;  %1820 = vmatpush1.bf16.msra.mxu0 %v1401_v53  ;;  %v1369_v62 = vmax.f32 %v1301_v4, 0.0  ;;  %v5517_v53 = vld [vmem:[%s7714_s3 + $0x170] ss:$8 sps:$4 sm:$0xff]   ;;  %v5521_v4 = vld [vmem:[%s7714_s3 + $0x194] ss:$8 sps:$4 sm:$0xff]  }
 0x2ac   :  { %v1307_v1 = vadd.f32 %v1306_v25, %v7834_v46  ;;  %v1370_v45 = vmax.f32 %v1303_v35, 0.0  ;;  %v5523_v57 = vld [vmem:[%s7714_s3 + $0x190] ss:$8 sps:$4 sm:$0xff]   ;;  %v5524_v35 = vld [vmem:[%s7714_s3 + $0x1a4] ss:$8 sps:$4 sm:$0xff]  }
 0x2ad   :  { %v1371_v15 = vmax.f32 %v1305_v60, 0.0  ;;  %v5526_v13 = vld [vmem:[%s7714_s3 + $0x1a0] ss:$8 sps:$4 sm:$0xff]   ;;  %v5527_v46 = vld [vmem:[%s7714_s3 + $0x1b4] ss:$8 sps:$4 sm:$0xff]  }
 0x2ae   :  { %v1372_v31 = vmax.f32 %v1307_v1, 0.0  ;;  %v5529_v60 = vld [vmem:[%s7714_s3 + $0x1b0] ss:$8 sps:$4 sm:$0xff]   ;;  %v5530_v25 = vld [vmem:[%s7714_s3 + $0x1c4] ss:$8 sps:$4 sm:$0xff]  }
 0x2af   :  { %v1403_v12 = vpack.c.bf16 %v1371_v15, %v1369_v62  ;;  %v5532_v1 = vld [vmem:[%s7714_s3 + $0x1c0] ss:$8 sps:$4 sm:$0xff]   ;;  %v5533_v62 = vld [vmem:[%s7714_s3 + $0x1d4] ss:$8 sps:$4 sm:$0xff]   ;;  %v5535_v15 = vld [vmem:[%s7714_s3 + $0x1d0] ss:$8 sps:$4 sm:$0xff]  }
 0x2b0   :  { %v1404_v61 = vpack.c.bf16 %v1372_v31, %v1370_v45  ;;  %v5536_v45 = vld [vmem:[%s7714_s3 + $0x1e4] ss:$8 sps:$4 sm:$0xff]   ;;  %v5538_v31 = vld [vmem:[%s7714_s3 + $0x1e0] ss:$8 sps:$4 sm:$0xff]  }
 0x2b2   :  { %1821 = vmatprep.subr.bf16.mxu0 %v1404_v61  ;;  %v5541_v61 = vld [vmem:[%s7714_s3 + $0x1f0] ss:$8 sps:$4 sm:$0xff]  }
 0x2b3   :  { %1822 = vmatpush1.bf16.msra.mxu0 %v1403_v12  ;;  %v5539_v12 = vld [vmem:[%s7714_s3 + $0x1f4] ss:$8 sps:$4 sm:$0xff]  }
 0x2b6   :  { %1824 = vmatmul.mubr.bf16.vlgmr.msra.gmra.mrb[32].mxu0 %v5494_v14 }
 0x2b7   :  { %1833 = vmatprep.mubr.bf16.mxu0 %v5497_v30 }
 0x2be   :  { %1834 = vmatmul.mubr.bf16.gmra.mrb[36].mxu0 %v5499_v33 }
 0x2bf   :  { %1843 = vmatprep.mubr.bf16.mxu0 %v5500_v11 }
 0x2c6   :  { %1844 = vmatmul.mubr.bf16.gmra.mrb[40].mxu0 %v5502_v38 }
 0x2c7   :  { %1853 = vmatprep.mubr.bf16.mxu0 %v5503_v56  ;;  %v7835_v56 = vld [vmem:[#allocation21_spill] sm:$0xff] }
 0x2ce   :  { %1854 = vmatmul.mubr.bf16.gmra.mrb[44].mxu0 %v5505_v44 }
 0x2cf   :  { %1863 = vmatprep.mubr.bf16.mxu0 %v5506_v37 }
 0x2d6   :  { %1864 = vmatmul.mubr.bf16.gmra.mrb[48].mxu0 %v5508_v47  ;;  %v5544_v47 = vld [vmem:[%s7714_s3 + $0x204] ss:$8 sps:$4 sm:$0xff]  }
 0x2d7   :  { %1873 = vmatprep.mubr.bf16.mxu0 %v5509_v54  ;;  %2498 = vmatprep.mubr.bf16.mxu1 %v5544_v47 }
 0x2de   :  { %1874 = vmatmul.mubr.bf16.gmra.mrb[52].mxu0 %v5511_v29 }
 0x2df   :  { %1883 = vmatprep.mubr.bf16.mxu0 %v5512_v7 }
 0x2e6   :  { %1884 = vmatmul.mubr.bf16.gmra.mrb[56].mxu0 %v5514_v24 }
 0x2e7   :  { %1893 = vmatprep.mubr.bf16.mxu0 %v5515_v21 }
 0x2ee   :  { %1894 = vmatmul.mubr.bf16.gmra.mrb[60].mxu0 %v5517_v53 }
 0x2ef   :  { %1903 = vmatprep.mubr.bf16.mxu0 %v5518_v6 }
 0x2f6   :  { %1904 = vmatmul.mubr.bf16.gmra.mrb[64].mxu0 %v5520_v48 }
 0x2f7   :  { %1913 = vmatprep.mubr.bf16.mxu0 %v5521_v4  ;;  %v7836_v4 = vld [vmem:[#allocation22_spill] sm:$0xff] }
 0x2fe   :  { %1914 = vmatmul.mubr.bf16.gmra.mrb[68].mxu0 %v5523_v57 }
 0x2ff   :  { %1923 = vmatprep.mubr.bf16.mxu0 %v5524_v35 }
 0x306   :  { %1924 = vmatmul.mubr.bf16.gmra.mrb[72].mxu0 %v5526_v13 }
 0x307   :  { %1933 = vmatprep.mubr.bf16.mxu0 %v5527_v46  ;;  %v7837_v46 = vld [vmem:[#allocation23_spill] sm:$0xff] }
 0x30e   :  { %1934 = vmatmul.mubr.bf16.gmra.mrb[76].mxu0 %v5529_v60 }
 0x30f   :  { %1943 = vmatprep.mubr.bf16.mxu0 %v5530_v25 }
 0x316   :  { %1944 = vmatmul.mubr.bf16.gmra.mrb[80].mxu0 %v5532_v1 }
 0x317   :  { %1953 = vmatprep.mubr.bf16.mxu0 %v5533_v62 }
 0x31e   :  { %1954 = vmatmul.mubr.bf16.gmra.mrb[84].mxu0 %v5535_v15 }
 0x31f   :  { %1963 = vmatprep.mubr.bf16.mxu0 %v5536_v45 }
 0x326   :  { %1964 = vmatmul.mubr.bf16.gmra.mrb[88].mxu0 %v5538_v31 }
 0x327   :  { %1973 = vmatprep.mubr.bf16.mxu0 %v5539_v12 }
 0x32e   :  { %1974 = vmatmul.mubr.bf16.gmra.mrb[92].mxu0 %v5541_v61 }
 0x389   :  { %v1825_v14 = vpop.f32.mrb[32].mxu0 }
 0x38a   :  { %v1826_v30 = vadd.f32 %v1825_v14, %v6428_v3  ;;  %v1827_v33 = vpop.f32.mrb[33].mxu0 }
 0x38b   :  { %v1828_v11 = vadd.f32 %v1827_v33, %v6428_v3  ;;  %v1829_v38 = vpop.f32.mrb[34].mxu0 }
 0x38c   :  { %v1830_v44 = vadd.f32 %v1829_v38, %v7835_v56  ;;  %v1831_v37 = vpop.f32.mrb[35].mxu0  ;;  %v1984_v29 = vmax.f32 %v1826_v30, 0.0 }
 0x38d   :  { %v1832_v54 = vadd.f32 %v1831_v37, %v7835_v56  ;;  %v1985_v24 = vmax.f32 %v1828_v11, 0.0 }
 0x38e   :  { %v1986_v7 = vmax.f32 %v1830_v44, 0.0 }
 0x38f   :  { %v1987_v21 = vmax.f32 %v1832_v54, 0.0 }
 0x390   :  { %v2048_v53 = vpack.c.bf16 %v1986_v7, %v1984_v29 }
 0x391   :  { %v2049_v6 = vpack.c.bf16 %v1987_v21, %v1985_v24  ;;  %v1835_v48 = vpop.f32.mrb[36].mxu0 }
 0x392   :  { %v1836_v3 = vadd.f32 %v1835_v48, %v7836_v4  ;;  %v1837_v57 = vpop.f32.mrb[37].mxu0 }
 0x393   :  { %v1838_v35 = vadd.f32 %v1837_v57, %v7836_v4  ;;  %v1839_v13 = vpop.f32.mrb[38].mxu0  ;;  %2466 = vmatprep.subr.bf16.mxu1 %v2049_v6 }
 0x394   :  { %v1840_v60 = vadd.f32 %v1839_v13, %v7837_v46  ;;  %v1841_v25 = vpop.f32.mrb[39].mxu0  ;;  %2467 = vmatpush1.bf16.msra.mxu1 %v2048_v53  ;;  %v1988_v62 = vmax.f32 %v1836_v3, 0.0 }
 0x395   :  { %v1842_v1 = vadd.f32 %v1841_v25, %v7837_v46  ;;  %v1989_v45 = vmax.f32 %v1838_v35, 0.0 }
 0x396   :  { %v1990_v15 = vmax.f32 %v1840_v60, 0.0 }
 0x397   :  { %v1991_v31 = vmax.f32 %v1842_v1, 0.0 }
 0x398   :  { %v2050_v12 = vpack.c.bf16 %v1990_v15, %v1988_v62 }
 0x399   :  { %v2051_v61 = vpack.c.bf16 %v1991_v31, %v1989_v45  ;;  %v1845_v14 = vpop.f32.mrb[40].mxu0 }
 0x39a   :  { %v1846_v30 = vadd.f32 %v1845_v14, %v6458_v49  ;;  %v1847_v33 = vpop.f32.mrb[41].mxu0 }
 0x39b   :  { %v1848_v11 = vadd.f32 %v1847_v33, %v6458_v49  ;;  %v1849_v38 = vpop.f32.mrb[42].mxu0  ;;  %2468 = vmatprep.subr.bf16.mxu1 %v2051_v61 }
 0x39c   :  { %v1850_v56 = vadd.f32 %v1849_v38, %v6472_v34  ;;  %v1851_v44 = vpop.f32.mrb[43].mxu0  ;;  %2469 = vmatpush1.bf16.msra.mxu1 %v2050_v12  ;;  %v1992_v47 = vmax.f32 %v1846_v30, 0.0 }
 0x39d   :  { %v1852_v37 = vadd.f32 %v1851_v44, %v6472_v34  ;;  %v1993_v29 = vmax.f32 %v1848_v11, 0.0 }
 0x39e   :  { %v1994_v54 = vmax.f32 %v1850_v56, 0.0 }
 0x39f   :  { %v1995_v7 = vmax.f32 %v1852_v37, 0.0 }
 0x3a0   :  { %v2052_v24 = vpack.c.bf16 %v1994_v54, %v1992_v47 }
 0x3a1   :  { %v2053_v21 = vpack.c.bf16 %v1995_v7, %v1993_v29  ;;  %v1855_v53 = vpop.f32.mrb[44].mxu0 }
 0x3a2   :  { %v1856_v6 = vadd.f32 %v1855_v53, %v6485_v41  ;;  %v1857_v48 = vpop.f32.mrb[45].mxu0 }
 0x3a3   :  { %v1858_v49 = vadd.f32 %v1857_v48, %v6485_v41  ;;  %v1859_v4 = vpop.f32.mrb[46].mxu0  ;;  %2470 = vmatprep.subr.bf16.mxu1 %v2053_v21 }
 0x3a4   :  { %v1860_v3 = vadd.f32 %v1859_v4, %v6500_v36  ;;  %v1861_v57 = vpop.f32.mrb[47].mxu0  ;;  %2471 = vmatpush1.bf16.msra.mxu1 %v2052_v24  ;;  %v1996_v35 = vmax.f32 %v1856_v6, 0.0 }
 0x3a5   :  { %v1862_v34 = vadd.f32 %v1861_v57, %v6500_v36  ;;  %v1997_v46 = vmax.f32 %v1858_v49, 0.0 }
 0x3a6   :  { %v1998_v13 = vmax.f32 %v1860_v3, 0.0 }
 0x3a7   :  { %v1999_v60 = vmax.f32 %v1862_v34, 0.0 }
 0x3a8   :  { %v2054_v25 = vpack.c.bf16 %v1998_v13, %v1996_v35 }
 0x3a9   :  { %v2055_v1 = vpack.c.bf16 %v1999_v60, %v1997_v46  ;;  %v1865_v62 = vpop.f32.mrb[48].mxu0 }
 0x3aa   :  { %v1866_v15 = vadd.f32 %v1865_v62, %v6513_v17  ;;  %v1867_v45 = vpop.f32.mrb[49].mxu0 }
 0x3ab   :  { %v1868_v41 = vadd.f32 %v1867_v45, %v6513_v17  ;;  %v1869_v31 = vpop.f32.mrb[50].mxu0  ;;  %2472 = vmatprep.subr.bf16.mxu1 %v2055_v1 }
 0x3ac   :  { %v1870_v12 = vadd.f32 %v1869_v31, %v6531_v0  ;;  %v1871_v61 = vpop.f32.mrb[51].mxu0  ;;  %2473 = vmatpush1.bf16.msra.mxu1 %v2054_v25  ;;  %v2000_v14 = vmax.f32 %v1866_v15, 0.0 }
 0x3ad   :  { %v1872_v36 = vadd.f32 %v1871_v61, %v6531_v0  ;;  %v2001_v33 = vmax.f32 %v1868_v41, 0.0 }
 0x3ae   :  { %v2002_v30 = vmax.f32 %v1870_v12, 0.0 }
 0x3af   :  { %v2003_v11 = vmax.f32 %v1872_v36, 0.0 }
 0x3b0   :  { %v2056_v38 = vpack.c.bf16 %v2002_v30, %v2000_v14 }
 0x3b1   :  { %v2057_v56 = vpack.c.bf16 %v2003_v11, %v2001_v33  ;;  %v1875_v44 = vpop.f32.mrb[52].mxu0 }
 0x3b2   :  { %v1876_v37 = vadd.f32 %v1875_v44, %v6541_v18  ;;  %v1877_v47 = vpop.f32.mrb[53].mxu0 }
 0x3b3   :  { %v1878_v17 = vadd.f32 %v1877_v47, %v6541_v18  ;;  %v1879_v54 = vpop.f32.mrb[54].mxu0  ;;  %2474 = vmatprep.subr.bf16.mxu1 %v2057_v56 }
 0x3b4   :  { %v1880_v29 = vadd.f32 %v1879_v54, %v6559_v19  ;;  %v1881_v7 = vpop.f32.mrb[55].mxu0  ;;  %2475 = vmatpush1.bf16.msra.mxu1 %v2056_v38  ;;  %v2004_v24 = vmax.f32 %v1876_v37, 0.0 }
 0x3b5   :  { %v1882_v0 = vadd.f32 %v1881_v7, %v6559_v19  ;;  %v2005_v53 = vmax.f32 %v1878_v17, 0.0 }
 0x3b6   :  { %v2006_v21 = vmax.f32 %v1880_v29, 0.0 }
 0x3b7   :  { %v2007_v6 = vmax.f32 %v1882_v0, 0.0 }
 0x3b8   :  { %v2058_v48 = vpack.c.bf16 %v2006_v21, %v2004_v24 }
 0x3b9   :  { %v2059_v49 = vpack.c.bf16 %v2007_v6, %v2005_v53  ;;  %v1885_v4 = vpop.f32.mrb[56].mxu0 }
 0x3ba   :  { %v1886_v3 = vadd.f32 %v1885_v4, %v6569_v50  ;;  %v1887_v57 = vpop.f32.mrb[57].mxu0 }
 0x3bb   :  { %v1888_v18 = vadd.f32 %v1887_v57, %v6569_v50  ;;  %v1889_v34 = vpop.f32.mrb[58].mxu0  ;;  %2476 = vmatprep.subr.bf16.mxu1 %v2059_v49 }
 0x3bc   :  { %v1890_v35 = vadd.f32 %v1889_v34, %v6587_v23  ;;  %v1891_v13 = vpop.f32.mrb[59].mxu0  ;;  %2477 = vmatpush1.bf16.msra.mxu1 %v2058_v48  ;;  %v2008_v46 = vmax.f32 %v1886_v3, 0.0 }
 0x3bd   :  { %v1892_v19 = vadd.f32 %v1891_v13, %v6587_v23  ;;  %v2009_v25 = vmax.f32 %v1888_v18, 0.0 }
 0x3be   :  { %v2010_v60 = vmax.f32 %v1890_v35, 0.0 }
 0x3bf   :  { %v2011_v1 = vmax.f32 %v1892_v19, 0.0 }
 0x3c0   :  { %v2060_v62 = vpack.c.bf16 %v2010_v60, %v2008_v46 }
 0x3c1   :  { %v2061_v15 = vpack.c.bf16 %v2011_v1, %v2009_v25  ;;  %v1895_v45 = vpop.f32.mrb[60].mxu0 }
 0x3c2   :  { %v1896_v41 = vadd.f32 %v1895_v45, %v6597_v43  ;;  %v1897_v31 = vpop.f32.mrb[61].mxu0 }
 0x3c3   :  { %v1898_v50 = vadd.f32 %v1897_v31, %v6597_v43  ;;  %v1899_v12 = vpop.f32.mrb[62].mxu0  ;;  %2478 = vmatprep.subr.bf16.mxu1 %v2061_v15 }
 0x3c4   :  { %v1900_v61 = vadd.f32 %v1899_v12, %v6607_v10  ;;  %v1901_v36 = vpop.f32.mrb[63].mxu0  ;;  %2479 = vmatpush1.bf16.msra.mxu1 %v2060_v62  ;;  %v2012_v14 = vmax.f32 %v1896_v41, 0.0 }
 0x3c5   :  { %v1902_v23 = vadd.f32 %v1901_v36, %v6607_v10  ;;  %v2013_v33 = vmax.f32 %v1898_v50, 0.0 }
 0x3c6   :  { %v2014_v30 = vmax.f32 %v1900_v61, 0.0 }
 0x3c7   :  { %v2015_v11 = vmax.f32 %v1902_v23, 0.0 }
 0x3c8   :  { %v2062_v38 = vpack.c.bf16 %v2014_v30, %v2012_v14 }
 0x3c9   :  { %v2063_v56 = vpack.c.bf16 %v2015_v11, %v2013_v33  ;;  %v1905_v44 = vpop.f32.mrb[64].mxu0 }
 0x3ca   :  { %v1906_v37 = vadd.f32 %v1905_v44, %v6622_v51  ;;  %v1907_v47 = vpop.f32.mrb[65].mxu0 }
 0x3cb   :  { %v1908_v43 = vadd.f32 %v1907_v47, %v6622_v51  ;;  %v1909_v17 = vpop.f32.mrb[66].mxu0  ;;  %2480 = vmatprep.subr.bf16.mxu1 %v2063_v56 }
 0x3cc   :  { %v1910_v54 = vadd.f32 %v1909_v17, %v6624_v40  ;;  %v1911_v29 = vpop.f32.mrb[67].mxu0  ;;  %2481 = vmatpush1.bf16.msra.mxu1 %v2062_v38  ;;  %v2016_v7 = vmax.f32 %v1906_v37, 0.0 }
 0x3cd   :  { %v1912_v10 = vadd.f32 %v1911_v29, %v6624_v40  ;;  %v2017_v24 = vmax.f32 %v1908_v43, 0.0 }
 0x3ce   :  { %v2018_v0 = vmax.f32 %v1910_v54, 0.0 }
 0x3cf   :  { %v2019_v21 = vmax.f32 %v1912_v10, 0.0 }
 0x3d0   :  { %v2064_v53 = vpack.c.bf16 %v2018_v0, %v2016_v7 }
 0x3d1   :  { %v2065_v6 = vpack.c.bf16 %v2019_v21, %v2017_v24  ;;  %v1915_v48 = vpop.f32.mrb[68].mxu0 }
 0x3d2   :  { %v1916_v49 = vadd.f32 %v1915_v48, %v6633_v5  ;;  %v1917_v4 = vpop.f32.mrb[69].mxu0 }
 0x3d3   :  { %v1918_v51 = vadd.f32 %v1917_v4, %v6633_v5  ;;  %v1919_v3 = vpop.f32.mrb[70].mxu0  ;;  %2482 = vmatprep.subr.bf16.mxu1 %v2065_v6 }
 0x3d4   :  { %v1920_v57 = vadd.f32 %v1919_v3, %v6639_v52  ;;  %v1921_v18 = vpop.f32.mrb[71].mxu0  ;;  %2483 = vmatpush1.bf16.msra.mxu1 %v2064_v53  ;;  %v2020_v34 = vmax.f32 %v1916_v49, 0.0 }
 0x3d5   :  { %v1922_v40 = vadd.f32 %v1921_v18, %v6639_v52  ;;  %v2021_v13 = vmax.f32 %v1918_v51, 0.0 }
 0x3d6   :  { %v2022_v35 = vmax.f32 %v1920_v57, 0.0 }
 0x3d7   :  { %v2023_v19 = vmax.f32 %v1922_v40, 0.0 }
 0x3d8   :  { %v2066_v46 = vpack.c.bf16 %v2022_v35, %v2020_v34 }
 0x3d9   :  { %v2067_v60 = vpack.c.bf16 %v2023_v19, %v2021_v13  ;;  %v1925_v25 = vpop.f32.mrb[72].mxu0 }
 0x3da   :  { %v1926_v1 = vadd.f32 %v1925_v25, %v6653_v32  ;;  %v1927_v62 = vpop.f32.mrb[73].mxu0 }
 0x3db   :  { %v1928_v5 = vadd.f32 %v1927_v62, %v6653_v32  ;;  %v1929_v15 = vpop.f32.mrb[74].mxu0  ;;  %2484 = vmatprep.subr.bf16.mxu1 %v2067_v60 }
 0x3dc   :  { %v1930_v45 = vadd.f32 %v1929_v15, %v6655_v42  ;;  %v1931_v41 = vpop.f32.mrb[75].mxu0  ;;  %2485 = vmatpush1.bf16.msra.mxu1 %v2066_v46  ;;  %v2024_v31 = vmax.f32 %v1926_v1, 0.0 }
 0x3dd   :  { %v1932_v52 = vadd.f32 %v1931_v41, %v6655_v42  ;;  %v2025_v12 = vmax.f32 %v1928_v5, 0.0 }
 0x3de   :  { %v2026_v50 = vmax.f32 %v1930_v45, 0.0 }
 0x3df   :  { %v2027_v61 = vmax.f32 %v1932_v52, 0.0 }
 0x3e0   :  { %v2068_v36 = vpack.c.bf16 %v2026_v50, %v2024_v31 }
 0x3e1   :  { %v2069_v23 = vpack.c.bf16 %v2027_v61, %v2025_v12  ;;  %v1935_v14 = vpop.f32.mrb[76].mxu0 }
 0x3e2   :  { %v1936_v30 = vadd.f32 %v1935_v14, %v6665_v9  ;;  %v1937_v33 = vpop.f32.mrb[77].mxu0 }
 0x3e3   :  { %v1938_v32 = vadd.f32 %v1937_v33, %v6665_v9  ;;  %v1939_v11 = vpop.f32.mrb[78].mxu0  ;;  %2486 = vmatprep.subr.bf16.mxu1 %v2069_v23 }
 0x3e4   :  { %v1940_v38 = vadd.f32 %v1939_v11, %v6671_v55  ;;  %v1941_v56 = vpop.f32.mrb[79].mxu0  ;;  %2487 = vmatpush1.bf16.msra.mxu1 %v2068_v36  ;;  %v2028_v44 = vmax.f32 %v1936_v30, 0.0 }
 0x3e5   :  { %v1942_v42 = vadd.f32 %v1941_v56, %v6671_v55  ;;  %v2029_v47 = vmax.f32 %v1938_v32, 0.0 }
 0x3e6   :  { %v2030_v37 = vmax.f32 %v1940_v38, 0.0 }
 0x3e7   :  { %v2031_v43 = vmax.f32 %v1942_v42, 0.0 }
 0x3e8   :  { %v2070_v17 = vpack.c.bf16 %v2030_v37, %v2028_v44 }
 0x3e9   :  { %v2071_v54 = vpack.c.bf16 %v2031_v43, %v2029_v47  ;;  %v1945_v29 = vpop.f32.mrb[80].mxu0 }
 0x3ea   :  { %v1946_v10 = vadd.f32 %v1945_v29, %v6685_v59  ;;  %v1947_v7 = vpop.f32.mrb[81].mxu0  ;;  %v5550_v29 = vld [vmem:[%s7714_s3 + $0x220] ss:$8 sps:$4 sm:$0xff]  }
 0x3eb   :  { %v1948_v9 = vadd.f32 %v1947_v7, %v6685_v59  ;;  %v1949_v0 = vpop.f32.mrb[82].mxu0  ;;  %2488 = vmatprep.subr.bf16.mxu1 %v2071_v54  ;;  %v5548_v54 = vld [vmem:[%s7714_s3 + $0x224] ss:$8 sps:$4 sm:$0xff]   ;;  %v5553_v7 = vld [vmem:[%s7714_s3 + $0x230] ss:$8 sps:$4 sm:$0xff]  }
 0x3ec   :  { %v1950_v24 = vadd.f32 %v1949_v0, %v6687_v16  ;;  %v1951_v21 = vpop.f32.mrb[83].mxu0  ;;  %2489 = vmatpush1.bf16.msra.mxu1 %v2070_v17  ;;  %v2032_v53 = vmax.f32 %v1946_v10, 0.0  ;;  %v5542_v17 = vld [vmem:[%s7714_s3 + $0x200] ss:$8 sps:$4 sm:$0xff]   ;;  %v5551_v10 = vld [vmem:[%s7714_s3 + $0x234] ss:$8 sps:$4 sm:$0xff]  }
 0x3ed   :  { %v1952_v55 = vadd.f32 %v1951_v21, %v6687_v16  ;;  %v2033_v48 = vmax.f32 %v1948_v9, 0.0  ;;  %v5554_v9 = vld [vmem:[%s7714_s3 + $0x244] ss:$8 sps:$4 sm:$0xff]   ;;  %v5556_v0 = vld [vmem:[%s7714_s3 + $0x240] ss:$8 sps:$4 sm:$0xff]  }
 0x3ee   :  { %v2034_v6 = vmax.f32 %v1950_v24, 0.0  ;;  %v5557_v24 = vld [vmem:[%s7714_s3 + $0x254] ss:$8 sps:$4 sm:$0xff]   ;;  %v5559_v21 = vld [vmem:[%s7714_s3 + $0x250] ss:$8 sps:$4 sm:$0xff]  }
 0x3ef   :  { %v2035_v49 = vmax.f32 %v1952_v55, 0.0  ;;  %v5560_v55 = vld [vmem:[%s7714_s3 + $0x264] ss:$8 sps:$4 sm:$0xff]  }
 0x3f0   :  { %v2072_v4 = vpack.c.bf16 %v2034_v6, %v2032_v53  ;;  %v5562_v53 = vld [vmem:[%s7714_s3 + $0x260] ss:$8 sps:$4 sm:$0xff]   ;;  %v5563_v6 = vld [vmem:[%s7714_s3 + $0x274] ss:$8 sps:$4 sm:$0xff]  }
 0x3f1   :  { %v2073_v51 = vpack.c.bf16 %v2035_v49, %v2033_v48  ;;  %v1955_v3 = vpop.f32.mrb[84].mxu0  ;;  %v5565_v48 = vld [vmem:[%s7714_s3 + $0x270] ss:$8 sps:$4 sm:$0xff]   ;;  %v5566_v49 = vld [vmem:[%s7714_s3 + $0x284] ss:$8 sps:$4 sm:$0xff]  }
 0x3f2   :  { %v1956_v57 = vadd.f32 %v1955_v3, %v6697_v8  ;;  %v1957_v18 = vpop.f32.mrb[85].mxu0  ;;  %v5571_v3 = vld [vmem:[%s7714_s3 + $0x290] ss:$8 sps:$4 sm:$0xff]  }
 0x3f3   :  { %v1958_v59 = vadd.f32 %v1957_v18, %v6697_v8  ;;  %v1959_v40 = vpop.f32.mrb[86].mxu0  ;;  %2490 = vmatprep.subr.bf16.mxu1 %v2073_v51  ;;  %v5569_v51 = vld [vmem:[%s7714_s3 + $0x294] ss:$8 sps:$4 sm:$0xff]   ;;  %v5574_v18 = vld [vmem:[%s7714_s3 + $0x2a0] ss:$8 sps:$4 sm:$0xff]  }
 0x3f4   :  { %v1960_v34 = vadd.f32 %v1959_v40, %v6703_v27  ;;  %v1961_v35 = vpop.f32.mrb[87].mxu0  ;;  %2491 = vmatpush1.bf16.msra.mxu1 %v2072_v4  ;;  %v2036_v13 = vmax.f32 %v1956_v57, 0.0  ;;  %v5568_v4 = vld [vmem:[%s7714_s3 + $0x280] ss:$8 sps:$4 sm:$0xff]   ;;  %v5572_v57 = vld [vmem:[%s7714_s3 + $0x2a4] ss:$8 sps:$4 sm:$0xff]  }
 0x3f5   :  { %v1962_v16 = vadd.f32 %v1961_v35, %v6703_v27  ;;  %v2037_v46 = vmax.f32 %v1958_v59, 0.0  ;;  %v5575_v59 = vld [vmem:[%s7714_s3 + $0x2b4] ss:$8 sps:$4 sm:$0xff]   ;;  %v5577_v40 = vld [vmem:[%s7714_s3 + $0x2b0] ss:$8 sps:$4 sm:$0xff]  }
 0x3f6   :  { %v2038_v19 = vmax.f32 %v1960_v34, 0.0  ;;  %v5578_v34 = vld [vmem:[%s7714_s3 + $0x2c4] ss:$8 sps:$4 sm:$0xff]   ;;  %v5580_v35 = vld [vmem:[%s7714_s3 + $0x2c0] ss:$8 sps:$4 sm:$0xff]  }
 0x3f7   :  { %v2039_v60 = vmax.f32 %v1962_v16, 0.0  ;;  %v5581_v16 = vld [vmem:[%s7714_s3 + $0x2d4] ss:$8 sps:$4 sm:$0xff]  }
 0x3f8   :  { %v2074_v25 = vpack.c.bf16 %v2038_v19, %v2036_v13  ;;  %v5583_v13 = vld [vmem:[%s7714_s3 + $0x2d0] ss:$8 sps:$4 sm:$0xff]   ;;  %v5584_v19 = vld [vmem:[%s7714_s3 + $0x2e4] ss:$8 sps:$4 sm:$0xff]  }
 0x3f9   :  { %v2075_v1 = vpack.c.bf16 %v2039_v60, %v2037_v46  ;;  %v1965_v62 = vpop.f32.mrb[88].mxu0  ;;  %v5586_v46 = vld [vmem:[%s7714_s3 + $0x2e0] ss:$8 sps:$4 sm:$0xff]   ;;  %v5587_v60 = vld [vmem:[%s7714_s3 + $0x2f4] ss:$8 sps:$4 sm:$0xff]  }
 0x3fa   :  { %v1966_v5 = vadd.f32 %v1965_v62, %v6721_v28  ;;  %v1967_v15 = vpop.f32.mrb[89].mxu0 }
 0x3fb   :  { %v1968_v8 = vadd.f32 %v1967_v15, %v6721_v28  ;;  %v1969_v45 = vpop.f32.mrb[90].mxu0  ;;  %2492 = vmatprep.subr.bf16.mxu1 %v2075_v1 }
 0x3fc   :  { %v1970_v41 = vadd.f32 %v1969_v45, %v6723_v63  ;;  %v1971_v52 = vpop.f32.mrb[91].mxu0  ;;  %2493 = vmatpush1.bf16.msra.mxu1 %v2074_v25  ;;  %v2040_v31 = vmax.f32 %v1966_v5, 0.0  ;;  %v5589_v25 = vld [vmem:[%s7714_s3 + $0x2f0] ss:$8 sps:$4 sm:$0xff]  }
 0x3fd   :  { %v1972_v27 = vadd.f32 %v1971_v52, %v6723_v63  ;;  %v2041_v12 = vmax.f32 %v1968_v8, 0.0  ;;  %v5592_v52 = vld [vmem:[%s7714_s3 + $0x304] ss:$8 sps:$4 sm:$0xff]  }
 0x3fe   :  { %v2042_v50 = vmax.f32 %v1970_v41, 0.0  ;;  %3173 = vmatprep.mubr.bf16.mxu0 %v5592_v52 }
 0x3ff   :  { %v2043_v61 = vmax.f32 %v1972_v27, 0.0 }
 0x400   :  { %v2076_v36 = vpack.c.bf16 %v2042_v50, %v2040_v31 }
 0x401   :  { %v2077_v23 = vpack.c.bf16 %v2043_v61, %v2041_v12  ;;  %v1975_v14 = vpop.f32.mrb[92].mxu0 }
 0x402   :  { %v1976_v30 = vadd.f32 %v1975_v14, %v6734_v26  ;;  %v1977_v33 = vpop.f32.mrb[93].mxu0 }
 0x403   :  { %v1978_v28 = vadd.f32 %v1977_v33, %v6734_v26  ;;  %v1979_v32 = vpop.f32.mrb[94].mxu0  ;;  %2494 = vmatprep.subr.bf16.mxu1 %v2077_v23  ;;  %v5545_v26 = vld [vmem:[%s7714_s3 + $0x214] ss:$8 sps:$4 sm:$0xff]  }
 0x404   :  { %v1980_v11 = vadd.f32 %v1979_v32, %v6742_v2  ;;  %v1981_v38 = vpop.f32.mrb[95].mxu0  ;;  %2495 = vmatpush1.bf16.msra.mxu1 %v2076_v36  ;;  %v2044_v56 = vmax.f32 %v1976_v30, 0.0 }
 0x405   :  { %v1982_v63 = vadd.f32 %v1981_v38, %v6742_v2  ;;  %v2045_v44 = vmax.f32 %v1978_v28, 0.0  ;;  %v5547_v2 = vld [vmem:[%s7714_s3 + $0x210] ss:$8 sps:$4 sm:$0xff]  }
 0x406   :  { %v2046_v42 = vmax.f32 %v1980_v11, 0.0 }
 0x407   :  { %v2047_v37 = vmax.f32 %v1982_v63, 0.0 }
 0x408   :  { %v2078_v47 = vpack.c.bf16 %v2046_v42, %v2044_v56 }
 0x409   :  { %v2079_v43 = vpack.c.bf16 %v2047_v37, %v2045_v44 }
 0x40b   :  { %2496 = vmatprep.subr.bf16.mxu1 %v2079_v43  ;;  %v7838_v43 = vld [vmem:[#allocation24_spill] sm:$0xff] }
 0x40c   :  { %2497 = vmatpush1.bf16.msra.mxu1 %v2078_v47 }
 0x40f   :  { %2499 = vmatmul.mubr.bf16.vlgmr.msra.gmra.mrb[96].mxu1 %v5542_v17 }
 0x410   :  { %2508 = vmatprep.mubr.bf16.mxu1 %v5545_v26 }
 0x417   :  { %2509 = vmatmul.mubr.bf16.gmra.mrb[100].mxu1 %v5547_v2 }
 0x418   :  { %2518 = vmatprep.mubr.bf16.mxu1 %v5548_v54  ;;  %v7839_v54 = vld [vmem:[#allocation25_spill] sm:$0xff] }
 0x41f   :  { %2519 = vmatmul.mubr.bf16.gmra.mrb[104].mxu1 %v5550_v29 }
 0x420   :  { %2528 = vmatprep.mubr.bf16.mxu1 %v5551_v10 }
 0x427   :  { %2529 = vmatmul.mubr.bf16.gmra.mrb[108].mxu1 %v5553_v7 }
 0x428   :  { %2538 = vmatprep.mubr.bf16.mxu1 %v5554_v9 }
 0x42f   :  { %2539 = vmatmul.mubr.bf16.gmra.mrb[112].mxu1 %v5556_v0 }
 0x430   :  { %2548 = vmatprep.mubr.bf16.mxu1 %v5557_v24 }
 0x437   :  { %2549 = vmatmul.mubr.bf16.gmra.mrb[116].mxu1 %v5559_v21 }
 0x438   :  { %2558 = vmatprep.mubr.bf16.mxu1 %v5560_v55 }
 0x43f   :  { %2559 = vmatmul.mubr.bf16.gmra.mrb[120].mxu1 %v5562_v53 }
 0x440   :  { %2568 = vmatprep.mubr.bf16.mxu1 %v5563_v6  ;;  %v7840_v6 = vld [vmem:[#allocation26_spill] sm:$0xff] }
 0x447   :  { %2569 = vmatmul.mubr.bf16.gmra.mrb[124].mxu1 %v5565_v48 }
 0x448   :  { %2578 = vmatprep.mubr.bf16.mxu1 %v5566_v49 }
 0x44f   :  { %2579 = vmatmul.mubr.bf16.gmra.mrb[128].mxu1 %v5568_v4 }
 0x450   :  { %2588 = vmatprep.mubr.bf16.mxu1 %v5569_v51 }
 0x457   :  { %2589 = vmatmul.mubr.bf16.gmra.mrb[132].mxu1 %v5571_v3  ;;  %v7841_v3 = vld [vmem:[#allocation27_spill] sm:$0xff] }
 0x458   :  { %2598 = vmatprep.mubr.bf16.mxu1 %v5572_v57 }
 0x45f   :  { %2599 = vmatmul.mubr.bf16.gmra.mrb[136].mxu1 %v5574_v18 }
 0x460   :  { %2608 = vmatprep.mubr.bf16.mxu1 %v5575_v59 }
 0x467   :  { %2609 = vmatmul.mubr.bf16.gmra.mrb[140].mxu1 %v5577_v40 }
 0x468   :  { %2618 = vmatprep.mubr.bf16.mxu1 %v5578_v34 }
 0x46f   :  { %2619 = vmatmul.mubr.bf16.gmra.mrb[144].mxu1 %v5580_v35 }
 0x470   :  { %2628 = vmatprep.mubr.bf16.mxu1 %v5581_v16 }
 0x477   :  { %2629 = vmatmul.mubr.bf16.gmra.mrb[148].mxu1 %v5583_v13 }
 0x478   :  { %2638 = vmatprep.mubr.bf16.mxu1 %v5584_v19 }
 0x47f   :  { %2639 = vmatmul.mubr.bf16.gmra.mrb[152].mxu1 %v5586_v46 }
 0x480   :  { %2648 = vmatprep.mubr.bf16.mxu1 %v5587_v60  ;;  %v7842_v60 = vld [vmem:[#allocation28_spill] sm:$0xff] }
 0x487   :  { %2649 = vmatmul.mubr.bf16.gmra.mrb[156].mxu1 %v5589_v25 }
 0x4e2   :  { %v2500_v1 = vpop.f32.mrb[96].mxu1 }
 0x4e3   :  { %v2501_v62 = vadd.f32 %v2500_v1, %v6753_v22  ;;  %v2502_v5 = vpop.f32.mrb[97].mxu1 }
 0x4e4   :  { %v2503_v15 = vadd.f32 %v2502_v5, %v6753_v22  ;;  %v2504_v8 = vpop.f32.mrb[98].mxu1 }
 0x4e5   :  { %v2505_v45 = vadd.f32 %v2504_v8, %v6755_v58  ;;  %v2506_v41 = vpop.f32.mrb[99].mxu1  ;;  %v2659_v31 = vmax.f32 %v2501_v62, 0.0 }
 0x4e6   :  { %v2507_v27 = vadd.f32 %v2506_v41, %v6755_v58  ;;  %v2660_v12 = vmax.f32 %v2503_v15, 0.0  ;;  %v7843_v15 = vld [vmem:[#allocation29_spill] sm:$0xff] }
 0x4e7   :  { %v2661_v50 = vmax.f32 %v2505_v45, 0.0 }
 0x4e8   :  { %v2662_v61 = vmax.f32 %v2507_v27, 0.0 }
 0x4e9   :  { %v2723_v36 = vpack.c.bf16 %v2661_v50, %v2659_v31 }
 0x4ea   :  { %v2724_v23 = vpack.c.bf16 %v2662_v61, %v2660_v12  ;;  %v2510_v14 = vpop.f32.mrb[100].mxu1 }
 0x4eb   :  { %v2511_v22 = vadd.f32 %v2510_v14, %v6769_v39  ;;  %v2512_v30 = vpop.f32.mrb[101].mxu1 }
 0x4ec   :  { %v2513_v33 = vadd.f32 %v2512_v30, %v6769_v39  ;;  %v2514_v28 = vpop.f32.mrb[102].mxu1  ;;  %3141 = vmatprep.subr.bf16.mxu0 %v2724_v23  ;;  %v7844_v23 = vld [vmem:[#allocation30_spill] sm:$0xff] }
 0x4ed   :  { %v2515_v32 = vadd.f32 %v2514_v28, %v6774_v20  ;;  %v2516_v11 = vpop.f32.mrb[103].mxu1  ;;  %3142 = vmatpush1.bf16.msra.mxu0 %v2723_v36  ;;  %v2663_v38 = vmax.f32 %v2511_v22, 0.0  ;;  %v7845_v28 = vld [vmem:[#allocation31_spill] sm:$0xff] }
 0x4ee   :  { %v2517_v58 = vadd.f32 %v2516_v11, %v6774_v20  ;;  %v2664_v56 = vmax.f32 %v2513_v33, 0.0 }
 0x4ef   :  { %v2665_v63 = vmax.f32 %v2515_v32, 0.0 }
 0x4f0   :  { %v2666_v42 = vmax.f32 %v2517_v58, 0.0 }
 0x4f1   :  { %v2725_v44 = vpack.c.bf16 %v2665_v63, %v2663_v38 }
 0x4f2   :  { %v2726_v37 = vpack.c.bf16 %v2666_v42, %v2664_v56  ;;  %v2520_v47 = vpop.f32.mrb[104].mxu1 }
 0x4f3   :  { %v2521_v17 = vadd.f32 %v2520_v47, %v7838_v43  ;;  %v2522_v26 = vpop.f32.mrb[105].mxu1 }
 0x4f4   :  { %v2523_v39 = vadd.f32 %v2522_v26, %v7838_v43  ;;  %v2524_v2 = vpop.f32.mrb[106].mxu1  ;;  %3143 = vmatprep.subr.bf16.mxu0 %v2726_v37  ;;  %v7846_v43 = vld [vmem:[#allocation32_spill] sm:$0xff] }
 0x4f5   :  { %v2525_v29 = vadd.f32 %v2524_v2, %v7839_v54  ;;  %v2526_v10 = vpop.f32.mrb[107].mxu1  ;;  %3144 = vmatpush1.bf16.msra.mxu0 %v2725_v44  ;;  %v2667_v7 = vmax.f32 %v2521_v17, 0.0 }
 0x4f6   :  { %v2527_v20 = vadd.f32 %v2526_v10, %v7839_v54  ;;  %v2668_v0 = vmax.f32 %v2523_v39, 0.0  ;;  %v7847_v54 = vld [vmem:[#allocation33_spill] sm:$0xff] }
 0x4f7   :  { %v2669_v9 = vmax.f32 %v2525_v29, 0.0 }
 0x4f8   :  { %v2670_v24 = vmax.f32 %v2527_v20, 0.0 }
 0x4f9   :  { %v2727_v21 = vpack.c.bf16 %v2669_v9, %v2667_v7 }
 0x4fa   :  { %v2728_v55 = vpack.c.bf16 %v2670_v24, %v2668_v0  ;;  %v2530_v53 = vpop.f32.mrb[108].mxu1 }
 0x4fb   :  { %v2531_v48 = vadd.f32 %v2530_v53, %v7840_v6  ;;  %v2532_v49 = vpop.f32.mrb[109].mxu1 }
 0x4fc   :  { %v2533_v4 = vadd.f32 %v2532_v49, %v7840_v6  ;;  %v2534_v51 = vpop.f32.mrb[110].mxu1  ;;  %3145 = vmatprep.subr.bf16.mxu0 %v2728_v55  ;;  %v7848_v6 = vld [vmem:[#allocation34_spill] sm:$0xff] }
 0x4fd   :  { %v2535_v57 = vadd.f32 %v2534_v51, %v7841_v3  ;;  %v2536_v18 = vpop.f32.mrb[111].mxu1  ;;  %3146 = vmatpush1.bf16.msra.mxu0 %v2727_v21  ;;  %v2671_v40 = vmax.f32 %v2531_v48, 0.0 }
 0x4fe   :  { %v2537_v59 = vadd.f32 %v2536_v18, %v7841_v3  ;;  %v2672_v35 = vmax.f32 %v2533_v4, 0.0  ;;  %v7849_v3 = vld [vmem:[#allocation35_spill] sm:$0xff] }
 0x4ff   :  { %v2673_v34 = vmax.f32 %v2535_v57, 0.0 }
 0x500   :  { %v2674_v16 = vmax.f32 %v2537_v59, 0.0 }
 0x501   :  { %v2729_v13 = vpack.c.bf16 %v2673_v34, %v2671_v40 }
 0x502   :  { %v2730_v19 = vpack.c.bf16 %v2674_v16, %v2672_v35  ;;  %v2540_v46 = vpop.f32.mrb[112].mxu1 }
 0x503   :  { %v2541_v25 = vadd.f32 %v2540_v46, %v7842_v60  ;;  %v2542_v1 = vpop.f32.mrb[113].mxu1 }
 0x504   :  { %v2543_v62 = vadd.f32 %v2542_v1, %v7842_v60  ;;  %v2544_v5 = vpop.f32.mrb[114].mxu1  ;;  %3147 = vmatprep.subr.bf16.mxu0 %v2730_v19  ;;  %v7850_v60 = vld [vmem:[#allocation36_spill] sm:$0xff] }
 0x505   :  { %v2545_v8 = vadd.f32 %v2544_v5, %v7843_v15  ;;  %v2546_v45 = vpop.f32.mrb[115].mxu1  ;;  %3148 = vmatpush1.bf16.msra.mxu0 %v2729_v13  ;;  %v2675_v52 = vmax.f32 %v2541_v25, 0.0 }
 0x506   :  { %v2547_v41 = vadd.f32 %v2546_v45, %v7843_v15  ;;  %v2676_v31 = vmax.f32 %v2543_v62, 0.0  ;;  %v7851_v15 = vld [vmem:[#allocation37_spill] sm:$0xff] }
 0x507   :  { %v2677_v27 = vmax.f32 %v2545_v8, 0.0 }
 0x508   :  { %v2678_v50 = vmax.f32 %v2547_v41, 0.0 }
 0x509   :  { %v2731_v12 = vpack.c.bf16 %v2677_v27, %v2675_v52 }
 0x50a   :  { %v2732_v61 = vpack.c.bf16 %v2678_v50, %v2676_v31  ;;  %v2550_v36 = vpop.f32.mrb[116].mxu1 }
 0x50b   :  { %v2551_v14 = vadd.f32 %v2550_v36, %v7844_v23  ;;  %v2552_v22 = vpop.f32.mrb[117].mxu1 }
 0x50c   :  { %v2553_v30 = vadd.f32 %v2552_v22, %v7844_v23  ;;  %v2554_v33 = vpop.f32.mrb[118].mxu1  ;;  %3149 = vmatprep.subr.bf16.mxu0 %v2732_v61  ;;  %v7852_v23 = vld [vmem:[#allocation38_spill] sm:$0xff] }
 0x50d   :  { %v2555_v32 = vadd.f32 %v2554_v33, %v7845_v28  ;;  %v2556_v11 = vpop.f32.mrb[119].mxu1  ;;  %3150 = vmatpush1.bf16.msra.mxu0 %v2731_v12  ;;  %v2679_v38 = vmax.f32 %v2551_v14, 0.0 }
 0x50e   :  { %v2557_v58 = vadd.f32 %v2556_v11, %v7845_v28  ;;  %v2680_v56 = vmax.f32 %v2553_v30, 0.0  ;;  %v7853_v28 = vld [vmem:[#allocation39_spill] sm:$0xff] }
 0x50f   :  { %v2681_v63 = vmax.f32 %v2555_v32, 0.0 }
 0x510   :  { %v2682_v42 = vmax.f32 %v2557_v58, 0.0 }
 0x511   :  { %v2733_v44 = vpack.c.bf16 %v2681_v63, %v2679_v38 }
 0x512   :  { %v2734_v37 = vpack.c.bf16 %v2682_v42, %v2680_v56  ;;  %v2560_v47 = vpop.f32.mrb[120].mxu1 }
 0x513   :  { %v2561_v17 = vadd.f32 %v2560_v47, %v7846_v43  ;;  %v2562_v26 = vpop.f32.mrb[121].mxu1 }
 0x514   :  { %v2563_v39 = vadd.f32 %v2562_v26, %v7846_v43  ;;  %v2564_v2 = vpop.f32.mrb[122].mxu1  ;;  %3151 = vmatprep.subr.bf16.mxu0 %v2734_v37  ;;  %v7854_v43 = vld [vmem:[#allocation40_spill] sm:$0xff] }
 0x515   :  { %v2565_v29 = vadd.f32 %v2564_v2, %v7847_v54  ;;  %v2566_v10 = vpop.f32.mrb[123].mxu1  ;;  %3152 = vmatpush1.bf16.msra.mxu0 %v2733_v44  ;;  %v2683_v7 = vmax.f32 %v2561_v17, 0.0 }
 0x516   :  { %v2567_v20 = vadd.f32 %v2566_v10, %v7847_v54  ;;  %v2684_v0 = vmax.f32 %v2563_v39, 0.0  ;;  %v7855_v54 = vld [vmem:[#allocation41_spill] sm:$0xff] }
 0x517   :  { %v2685_v9 = vmax.f32 %v2565_v29, 0.0 }
 0x518   :  { %v2686_v24 = vmax.f32 %v2567_v20, 0.0 }
 0x519   :  { %v2735_v21 = vpack.c.bf16 %v2685_v9, %v2683_v7 }
 0x51a   :  { %v2736_v55 = vpack.c.bf16 %v2686_v24, %v2684_v0  ;;  %v2570_v53 = vpop.f32.mrb[124].mxu1 }
 0x51b   :  { %v2571_v48 = vadd.f32 %v2570_v53, %v7848_v6  ;;  %v2572_v49 = vpop.f32.mrb[125].mxu1 }
 0x51c   :  { %v2573_v4 = vadd.f32 %v2572_v49, %v7848_v6  ;;  %v2574_v51 = vpop.f32.mrb[126].mxu1  ;;  %3153 = vmatprep.subr.bf16.mxu0 %v2736_v55  ;;  %v7856_v6 = vld [vmem:[#allocation42_spill] sm:$0xff] }
 0x51d   :  { %v2575_v57 = vadd.f32 %v2574_v51, %v7849_v3  ;;  %v2576_v18 = vpop.f32.mrb[127].mxu1  ;;  %3154 = vmatpush1.bf16.msra.mxu0 %v2735_v21  ;;  %v2687_v40 = vmax.f32 %v2571_v48, 0.0 }
 0x51e   :  { %v2577_v59 = vadd.f32 %v2576_v18, %v7849_v3  ;;  %v2688_v35 = vmax.f32 %v2573_v4, 0.0  ;;  %v7857_v3 = vld [vmem:[#allocation43_spill] sm:$0xff] }
 0x51f   :  { %v2689_v34 = vmax.f32 %v2575_v57, 0.0 }
 0x520   :  { %v2690_v16 = vmax.f32 %v2577_v59, 0.0 }
 0x521   :  { %v2737_v13 = vpack.c.bf16 %v2689_v34, %v2687_v40 }
 0x522   :  { %v2738_v19 = vpack.c.bf16 %v2690_v16, %v2688_v35  ;;  %v2580_v46 = vpop.f32.mrb[128].mxu1 }
 0x523   :  { %v2581_v25 = vadd.f32 %v2580_v46, %v7850_v60  ;;  %v2582_v1 = vpop.f32.mrb[129].mxu1 }
 0x524   :  { %v2583_v62 = vadd.f32 %v2582_v1, %v7850_v60  ;;  %v2584_v5 = vpop.f32.mrb[130].mxu1  ;;  %3155 = vmatprep.subr.bf16.mxu0 %v2738_v19  ;;  %v7858_v60 = vld [vmem:[#allocation44_spill] sm:$0xff] }
 0x525   :  { %v2585_v8 = vadd.f32 %v2584_v5, %v7851_v15  ;;  %v2586_v45 = vpop.f32.mrb[131].mxu1  ;;  %3156 = vmatpush1.bf16.msra.mxu0 %v2737_v13  ;;  %v2691_v52 = vmax.f32 %v2581_v25, 0.0 }
 0x526   :  { %v2587_v41 = vadd.f32 %v2586_v45, %v7851_v15  ;;  %v2692_v31 = vmax.f32 %v2583_v62, 0.0  ;;  %v7859_v15 = vld [vmem:[#allocation45_spill] sm:$0xff] }
 0x527   :  { %v2693_v27 = vmax.f32 %v2585_v8, 0.0 }
 0x528   :  { %v2694_v50 = vmax.f32 %v2587_v41, 0.0 }
 0x529   :  { %v2739_v12 = vpack.c.bf16 %v2693_v27, %v2691_v52 }
 0x52a   :  { %v2740_v61 = vpack.c.bf16 %v2694_v50, %v2692_v31  ;;  %v2590_v36 = vpop.f32.mrb[132].mxu1 }
 0x52b   :  { %v2591_v14 = vadd.f32 %v2590_v36, %v7852_v23  ;;  %v2592_v22 = vpop.f32.mrb[133].mxu1 }
 0x52c   :  { %v2593_v30 = vadd.f32 %v2592_v22, %v7852_v23  ;;  %v2594_v33 = vpop.f32.mrb[134].mxu1  ;;  %3157 = vmatprep.subr.bf16.mxu0 %v2740_v61  ;;  %v7860_v23 = vld [vmem:[#allocation46_spill] sm:$0xff] }
 0x52d   :  { %v2595_v32 = vadd.f32 %v2594_v33, %v7853_v28  ;;  %v2596_v11 = vpop.f32.mrb[135].mxu1  ;;  %3158 = vmatpush1.bf16.msra.mxu0 %v2739_v12  ;;  %v2695_v38 = vmax.f32 %v2591_v14, 0.0 }
 0x52e   :  { %v2597_v58 = vadd.f32 %v2596_v11, %v7853_v28  ;;  %v2696_v56 = vmax.f32 %v2593_v30, 0.0  ;;  %v7861_v28 = vld [vmem:[#allocation47_spill] sm:$0xff] }
 0x52f   :  { %v2697_v63 = vmax.f32 %v2595_v32, 0.0 }
 0x530   :  { %v2698_v42 = vmax.f32 %v2597_v58, 0.0 }
 0x531   :  { %v2741_v44 = vpack.c.bf16 %v2697_v63, %v2695_v38 }
 0x532   :  { %v2742_v37 = vpack.c.bf16 %v2698_v42, %v2696_v56  ;;  %v2600_v47 = vpop.f32.mrb[136].mxu1 }
 0x533   :  { %v2601_v17 = vadd.f32 %v2600_v47, %v7854_v43  ;;  %v2602_v26 = vpop.f32.mrb[137].mxu1 }
 0x534   :  { %v2603_v39 = vadd.f32 %v2602_v26, %v7854_v43  ;;  %v2604_v2 = vpop.f32.mrb[138].mxu1  ;;  %3159 = vmatprep.subr.bf16.mxu0 %v2742_v37  ;;  %v7862_v43 = vld [vmem:[#allocation48_spill] sm:$0xff] }
 0x535   :  { %v2605_v29 = vadd.f32 %v2604_v2, %v7855_v54  ;;  %v2606_v10 = vpop.f32.mrb[139].mxu1  ;;  %3160 = vmatpush1.bf16.msra.mxu0 %v2741_v44  ;;  %v2699_v7 = vmax.f32 %v2601_v17, 0.0 }
 0x536   :  { %v2607_v20 = vadd.f32 %v2606_v10, %v7855_v54  ;;  %v2700_v0 = vmax.f32 %v2603_v39, 0.0  ;;  %v7863_v54 = vld [vmem:[#allocation49_spill] sm:$0xff] }
 0x537   :  { %v2701_v9 = vmax.f32 %v2605_v29, 0.0 }
 0x538   :  { %v2702_v24 = vmax.f32 %v2607_v20, 0.0 }
 0x539   :  { %v2743_v21 = vpack.c.bf16 %v2701_v9, %v2699_v7 }
 0x53a   :  { %v2744_v55 = vpack.c.bf16 %v2702_v24, %v2700_v0  ;;  %v2610_v53 = vpop.f32.mrb[140].mxu1 }
 0x53b   :  { %v2611_v48 = vadd.f32 %v2610_v53, %v7856_v6  ;;  %v2612_v49 = vpop.f32.mrb[141].mxu1 }
 0x53c   :  { %v2613_v4 = vadd.f32 %v2612_v49, %v7856_v6  ;;  %v2614_v51 = vpop.f32.mrb[142].mxu1  ;;  %3161 = vmatprep.subr.bf16.mxu0 %v2744_v55  ;;  %v7864_v6 = vld [vmem:[#allocation50_spill] sm:$0xff] }
 0x53d   :  { %v2615_v57 = vadd.f32 %v2614_v51, %v7857_v3  ;;  %v2616_v18 = vpop.f32.mrb[143].mxu1  ;;  %3162 = vmatpush1.bf16.msra.mxu0 %v2743_v21  ;;  %v2703_v40 = vmax.f32 %v2611_v48, 0.0 }
 0x53e   :  { %v2617_v59 = vadd.f32 %v2616_v18, %v7857_v3  ;;  %v2704_v35 = vmax.f32 %v2613_v4, 0.0  ;;  %v2304_v4 = vpop.permute.xlu1 %2303 }
 0x53f   :  { %v2705_v34 = vmax.f32 %v2615_v57, 0.0 }
 0x540   :  { %v2706_v16 = vmax.f32 %v2617_v59, 0.0 }
 0x541   :  { %v2745_v13 = vpack.c.bf16 %v2705_v34, %v2703_v40 }
 0x542   :  { %v2746_v19 = vpack.c.bf16 %v2706_v16, %v2704_v35  ;;  %v2620_v46 = vpop.f32.mrb[144].mxu1 }
 0x543   :  { %v2621_v25 = vadd.f32 %v2620_v46, %v7858_v60  ;;  %v2622_v1 = vpop.f32.mrb[145].mxu1  ;;  %v5590_v46 = vld [vmem:[%s7714_s3 + $0x300] ss:$8 sps:$4 sm:$0xff]  }
 0x544   :  { %v2623_v62 = vadd.f32 %v2622_v1, %v7858_v60  ;;  %v2624_v5 = vpop.f32.mrb[146].mxu1  ;;  %3163 = vmatprep.subr.bf16.mxu0 %v2746_v19  ;;  %v5593_v60 = vld [vmem:[%s7714_s3 + $0x314] ss:$8 sps:$4 sm:$0xff]   ;;  %v5596_v1 = vld [vmem:[%s7714_s3 + $0x324] ss:$8 sps:$4 sm:$0xff]  }
 0x545   :  { %v2625_v8 = vadd.f32 %v2624_v5, %v7859_v15  ;;  %v2626_v45 = vpop.f32.mrb[147].mxu1  ;;  %3164 = vmatpush1.bf16.msra.mxu0 %v2745_v13  ;;  %v2707_v52 = vmax.f32 %v2621_v25, 0.0  ;;  %v5595_v25 = vld [vmem:[%s7714_s3 + $0x310] ss:$8 sps:$4 sm:$0xff]   ;;  %v5599_v5 = vld [vmem:[%s7714_s3 + $0x334] ss:$8 sps:$4 sm:$0xff]  }
 0x546   :  { %v2627_v41 = vadd.f32 %v2626_v45, %v7859_v15  ;;  %v2708_v31 = vmax.f32 %v2623_v62, 0.0  ;;  %v5598_v62 = vld [vmem:[%s7714_s3 + $0x320] ss:$8 sps:$4 sm:$0xff]   ;;  %v5601_v15 = vld [vmem:[%s7714_s3 + $0x330] ss:$8 sps:$4 sm:$0xff]  }
 0x547   :  { %v2709_v27 = vmax.f32 %v2625_v8, 0.0  ;;  %v5602_v8 = vld [vmem:[%s7714_s3 + $0x344] ss:$8 sps:$4 sm:$0xff]   ;;  %v5604_v45 = vld [vmem:[%s7714_s3 + $0x340] ss:$8 sps:$4 sm:$0xff]  }
 0x548   :  { %v2710_v50 = vmax.f32 %v2627_v41, 0.0  ;;  %v5605_v41 = vld [vmem:[%s7714_s3 + $0x354] ss:$8 sps:$4 sm:$0xff]  }
 0x549   :  { %v2747_v12 = vpack.c.bf16 %v2709_v27, %v2707_v52  ;;  %v5607_v52 = vld [vmem:[%s7714_s3 + $0x350] ss:$8 sps:$4 sm:$0xff]   ;;  %v5608_v27 = vld [vmem:[%s7714_s3 + $0x364] ss:$8 sps:$4 sm:$0xff]  }
 0x54a   :  { %v2748_v61 = vpack.c.bf16 %v2710_v50, %v2708_v31  ;;  %v2630_v36 = vpop.f32.mrb[148].mxu1  ;;  %v5610_v31 = vld [vmem:[%s7714_s3 + $0x360] ss:$8 sps:$4 sm:$0xff]   ;;  %v5611_v50 = vld [vmem:[%s7714_s3 + $0x374] ss:$8 sps:$4 sm:$0xff]  }
 0x54b   :  { %v2631_v14 = vadd.f32 %v2630_v36, %v7860_v23  ;;  %v2632_v22 = vpop.f32.mrb[149].mxu1  ;;  %v5616_v36 = vld [vmem:[%s7714_s3 + $0x380] ss:$8 sps:$4 sm:$0xff]  }
 0x54c   :  { %v2633_v30 = vadd.f32 %v2632_v22, %v7860_v23  ;;  %v2634_v33 = vpop.f32.mrb[150].mxu1  ;;  %3165 = vmatprep.subr.bf16.mxu0 %v2748_v61  ;;  %v5614_v61 = vld [vmem:[%s7714_s3 + $0x384] ss:$8 sps:$4 sm:$0xff]   ;;  %v5617_v23 = vld [vmem:[%s7714_s3 + $0x394] ss:$8 sps:$4 sm:$0xff]  }
 0x54d   :  { %v2635_v32 = vadd.f32 %v2634_v33, %v7861_v28  ;;  %v2636_v11 = vpop.f32.mrb[151].mxu1  ;;  %3166 = vmatpush1.bf16.msra.mxu0 %v2747_v12  ;;  %v2711_v38 = vmax.f32 %v2631_v14, 0.0  ;;  %v5613_v12 = vld [vmem:[%s7714_s3 + $0x370] ss:$8 sps:$4 sm:$0xff]   ;;  %v5620_v22 = vld [vmem:[%s7714_s3 + $0x3a4] ss:$8 sps:$4 sm:$0xff]  }
 0x54e   :  { %v2637_v58 = vadd.f32 %v2636_v11, %v7861_v28  ;;  %v2712_v56 = vmax.f32 %v2633_v30, 0.0  ;;  %v5619_v14 = vld [vmem:[%s7714_s3 + $0x390] ss:$8 sps:$4 sm:$0xff]   ;;  %v5622_v30 = vld [vmem:[%s7714_s3 + $0x3a0] ss:$8 sps:$4 sm:$0xff]  }
 0x54f   :  { %v2713_v63 = vmax.f32 %v2635_v32, 0.0  ;;  %v5623_v33 = vld [vmem:[%s7714_s3 + $0x3b4] ss:$8 sps:$4 sm:$0xff]   ;;  %v5625_v28 = vld [vmem:[%s7714_s3 + $0x3b0] ss:$8 sps:$4 sm:$0xff]  }
 0x550   :  { %v2714_v42 = vmax.f32 %v2637_v58, 0.0  ;;  %v5626_v32 = vld [vmem:[%s7714_s3 + $0x3c4] ss:$8 sps:$4 sm:$0xff]   ;;  %v5628_v11 = vld [vmem:[%s7714_s3 + $0x3c0] ss:$8 sps:$4 sm:$0xff]  }
 0x551   :  { %v2749_v44 = vpack.c.bf16 %v2713_v63, %v2711_v38  ;;  %v5629_v58 = vld [vmem:[%s7714_s3 + $0x3d4] ss:$8 sps:$4 sm:$0xff]   ;;  %v5631_v38 = vld [vmem:[%s7714_s3 + $0x3d0] ss:$8 sps:$4 sm:$0xff]   ;;  %v5632_v63 = vld [vmem:[%s7714_s3 + $0x3e4] ss:$8 sps:$4 sm:$0xff]  }
 0x552   :  { %v2750_v37 = vpack.c.bf16 %v2714_v42, %v2712_v56  ;;  %v2640_v47 = vpop.f32.mrb[152].mxu1  ;;  %v5634_v56 = vld [vmem:[%s7714_s3 + $0x3e0] ss:$8 sps:$4 sm:$0xff]   ;;  %v5635_v42 = vld [vmem:[%s7714_s3 + $0x3f4] ss:$8 sps:$4 sm:$0xff]  }
 0x553   :  { %v2641_v17 = vadd.f32 %v2640_v47, %v7862_v43  ;;  %v2642_v26 = vpop.f32.mrb[153].mxu1 }
 0x554   :  { %v2643_v39 = vadd.f32 %v2642_v26, %v7862_v43  ;;  %v2644_v2 = vpop.f32.mrb[154].mxu1  ;;  %3167 = vmatprep.subr.bf16.mxu0 %v2750_v37  ;;  %v2824_v37 = vpop.permute.xlu0 %2823 }
 0x555   :  { %v2645_v29 = vadd.f32 %v2644_v2, %v7863_v54  ;;  %v2646_v10 = vpop.f32.mrb[155].mxu1  ;;  %3168 = vmatpush1.bf16.msra.mxu0 %v2749_v44  ;;  %v2715_v7 = vmax.f32 %v2641_v17, 0.0  ;;  %v5637_v44 = vld [vmem:[%s7714_s3 + $0x3f0] ss:$8 sps:$4 sm:$0xff]   ;;  %v2829_v26 = vpop.permute.xlu1 %2828 }
 0x556   :  { %v2647_v20 = vadd.f32 %v2646_v10, %v7863_v54  ;;  %v2716_v0 = vmax.f32 %v2643_v39, 0.0  ;;  %v5640_v10 = vld [vmem:[%s7714_s3 + $0x404] ss:$8 sps:$4 sm:$0xff]  }
 0x557   :  { %v2717_v9 = vmax.f32 %v2645_v29, 0.0  ;;  %3848 = vmatprep.mubr.bf16.mxu1 %v5640_v10 }
 0x558   :  { %v2718_v24 = vmax.f32 %v2647_v20, 0.0 }
 0x559   :  { %v2751_v21 = vpack.c.bf16 %v2717_v9, %v2715_v7 }
 0x55a   :  { %v2752_v55 = vpack.c.bf16 %v2718_v24, %v2716_v0  ;;  %v2650_v53 = vpop.f32.mrb[156].mxu1 }
 0x55b   :  { %v2651_v48 = vadd.f32 %v2650_v53, %v7864_v6  ;;  %v2652_v49 = vpop.f32.mrb[157].mxu1 }
 0x55c   :  { %v2653_v51 = vadd.f32 %v2652_v49, %v7864_v6  ;;  %v2654_v3 = vpop.f32.mrb[158].mxu1  ;;  %3169 = vmatprep.subr.bf16.mxu0 %v2752_v55  ;;  %v2834_v55 = vpop.permute.xlu0 %2833 }
 0x55d   :  { %v2655_v57 = vadd.f32 %v2654_v3, %v2304_v4  ;;  %v2656_v18 = vpop.f32.mrb[159].mxu1  ;;  %3170 = vmatpush1.bf16.msra.mxu0 %v2751_v21  ;;  %v2719_v40 = vmax.f32 %v2651_v48, 0.0 }
 0x55e   :  { %v2657_v59 = vadd.f32 %v2656_v18, %v2304_v4  ;;  %v2720_v35 = vmax.f32 %v2653_v51, 0.0  ;;  %v2839_v4 = vpop.permute.xlu1 %2838 }
 0x55f   :  { %v2721_v34 = vmax.f32 %v2655_v57, 0.0 }
 0x560   :  { %v2722_v16 = vmax.f32 %v2657_v59, 0.0 }
 0x561   :  { %v2753_v13 = vpack.c.bf16 %v2721_v34, %v2719_v40 }
 0x562   :  { %v2754_v19 = vpack.c.bf16 %v2722_v16, %v2720_v35 }
 0x564   :  { %3171 = vmatprep.subr.bf16.mxu0 %v2754_v19  ;;  %v2844_v19 = vpop.permute.xlu0 %2843 }
 0x565   :  { %3172 = vmatpush1.bf16.msra.mxu0 %v2753_v13 }
 0x568   :  { %3174 = vmatmul.mubr.bf16.vlgmr.msra.gmra.mrb[96].mxu0 %v5590_v46 }
 0x569   :  { %3183 = vmatprep.mubr.bf16.mxu0 %v5593_v60 }
 0x570   :  { %3184 = vmatmul.mubr.bf16.gmra.mrb[100].mxu0 %v5595_v25 }
 0x571   :  { %3193 = vmatprep.mubr.bf16.mxu0 %v5596_v1 }
 0x578   :  { %3194 = vmatmul.mubr.bf16.gmra.mrb[104].mxu0 %v5598_v62  ;;  %v2849_v62 = vpop.permute.xlu1 %2848 }
 0x579   :  { %3203 = vmatprep.mubr.bf16.mxu0 %v5599_v5 }
 0x580   :  { %3204 = vmatmul.mubr.bf16.gmra.mrb[108].mxu0 %v5601_v15 }
 0x581   :  { %3213 = vmatprep.mubr.bf16.mxu0 %v5602_v8 }
 0x588   :  { %3214 = vmatmul.mubr.bf16.gmra.mrb[112].mxu0 %v5604_v45 }
 0x589   :  { %3223 = vmatprep.mubr.bf16.mxu0 %v5605_v41 }
 0x590   :  { %3224 = vmatmul.mubr.bf16.gmra.mrb[116].mxu0 %v5607_v52 }
 0x591   :  { %3233 = vmatprep.mubr.bf16.mxu0 %v5608_v27 }
 0x598   :  { %3234 = vmatmul.mubr.bf16.gmra.mrb[120].mxu0 %v5610_v31 }
 0x599   :  { %3243 = vmatprep.mubr.bf16.mxu0 %v5611_v50 }
 0x5a0   :  { %3244 = vmatmul.mubr.bf16.gmra.mrb[124].mxu0 %v5613_v12 }
 0x5a1   :  { %3253 = vmatprep.mubr.bf16.mxu0 %v5614_v61  ;;  %v2854_v61 = vpop.permute.xlu0 %2853 }
 0x5a8   :  { %3254 = vmatmul.mubr.bf16.gmra.mrb[128].mxu0 %v5616_v36 }
 0x5a9   :  { %3263 = vmatprep.mubr.bf16.mxu0 %v5617_v23 }
 0x5b0   :  { %3264 = vmatmul.mubr.bf16.gmra.mrb[132].mxu0 %v5619_v14 }
 0x5b1   :  { %3273 = vmatprep.mubr.bf16.mxu0 %v5620_v22 }
 0x5b8   :  { %3274 = vmatmul.mubr.bf16.gmra.mrb[136].mxu0 %v5622_v30  ;;  %v2859_v30 = vpop.permute.xlu1 %2858 }
 0x5b9   :  { %3283 = vmatprep.mubr.bf16.mxu0 %v5623_v33 }
 0x5c0   :  { %3284 = vmatmul.mubr.bf16.gmra.mrb[140].mxu0 %v5625_v28 }
 0x5c1   :  { %3293 = vmatprep.mubr.bf16.mxu0 %v5626_v32 }
 0x5c8   :  { %3294 = vmatmul.mubr.bf16.gmra.mrb[144].mxu0 %v5628_v11 }
 0x5c9   :  { %3303 = vmatprep.mubr.bf16.mxu0 %v5629_v58 }
 0x5d0   :  { %3304 = vmatmul.mubr.bf16.gmra.mrb[148].mxu0 %v5631_v38 }
 0x5d1   :  { %3313 = vmatprep.mubr.bf16.mxu0 %v5632_v63 }
 0x5d8   :  { %3314 = vmatmul.mubr.bf16.gmra.mrb[152].mxu0 %v5634_v56 }
 0x5d9   :  { %3323 = vmatprep.mubr.bf16.mxu0 %v5635_v42 }
 0x5e0   :  { %3324 = vmatmul.mubr.bf16.gmra.mrb[156].mxu0 %v5637_v44 }
 0x63b   :  { %v3175_v47 = vpop.f32.mrb[96].mxu0 }
 0x63c   :  { %v3176_v43 = vadd.f32 %v3175_v47, %v2824_v37  ;;  %v3177_v17 = vpop.f32.mrb[97].mxu0 }
 0x63d   :  { %v3178_v39 = vadd.f32 %v3177_v17, %v2824_v37  ;;  %v3179_v2 = vpop.f32.mrb[98].mxu0  ;;  %v2864_v37 = vpop.permute.xlu0 %2863 }
 0x63e   :  { %v3180_v54 = vadd.f32 %v3179_v2, %v2829_v26  ;;  %v3181_v29 = vpop.f32.mrb[99].mxu0  ;;  %v3334_v7 = vmax.f32 %v3176_v43, 0.0 }
 0x63f   :  { %v3182_v20 = vadd.f32 %v3181_v29, %v2829_v26  ;;  %v3335_v0 = vmax.f32 %v3178_v39, 0.0  ;;  %v2869_v39 = vpop.permute.xlu1 %2868 }
 0x640   :  { %v3336_v9 = vmax.f32 %v3180_v54, 0.0 }
 0x641   :  { %v3337_v24 = vmax.f32 %v3182_v20, 0.0 }
 0x642   :  { %v3398_v21 = vpack.c.bf16 %v3336_v9, %v3334_v7 }
 0x643   :  { %v3399_v53 = vpack.c.bf16 %v3337_v24, %v3335_v0  ;;  %v3185_v6 = vpop.f32.mrb[100].mxu0 }
 0x644   :  { %v3186_v48 = vadd.f32 %v3185_v6, %v2834_v55  ;;  %v3187_v49 = vpop.f32.mrb[101].mxu0 }
 0x645   :  { %v3188_v51 = vadd.f32 %v3187_v49, %v2834_v55  ;;  %v3189_v3 = vpop.f32.mrb[102].mxu0  ;;  %3816 = vmatprep.subr.bf16.mxu1 %v3399_v53  ;;  %v2874_v55 = vpop.permute.xlu0 %2873 }
 0x646   :  { %v3190_v57 = vadd.f32 %v3189_v3, %v2839_v4  ;;  %v3191_v18 = vpop.f32.mrb[103].mxu0  ;;  %3817 = vmatpush1.bf16.msra.mxu1 %v3398_v21  ;;  %v3338_v40 = vmax.f32 %v3186_v48, 0.0 }
 0x647   :  { %v3192_v59 = vadd.f32 %v3191_v18, %v2839_v4  ;;  %v3339_v35 = vmax.f32 %v3188_v51, 0.0  ;;  %v2879_v4 = vpop.permute.xlu1 %2878 }
 0x648   :  { %v3340_v34 = vmax.f32 %v3190_v57, 0.0 }
 0x649   :  { %v3341_v16 = vmax.f32 %v3192_v59, 0.0 }
 0x64a   :  { %v3400_v13 = vpack.c.bf16 %v3340_v34, %v3338_v40 }
 0x64b   :  { %v3401_v46 = vpack.c.bf16 %v3341_v16, %v3339_v35  ;;  %v3195_v60 = vpop.f32.mrb[104].mxu0 }
 0x64c   :  { %v3196_v25 = vadd.f32 %v3195_v60, %v2844_v19  ;;  %v3197_v1 = vpop.f32.mrb[105].mxu0 }
 0x64d   :  { %v3198_v5 = vadd.f32 %v3197_v1, %v2844_v19  ;;  %v3199_v15 = vpop.f32.mrb[106].mxu0  ;;  %3818 = vmatprep.subr.bf16.mxu1 %v3401_v46  ;;  %v2884_v19 = vpop.permute.xlu0 %2883 }
 0x64e   :  { %v3200_v8 = vadd.f32 %v3199_v15, %v2849_v62  ;;  %v3201_v45 = vpop.f32.mrb[107].mxu0  ;;  %3819 = vmatpush1.bf16.msra.mxu1 %v3400_v13  ;;  %v3342_v52 = vmax.f32 %v3196_v25, 0.0 }
 0x64f   :  { %v3202_v41 = vadd.f32 %v3201_v45, %v2849_v62  ;;  %v3343_v31 = vmax.f32 %v3198_v5, 0.0  ;;  %v2889_v62 = vpop.permute.xlu1 %2888 }
 0x650   :  { %v3344_v27 = vmax.f32 %v3200_v8, 0.0 }
 0x651   :  { %v3345_v50 = vmax.f32 %v3202_v41, 0.0 }
 0x652   :  { %v3402_v12 = vpack.c.bf16 %v3344_v27, %v3342_v52 }
 0x653   :  { %v3403_v36 = vpack.c.bf16 %v3345_v50, %v3343_v31  ;;  %v3205_v23 = vpop.f32.mrb[108].mxu0 }
 0x654   :  { %v3206_v14 = vadd.f32 %v3205_v23, %v2854_v61  ;;  %v3207_v22 = vpop.f32.mrb[109].mxu0 }
 0x655   :  { %v3208_v33 = vadd.f32 %v3207_v22, %v2854_v61  ;;  %v3209_v28 = vpop.f32.mrb[110].mxu0  ;;  %3820 = vmatprep.subr.bf16.mxu1 %v3403_v36  ;;  %v2894_v61 = vpop.permute.xlu0 %2893 }
 0x656   :  { %v3210_v32 = vadd.f32 %v3209_v28, %v2859_v30  ;;  %v3211_v11 = vpop.f32.mrb[111].mxu0  ;;  %3821 = vmatpush1.bf16.msra.mxu1 %v3402_v12  ;;  %v3346_v38 = vmax.f32 %v3206_v14, 0.0 }
 0x657   :  { %v3212_v58 = vadd.f32 %v3211_v11, %v2859_v30  ;;  %v3347_v56 = vmax.f32 %v3208_v33, 0.0  ;;  %v2899_v30 = vpop.permute.xlu1 %2898 }
 0x658   :  { %v3348_v63 = vmax.f32 %v3210_v32, 0.0 }
 0x659   :  { %v3349_v42 = vmax.f32 %v3212_v58, 0.0 }
 0x65a   :  { %v3404_v44 = vpack.c.bf16 %v3348_v63, %v3346_v38 }
 0x65b   :  { %v3405_v47 = vpack.c.bf16 %v3349_v42, %v3347_v56  ;;  %v3215_v43 = vpop.f32.mrb[112].mxu0 }
 0x65c   :  { %v3216_v17 = vadd.f32 %v3215_v43, %v2864_v37  ;;  %v3217_v26 = vpop.f32.mrb[113].mxu0 }
 0x65d   :  { %v3218_v2 = vadd.f32 %v3217_v26, %v2864_v37  ;;  %v3219_v54 = vpop.f32.mrb[114].mxu0  ;;  %3822 = vmatprep.subr.bf16.mxu1 %v3405_v47  ;;  %v2904_v37 = vpop.permute.xlu0 %2903 }
 0x65e   :  { %v3220_v29 = vadd.f32 %v3219_v54, %v2869_v39  ;;  %v3221_v10 = vpop.f32.mrb[115].mxu0  ;;  %3823 = vmatpush1.bf16.msra.mxu1 %v3404_v44  ;;  %v3350_v7 = vmax.f32 %v3216_v17, 0.0 }
 0x65f   :  { %v3222_v20 = vadd.f32 %v3221_v10, %v2869_v39  ;;  %v3351_v0 = vmax.f32 %v3218_v2, 0.0  ;;  %v2909_v39 = vpop.permute.xlu1 %2908 }
 0x660   :  { %v3352_v9 = vmax.f32 %v3220_v29, 0.0 }
 0x661   :  { %v3353_v24 = vmax.f32 %v3222_v20, 0.0 }
 0x662   :  { %v3406_v21 = vpack.c.bf16 %v3352_v9, %v3350_v7 }
 0x663   :  { %v3407_v53 = vpack.c.bf16 %v3353_v24, %v3351_v0  ;;  %v3225_v6 = vpop.f32.mrb[116].mxu0 }
 0x664   :  { %v3226_v48 = vadd.f32 %v3225_v6, %v2874_v55  ;;  %v3227_v49 = vpop.f32.mrb[117].mxu0 }
 0x665   :  { %v3228_v51 = vadd.f32 %v3227_v49, %v2874_v55  ;;  %v3229_v3 = vpop.f32.mrb[118].mxu0  ;;  %3824 = vmatprep.subr.bf16.mxu1 %v3407_v53  ;;  %v2914_v55 = vpop.permute.xlu0 %2913 }
 0x666   :  { %v3230_v57 = vadd.f32 %v3229_v3, %v2879_v4  ;;  %v3231_v18 = vpop.f32.mrb[119].mxu0  ;;  %3825 = vmatpush1.bf16.msra.mxu1 %v3406_v21  ;;  %v3354_v40 = vmax.f32 %v3226_v48, 0.0 }
 0x667   :  { %v3232_v59 = vadd.f32 %v3231_v18, %v2879_v4  ;;  %v3355_v35 = vmax.f32 %v3228_v51, 0.0  ;;  %v2919_v4 = vpop.permute.xlu1 %2918 }
 0x668   :  { %v3356_v34 = vmax.f32 %v3230_v57, 0.0 }
 0x669   :  { %v3357_v16 = vmax.f32 %v3232_v59, 0.0 }
 0x66a   :  { %v3408_v13 = vpack.c.bf16 %v3356_v34, %v3354_v40 }
 0x66b   :  { %v3409_v46 = vpack.c.bf16 %v3357_v16, %v3355_v35  ;;  %v3235_v60 = vpop.f32.mrb[120].mxu0 }
 0x66c   :  { %v3236_v25 = vadd.f32 %v3235_v60, %v2884_v19  ;;  %v3237_v1 = vpop.f32.mrb[121].mxu0 }
 0x66d   :  { %v3238_v5 = vadd.f32 %v3237_v1, %v2884_v19  ;;  %v3239_v15 = vpop.f32.mrb[122].mxu0  ;;  %3826 = vmatprep.subr.bf16.mxu1 %v3409_v46  ;;  %v2924_v19 = vpop.permute.xlu0 %2923 }
 0x66e   :  { %v3240_v8 = vadd.f32 %v3239_v15, %v2889_v62  ;;  %v3241_v45 = vpop.f32.mrb[123].mxu0  ;;  %3827 = vmatpush1.bf16.msra.mxu1 %v3408_v13  ;;  %v3358_v52 = vmax.f32 %v3236_v25, 0.0 }
 0x66f   :  { %v3242_v41 = vadd.f32 %v3241_v45, %v2889_v62  ;;  %v3359_v31 = vmax.f32 %v3238_v5, 0.0  ;;  %v2929_v62 = vpop.permute.xlu1 %2928 }
 0x670   :  { %v3360_v27 = vmax.f32 %v3240_v8, 0.0 }
 0x671   :  { %v3361_v50 = vmax.f32 %v3242_v41, 0.0 }
 0x672   :  { %v3410_v12 = vpack.c.bf16 %v3360_v27, %v3358_v52 }
 0x673   :  { %v3411_v36 = vpack.c.bf16 %v3361_v50, %v3359_v31  ;;  %v3245_v23 = vpop.f32.mrb[124].mxu0 }
 0x674   :  { %v3246_v14 = vadd.f32 %v3245_v23, %v2894_v61  ;;  %v3247_v22 = vpop.f32.mrb[125].mxu0 }
 0x675   :  { %v3248_v33 = vadd.f32 %v3247_v22, %v2894_v61  ;;  %v3249_v28 = vpop.f32.mrb[126].mxu0  ;;  %3828 = vmatprep.subr.bf16.mxu1 %v3411_v36  ;;  %v2934_v61 = vpop.permute.xlu0 %2933 }
 0x676   :  { %v3250_v32 = vadd.f32 %v3249_v28, %v2899_v30  ;;  %v3251_v11 = vpop.f32.mrb[127].mxu0  ;;  %3829 = vmatpush1.bf16.msra.mxu1 %v3410_v12  ;;  %v3362_v38 = vmax.f32 %v3246_v14, 0.0 }
 0x677   :  { %v3252_v58 = vadd.f32 %v3251_v11, %v2899_v30  ;;  %v3363_v56 = vmax.f32 %v3248_v33, 0.0  ;;  %v2939_v30 = vpop.permute.xlu1 %2938 }
 0x678   :  { %v3364_v63 = vmax.f32 %v3250_v32, 0.0 }
 0x679   :  { %v3365_v42 = vmax.f32 %v3252_v58, 0.0 }
 0x67a   :  { %v3412_v44 = vpack.c.bf16 %v3364_v63, %v3362_v38 }
 0x67b   :  { %v3413_v47 = vpack.c.bf16 %v3365_v42, %v3363_v56  ;;  %v3255_v43 = vpop.f32.mrb[128].mxu0 }
 0x67c   :  { %v3256_v17 = vadd.f32 %v3255_v43, %v2904_v37  ;;  %v3257_v26 = vpop.f32.mrb[129].mxu0 }
 0x67d   :  { %v3258_v2 = vadd.f32 %v3257_v26, %v2904_v37  ;;  %v3259_v54 = vpop.f32.mrb[130].mxu0  ;;  %3830 = vmatprep.subr.bf16.mxu1 %v3413_v47  ;;  %v2944_v37 = vpop.permute.xlu0 %2943 }
 0x67e   :  { %v3260_v29 = vadd.f32 %v3259_v54, %v2909_v39  ;;  %v3261_v10 = vpop.f32.mrb[131].mxu0  ;;  %3831 = vmatpush1.bf16.msra.mxu1 %v3412_v44  ;;  %v3366_v7 = vmax.f32 %v3256_v17, 0.0 }
 0x67f   :  { %v3262_v20 = vadd.f32 %v3261_v10, %v2909_v39  ;;  %v3367_v0 = vmax.f32 %v3258_v2, 0.0  ;;  %v2949_v39 = vpop.permute.xlu1 %2948 }
 0x680   :  { %v3368_v9 = vmax.f32 %v3260_v29, 0.0 }
 0x681   :  { %v3369_v24 = vmax.f32 %v3262_v20, 0.0 }
 0x682   :  { %v3414_v21 = vpack.c.bf16 %v3368_v9, %v3366_v7 }
 0x683   :  { %v3415_v53 = vpack.c.bf16 %v3369_v24, %v3367_v0  ;;  %v3265_v6 = vpop.f32.mrb[132].mxu0 }
 0x684   :  { %v3266_v48 = vadd.f32 %v3265_v6, %v2914_v55  ;;  %v3267_v49 = vpop.f32.mrb[133].mxu0 }
 0x685   :  { %v3268_v51 = vadd.f32 %v3267_v49, %v2914_v55  ;;  %v3269_v3 = vpop.f32.mrb[134].mxu0  ;;  %3832 = vmatprep.subr.bf16.mxu1 %v3415_v53  ;;  %v2954_v55 = vpop.permute.xlu0 %2953 }
 0x686   :  { %v3270_v57 = vadd.f32 %v3269_v3, %v2919_v4  ;;  %v3271_v18 = vpop.f32.mrb[135].mxu0  ;;  %3833 = vmatpush1.bf16.msra.mxu1 %v3414_v21  ;;  %v3370_v40 = vmax.f32 %v3266_v48, 0.0 }
 0x687   :  { %v3272_v59 = vadd.f32 %v3271_v18, %v2919_v4  ;;  %v3371_v35 = vmax.f32 %v3268_v51, 0.0  ;;  %v2959_v4 = vpop.permute.xlu1 %2958 }
 0x688   :  { %v3372_v34 = vmax.f32 %v3270_v57, 0.0 }
 0x689   :  { %v3373_v16 = vmax.f32 %v3272_v59, 0.0 }
 0x68a   :  { %v3416_v13 = vpack.c.bf16 %v3372_v34, %v3370_v40 }
 0x68b   :  { %v3417_v46 = vpack.c.bf16 %v3373_v16, %v3371_v35  ;;  %v3275_v60 = vpop.f32.mrb[136].mxu0 }
 0x68c   :  { %v3276_v25 = vadd.f32 %v3275_v60, %v2924_v19  ;;  %v3277_v1 = vpop.f32.mrb[137].mxu0 }
 0x68d   :  { %v3278_v5 = vadd.f32 %v3277_v1, %v2924_v19  ;;  %v3279_v15 = vpop.f32.mrb[138].mxu0  ;;  %3834 = vmatprep.subr.bf16.mxu1 %v3417_v46  ;;  %v2964_v19 = vpop.permute.xlu0 %2963 }
 0x68e   :  { %v3280_v8 = vadd.f32 %v3279_v15, %v2929_v62  ;;  %v3281_v45 = vpop.f32.mrb[139].mxu0  ;;  %3835 = vmatpush1.bf16.msra.mxu1 %v3416_v13  ;;  %v3374_v52 = vmax.f32 %v3276_v25, 0.0 }
 0x68f   :  { %v3282_v41 = vadd.f32 %v3281_v45, %v2929_v62  ;;  %v3375_v31 = vmax.f32 %v3278_v5, 0.0  ;;  %v2969_v62 = vpop.permute.xlu1 %2968 }
 0x690   :  { %v3376_v27 = vmax.f32 %v3280_v8, 0.0 }
 0x691   :  { %v3377_v50 = vmax.f32 %v3282_v41, 0.0 }
 0x692   :  { %v3418_v12 = vpack.c.bf16 %v3376_v27, %v3374_v52 }
 0x693   :  { %v3419_v36 = vpack.c.bf16 %v3377_v50, %v3375_v31  ;;  %v3285_v23 = vpop.f32.mrb[140].mxu0 }
 0x694   :  { %v3286_v14 = vadd.f32 %v3285_v23, %v2934_v61  ;;  %v3287_v22 = vpop.f32.mrb[141].mxu0 }
 0x695   :  { %v3288_v33 = vadd.f32 %v3287_v22, %v2934_v61  ;;  %v3289_v28 = vpop.f32.mrb[142].mxu0  ;;  %3836 = vmatprep.subr.bf16.mxu1 %v3419_v36  ;;  %v2974_v61 = vpop.permute.xlu0 %2973 }
 0x696   :  { %v3290_v32 = vadd.f32 %v3289_v28, %v2939_v30  ;;  %v3291_v11 = vpop.f32.mrb[143].mxu0  ;;  %3837 = vmatpush1.bf16.msra.mxu1 %v3418_v12  ;;  %v3378_v38 = vmax.f32 %v3286_v14, 0.0 }
 0x697   :  { %v3292_v58 = vadd.f32 %v3291_v11, %v2939_v30  ;;  %v3379_v56 = vmax.f32 %v3288_v33, 0.0  ;;  %v2979_v30 = vpop.permute.xlu1 %2978 }
 0x698   :  { %v3380_v63 = vmax.f32 %v3290_v32, 0.0 }
 0x699   :  { %v3381_v42 = vmax.f32 %v3292_v58, 0.0 }
 0x69a   :  { %v3420_v44 = vpack.c.bf16 %v3380_v63, %v3378_v38 }
 0x69b   :  { %v3421_v47 = vpack.c.bf16 %v3381_v42, %v3379_v56  ;;  %v3295_v43 = vpop.f32.mrb[144].mxu0 }
 0x69c   :  { %v3296_v17 = vadd.f32 %v3295_v43, %v2944_v37  ;;  %v3297_v26 = vpop.f32.mrb[145].mxu0  ;;  %v5641_v43 = vld [vmem:[%s7714_s3 + $0x414] ss:$8 sps:$4 sm:$0xff]  }
 0x69d   :  { %v3298_v2 = vadd.f32 %v3297_v26, %v2944_v37  ;;  %v3299_v54 = vpop.f32.mrb[146].mxu0  ;;  %3838 = vmatprep.subr.bf16.mxu1 %v3421_v47  ;;  %v5638_v47 = vld [vmem:[%s7714_s3 + $0x400] ss:$8 sps:$4 sm:$0xff]   ;;  %v5644_v26 = vld [vmem:[%s7714_s3 + $0x424] ss:$8 sps:$4 sm:$0xff]  }
 0x69e   :  { %v3300_v29 = vadd.f32 %v3299_v54, %v2949_v39  ;;  %v3301_v10 = vpop.f32.mrb[147].mxu0  ;;  %3839 = vmatpush1.bf16.msra.mxu1 %v3420_v44  ;;  %v3382_v7 = vmax.f32 %v3296_v17, 0.0  ;;  %v5643_v17 = vld [vmem:[%s7714_s3 + $0x410] ss:$8 sps:$4 sm:$0xff]  }
 0x69f   :  { %v3302_v20 = vadd.f32 %v3301_v10, %v2949_v39  ;;  %v3383_v0 = vmax.f32 %v3298_v2, 0.0  ;;  %v5646_v39 = vld [vmem:[%s7714_s3 + $0x420] ss:$8 sps:$4 sm:$0xff]   ;;  %v5647_v2 = vld [vmem:[%s7714_s3 + $0x434] ss:$8 sps:$4 sm:$0xff]  }
 0x6a0   :  { %v3384_v9 = vmax.f32 %v3300_v29, 0.0  ;;  %v5649_v54 = vld [vmem:[%s7714_s3 + $0x430] ss:$8 sps:$4 sm:$0xff]   ;;  %v5650_v29 = vld [vmem:[%s7714_s3 + $0x444] ss:$8 sps:$4 sm:$0xff]  }
 0x6a1   :  { %v3385_v24 = vmax.f32 %v3302_v20, 0.0  ;;  %v5652_v10 = vld [vmem:[%s7714_s3 + $0x440] ss:$8 sps:$4 sm:$0xff]   ;;  %v5653_v20 = vld [vmem:[%s7714_s3 + $0x454] ss:$8 sps:$4 sm:$0xff]  }
 0x6a2   :  { %v3422_v21 = vpack.c.bf16 %v3384_v9, %v3382_v7  ;;  %v5655_v7 = vld [vmem:[%s7714_s3 + $0x450] ss:$8 sps:$4 sm:$0xff]   ;;  %v5656_v9 = vld [vmem:[%s7714_s3 + $0x464] ss:$8 sps:$4 sm:$0xff]  }
 0x6a3   :  { %v3423_v53 = vpack.c.bf16 %v3385_v24, %v3383_v0  ;;  %v3305_v6 = vpop.f32.mrb[148].mxu0  ;;  %v5658_v0 = vld [vmem:[%s7714_s3 + $0x460] ss:$8 sps:$4 sm:$0xff]   ;;  %v5659_v24 = vld [vmem:[%s7714_s3 + $0x474] ss:$8 sps:$4 sm:$0xff]  }
 0x6a4   :  { %v3306_v48 = vadd.f32 %v3305_v6, %v2954_v55  ;;  %v3307_v49 = vpop.f32.mrb[149].mxu0  ;;  %v5665_v6 = vld [vmem:[%s7714_s3 + $0x494] ss:$8 sps:$4 sm:$0xff]  }
 0x6a5   :  { %v3308_v51 = vadd.f32 %v3307_v49, %v2954_v55  ;;  %v3309_v3 = vpop.f32.mrb[150].mxu0  ;;  %3840 = vmatprep.subr.bf16.mxu1 %v3423_v53  ;;  %v5662_v55 = vld [vmem:[%s7714_s3 + $0x484] ss:$8 sps:$4 sm:$0xff]   ;;  %v5664_v53 = vld [vmem:[%s7714_s3 + $0x480] ss:$8 sps:$4 sm:$0xff]  }
 0x6a6   :  { %v3310_v57 = vadd.f32 %v3309_v3, %v2959_v4  ;;  %v3311_v18 = vpop.f32.mrb[151].mxu0  ;;  %3841 = vmatpush1.bf16.msra.mxu1 %v3422_v21  ;;  %v3386_v40 = vmax.f32 %v3306_v48, 0.0  ;;  %v5661_v21 = vld [vmem:[%s7714_s3 + $0x470] ss:$8 sps:$4 sm:$0xff]   ;;  %v5668_v49 = vld [vmem:[%s7714_s3 + $0x4a4] ss:$8 sps:$4 sm:$0xff]  }
 0x6a7   :  { %v3312_v59 = vadd.f32 %v3311_v18, %v2959_v4  ;;  %v3387_v35 = vmax.f32 %v3308_v51, 0.0  ;;  %v5667_v48 = vld [vmem:[%s7714_s3 + $0x490] ss:$8 sps:$4 sm:$0xff]   ;;  %v5670_v4 = vld [vmem:[%s7714_s3 + $0x4a0] ss:$8 sps:$4 sm:$0xff]  }
 0x6a8   :  { %v3388_v34 = vmax.f32 %v3310_v57, 0.0  ;;  %v5671_v51 = vld [vmem:[%s7714_s3 + $0x4b4] ss:$8 sps:$4 sm:$0xff]   ;;  %v5673_v3 = vld [vmem:[%s7714_s3 + $0x4b0] ss:$8 sps:$4 sm:$0xff]  }
 0x6a9   :  { %v3389_v16 = vmax.f32 %v3312_v59, 0.0  ;;  %v5674_v57 = vld [vmem:[%s7714_s3 + $0x4c4] ss:$8 sps:$4 sm:$0xff]   ;;  %v5676_v18 = vld [vmem:[%s7714_s3 + $0x4c0] ss:$8 sps:$4 sm:$0xff]  }
 0x6aa   :  { %v3424_v13 = vpack.c.bf16 %v3388_v34, %v3386_v40  ;;  %v5677_v59 = vld [vmem:[%s7714_s3 + $0x4d4] ss:$8 sps:$4 sm:$0xff]   ;;  %v5679_v40 = vld [vmem:[%s7714_s3 + $0x4d0] ss:$8 sps:$4 sm:$0xff]   ;;  %v5680_v34 = vld [vmem:[%s7714_s3 + $0x4e4] ss:$8 sps:$4 sm:$0xff]  }
 0x6ab   :  { %v3425_v46 = vpack.c.bf16 %v3389_v16, %v3387_v35  ;;  %v3315_v60 = vpop.f32.mrb[152].mxu0  ;;  %v5682_v35 = vld [vmem:[%s7714_s3 + $0x4e0] ss:$8 sps:$4 sm:$0xff]   ;;  %v5683_v16 = vld [vmem:[%s7714_s3 + $0x4f4] ss:$8 sps:$4 sm:$0xff]  }
 0x6ac   :  { %v3316_v25 = vadd.f32 %v3315_v60, %v2964_v19  ;;  %v3317_v1 = vpop.f32.mrb[153].mxu0 }
 0x6ad   :  { %v3318_v5 = vadd.f32 %v3317_v1, %v2964_v19  ;;  %v3319_v15 = vpop.f32.mrb[154].mxu0  ;;  %3842 = vmatprep.subr.bf16.mxu1 %v3425_v46  ;;  %v3499_v19 = vpop.permute.xlu0 %3498 }
 0x6ae   :  { %v3320_v8 = vadd.f32 %v3319_v15, %v2969_v62  ;;  %v3321_v45 = vpop.f32.mrb[155].mxu0  ;;  %3843 = vmatpush1.bf16.msra.mxu1 %v3424_v13  ;;  %v3390_v52 = vmax.f32 %v3316_v25, 0.0  ;;  %v5685_v13 = vld [vmem:[%s7714_s3 + $0x4f0] ss:$8 sps:$4 sm:$0xff]   ;;  %v3504_v1 = vpop.permute.xlu1 %3503 }
 0x6af   :  { %v3322_v41 = vadd.f32 %v3321_v45, %v2969_v62  ;;  %v3391_v31 = vmax.f32 %v3318_v5, 0.0  ;;  %v5688_v45 = vld [vmem:[%s7714_s3 + $0x504] ss:$8 sps:$4 sm:$0xff]  }
 0x6b0   :  { %v3392_v27 = vmax.f32 %v3320_v8, 0.0  ;;  %4523 = vmatprep.mubr.bf16.mxu0 %v5688_v45 }
 0x6b1   :  { %v3393_v50 = vmax.f32 %v3322_v41, 0.0 }
 0x6b2   :  { %v3426_v12 = vpack.c.bf16 %v3392_v27, %v3390_v52 }
 0x6b3   :  { %v3427_v36 = vpack.c.bf16 %v3393_v50, %v3391_v31  ;;  %v3325_v23 = vpop.f32.mrb[156].mxu0 }
 0x6b4   :  { %v3326_v14 = vadd.f32 %v3325_v23, %v2974_v61  ;;  %v3327_v22 = vpop.f32.mrb[157].mxu0 }
 0x6b5   :  { %v3328_v33 = vadd.f32 %v3327_v22, %v2974_v61  ;;  %v3329_v28 = vpop.f32.mrb[158].mxu0  ;;  %3844 = vmatprep.subr.bf16.mxu1 %v3427_v36  ;;  %v3509_v61 = vpop.permute.xlu0 %3508 }
 0x6b6   :  { %v3330_v32 = vadd.f32 %v3329_v28, %v2979_v30  ;;  %v3331_v11 = vpop.f32.mrb[159].mxu0  ;;  %3845 = vmatpush1.bf16.msra.mxu1 %v3426_v12  ;;  %v3394_v38 = vmax.f32 %v3326_v14, 0.0 }
 0x6b7   :  { %v3332_v58 = vadd.f32 %v3331_v11, %v2979_v30  ;;  %v3395_v56 = vmax.f32 %v3328_v33, 0.0  ;;  %v3514_v30 = vpop.permute.xlu1 %3513 }
 0x6b8   :  { %v3396_v63 = vmax.f32 %v3330_v32, 0.0 }
 0x6b9   :  { %v3397_v42 = vmax.f32 %v3332_v58, 0.0 }
 0x6ba   :  { %v3428_v44 = vpack.c.bf16 %v3396_v63, %v3394_v38 }
 0x6bb   :  { %v3429_v37 = vpack.c.bf16 %v3397_v42, %v3395_v56 }
 0x6bd   :  { %3846 = vmatprep.subr.bf16.mxu1 %v3429_v37  ;;  %v3519_v37 = vpop.permute.xlu0 %3518 }
 0x6be   :  { %3847 = vmatpush1.bf16.msra.mxu1 %v3428_v44 }
 0x6c1   :  { %3849 = vmatmul.mubr.bf16.vlgmr.msra.gmra.mrb[160].mxu1 %v5638_v47 }
 0x6c2   :  { %3858 = vmatprep.mubr.bf16.mxu1 %v5641_v43 }
 0x6c9   :  { %3859 = vmatmul.mubr.bf16.gmra.mrb[164].mxu1 %v5643_v17 }
 0x6ca   :  { %3868 = vmatprep.mubr.bf16.mxu1 %v5644_v26 }
 0x6d1   :  { %3869 = vmatmul.mubr.bf16.gmra.mrb[168].mxu1 %v5646_v39  ;;  %v3524_v39 = vpop.permute.xlu1 %3523 }
 0x6d2   :  { %3878 = vmatprep.mubr.bf16.mxu1 %v5647_v2 }
 0x6d9   :  { %3879 = vmatmul.mubr.bf16.gmra.mrb[172].mxu1 %v5649_v54 }
 0x6da   :  { %3888 = vmatprep.mubr.bf16.mxu1 %v5650_v29 }
 0x6e1   :  { %3889 = vmatmul.mubr.bf16.gmra.mrb[176].mxu1 %v5652_v10 }
 0x6e2   :  { %3898 = vmatprep.mubr.bf16.mxu1 %v5653_v20 }
 0x6e9   :  { %3899 = vmatmul.mubr.bf16.gmra.mrb[180].mxu1 %v5655_v7 }
 0x6ea   :  { %3908 = vmatprep.mubr.bf16.mxu1 %v5656_v9 }
 0x6f1   :  { %3909 = vmatmul.mubr.bf16.gmra.mrb[184].mxu1 %v5658_v0 }
 0x6f2   :  { %3918 = vmatprep.mubr.bf16.mxu1 %v5659_v24 }
 0x6f9   :  { %3919 = vmatmul.mubr.bf16.gmra.mrb[188].mxu1 %v5661_v21 }
 0x6fa   :  { %3928 = vmatprep.mubr.bf16.mxu1 %v5662_v55  ;;  %v3529_v55 = vpop.permute.xlu0 %3528 }
 0x701   :  { %3929 = vmatmul.mubr.bf16.gmra.mrb[192].mxu1 %v5664_v53 }
 0x702   :  { %3938 = vmatprep.mubr.bf16.mxu1 %v5665_v6 }
 0x709   :  { %3939 = vmatmul.mubr.bf16.gmra.mrb[196].mxu1 %v5667_v48 }
 0x70a   :  { %3948 = vmatprep.mubr.bf16.mxu1 %v5668_v49 }
 0x711   :  { %3949 = vmatmul.mubr.bf16.gmra.mrb[200].mxu1 %v5670_v4  ;;  %v3534_v4 = vpop.permute.xlu1 %3533 }
 0x712   :  { %3958 = vmatprep.mubr.bf16.mxu1 %v5671_v51 }
 0x719   :  { %3959 = vmatmul.mubr.bf16.gmra.mrb[204].mxu1 %v5673_v3 }
 0x71a   :  { %3968 = vmatprep.mubr.bf16.mxu1 %v5674_v57 }
 0x721   :  { %3969 = vmatmul.mubr.bf16.gmra.mrb[208].mxu1 %v5676_v18 }
 0x722   :  { %3978 = vmatprep.mubr.bf16.mxu1 %v5677_v59 }
 0x729   :  { %3979 = vmatmul.mubr.bf16.gmra.mrb[212].mxu1 %v5679_v40 }
 0x72a   :  { %3988 = vmatprep.mubr.bf16.mxu1 %v5680_v34 }
 0x731   :  { %3989 = vmatmul.mubr.bf16.gmra.mrb[216].mxu1 %v5682_v35 }
 0x732   :  { %3998 = vmatprep.mubr.bf16.mxu1 %v5683_v16 }
 0x739   :  { %3999 = vmatmul.mubr.bf16.gmra.mrb[220].mxu1 %v5685_v13 }
 0x794   :  { %v3850_v46 = vpop.f32.mrb[160].mxu1 }
 0x795   :  { %v3851_v60 = vadd.f32 %v3850_v46, %v3499_v19  ;;  %v3852_v25 = vpop.f32.mrb[161].mxu1 }
 0x796   :  { %v3853_v62 = vadd.f32 %v3852_v25, %v3499_v19  ;;  %v3854_v5 = vpop.f32.mrb[162].mxu1  ;;  %v3539_v19 = vpop.permute.xlu0 %3538 }
 0x797   :  { %v3855_v15 = vadd.f32 %v3854_v5, %v3504_v1  ;;  %v3856_v8 = vpop.f32.mrb[163].mxu1  ;;  %v4009_v52 = vmax.f32 %v3851_v60, 0.0 }
 0x798   :  { %v3857_v41 = vadd.f32 %v3856_v8, %v3504_v1  ;;  %v4010_v31 = vmax.f32 %v3853_v62, 0.0  ;;  %v3544_v62 = vpop.permute.xlu1 %3543 }
 0x799   :  { %v4011_v27 = vmax.f32 %v3855_v15, 0.0 }
 0x79a   :  { %v4012_v50 = vmax.f32 %v3857_v41, 0.0 }
 0x79b   :  { %v4073_v12 = vpack.c.bf16 %v4011_v27, %v4009_v52 }
 0x79c   :  { %v4074_v36 = vpack.c.bf16 %v4012_v50, %v4010_v31  ;;  %v3860_v23 = vpop.f32.mrb[164].mxu1 }
 0x79d   :  { %v3861_v14 = vadd.f32 %v3860_v23, %v3509_v61  ;;  %v3862_v22 = vpop.f32.mrb[165].mxu1 }
 0x79e   :  { %v3863_v33 = vadd.f32 %v3862_v22, %v3509_v61  ;;  %v3864_v28 = vpop.f32.mrb[166].mxu1  ;;  %4491 = vmatprep.subr.bf16.mxu0 %v4074_v36  ;;  %v3549_v61 = vpop.permute.xlu0 %3548 }
 0x79f   :  { %v3865_v32 = vadd.f32 %v3864_v28, %v3514_v30  ;;  %v3866_v11 = vpop.f32.mrb[167].mxu1  ;;  %4492 = vmatpush1.bf16.msra.mxu0 %v4073_v12  ;;  %v4013_v38 = vmax.f32 %v3861_v14, 0.0 }
 0x7a0   :  { %v3867_v58 = vadd.f32 %v3866_v11, %v3514_v30  ;;  %v4014_v56 = vmax.f32 %v3863_v33, 0.0  ;;  %v3554_v30 = vpop.permute.xlu1 %3553 }
 0x7a1   :  { %v4015_v63 = vmax.f32 %v3865_v32, 0.0 }
 0x7a2   :  { %v4016_v42 = vmax.f32 %v3867_v58, 0.0 }
 0x7a3   :  { %v4075_v44 = vpack.c.bf16 %v4015_v63, %v4013_v38 }
 0x7a4   :  { %v4076_v47 = vpack.c.bf16 %v4016_v42, %v4014_v56  ;;  %v3870_v43 = vpop.f32.mrb[168].mxu1 }
 0x7a5   :  { %v3871_v17 = vadd.f32 %v3870_v43, %v3519_v37  ;;  %v3872_v26 = vpop.f32.mrb[169].mxu1 }
 0x7a6   :  { %v3873_v2 = vadd.f32 %v3872_v26, %v3519_v37  ;;  %v3874_v54 = vpop.f32.mrb[170].mxu1  ;;  %4493 = vmatprep.subr.bf16.mxu0 %v4076_v47  ;;  %v3559_v37 = vpop.permute.xlu0 %3558 }
 0x7a7   :  { %v3875_v29 = vadd.f32 %v3874_v54, %v3524_v39  ;;  %v3876_v10 = vpop.f32.mrb[171].mxu1  ;;  %4494 = vmatpush1.bf16.msra.mxu0 %v4075_v44  ;;  %v4017_v7 = vmax.f32 %v3871_v17, 0.0 }
 0x7a8   :  { %v3877_v20 = vadd.f32 %v3876_v10, %v3524_v39  ;;  %v4018_v0 = vmax.f32 %v3873_v2, 0.0  ;;  %v3564_v39 = vpop.permute.xlu1 %3563 }
 0x7a9   :  { %v4019_v9 = vmax.f32 %v3875_v29, 0.0 }
 0x7aa   :  { %v4020_v24 = vmax.f32 %v3877_v20, 0.0 }
 0x7ab   :  { %v4077_v21 = vpack.c.bf16 %v4019_v9, %v4017_v7 }
 0x7ac   :  { %v4078_v53 = vpack.c.bf16 %v4020_v24, %v4018_v0  ;;  %v3880_v6 = vpop.f32.mrb[172].mxu1 }
 0x7ad   :  { %v3881_v48 = vadd.f32 %v3880_v6, %v3529_v55  ;;  %v3882_v49 = vpop.f32.mrb[173].mxu1 }
 0x7ae   :  { %v3883_v51 = vadd.f32 %v3882_v49, %v3529_v55  ;;  %v3884_v3 = vpop.f32.mrb[174].mxu1  ;;  %4495 = vmatprep.subr.bf16.mxu0 %v4078_v53  ;;  %v3569_v55 = vpop.permute.xlu0 %3568 }
 0x7af   :  { %v3885_v57 = vadd.f32 %v3884_v3, %v3534_v4  ;;  %v3886_v18 = vpop.f32.mrb[175].mxu1  ;;  %4496 = vmatpush1.bf16.msra.mxu0 %v4077_v21  ;;  %v4021_v40 = vmax.f32 %v3881_v48, 0.0 }
 0x7b0   :  { %v3887_v59 = vadd.f32 %v3886_v18, %v3534_v4  ;;  %v4022_v35 = vmax.f32 %v3883_v51, 0.0  ;;  %v3574_v4 = vpop.permute.xlu1 %3573 }
 0x7b1   :  { %v4023_v34 = vmax.f32 %v3885_v57, 0.0 }
 0x7b2   :  { %v4024_v16 = vmax.f32 %v3887_v59, 0.0 }
 0x7b3   :  { %v4079_v13 = vpack.c.bf16 %v4023_v34, %v4021_v40 }
 0x7b4   :  { %v4080_v46 = vpack.c.bf16 %v4024_v16, %v4022_v35  ;;  %v3890_v60 = vpop.f32.mrb[176].mxu1 }
 0x7b5   :  { %v3891_v25 = vadd.f32 %v3890_v60, %v3539_v19  ;;  %v3892_v1 = vpop.f32.mrb[177].mxu1 }
 0x7b6   :  { %v3893_v5 = vadd.f32 %v3892_v1, %v3539_v19  ;;  %v3894_v15 = vpop.f32.mrb[178].mxu1  ;;  %4497 = vmatprep.subr.bf16.mxu0 %v4080_v46  ;;  %v3579_v19 = vpop.permute.xlu0 %3578 }
 0x7b7   :  { %v3895_v8 = vadd.f32 %v3894_v15, %v3544_v62  ;;  %v3896_v45 = vpop.f32.mrb[179].mxu1  ;;  %4498 = vmatpush1.bf16.msra.mxu0 %v4079_v13  ;;  %v4025_v52 = vmax.f32 %v3891_v25, 0.0 }
 0x7b8   :  { %v3897_v41 = vadd.f32 %v3896_v45, %v3544_v62  ;;  %v4026_v31 = vmax.f32 %v3893_v5, 0.0  ;;  %v3584_v62 = vpop.permute.xlu1 %3583 }
 0x7b9   :  { %v4027_v27 = vmax.f32 %v3895_v8, 0.0 }
 0x7ba   :  { %v4028_v50 = vmax.f32 %v3897_v41, 0.0 }
 0x7bb   :  { %v4081_v12 = vpack.c.bf16 %v4027_v27, %v4025_v52 }
 0x7bc   :  { %v4082_v36 = vpack.c.bf16 %v4028_v50, %v4026_v31  ;;  %v3900_v23 = vpop.f32.mrb[180].mxu1 }
 0x7bd   :  { %v3901_v14 = vadd.f32 %v3900_v23, %v3549_v61  ;;  %v3902_v22 = vpop.f32.mrb[181].mxu1 }
 0x7be   :  { %v3903_v33 = vadd.f32 %v3902_v22, %v3549_v61  ;;  %v3904_v28 = vpop.f32.mrb[182].mxu1  ;;  %4499 = vmatprep.subr.bf16.mxu0 %v4082_v36  ;;  %v3589_v61 = vpop.permute.xlu0 %3588 }
 0x7bf   :  { %v3905_v32 = vadd.f32 %v3904_v28, %v3554_v30  ;;  %v3906_v11 = vpop.f32.mrb[183].mxu1  ;;  %4500 = vmatpush1.bf16.msra.mxu0 %v4081_v12  ;;  %v4029_v38 = vmax.f32 %v3901_v14, 0.0 }
 0x7c0   :  { %v3907_v58 = vadd.f32 %v3906_v11, %v3554_v30  ;;  %v4030_v56 = vmax.f32 %v3903_v33, 0.0  ;;  %v3594_v30 = vpop.permute.xlu1 %3593 }
 0x7c1   :  { %v4031_v63 = vmax.f32 %v3905_v32, 0.0 }
 0x7c2   :  { %v4032_v42 = vmax.f32 %v3907_v58, 0.0 }
 0x7c3   :  { %v4083_v44 = vpack.c.bf16 %v4031_v63, %v4029_v38 }
 0x7c4   :  { %v4084_v47 = vpack.c.bf16 %v4032_v42, %v4030_v56  ;;  %v3910_v43 = vpop.f32.mrb[184].mxu1 }
 0x7c5   :  { %v3911_v17 = vadd.f32 %v3910_v43, %v3559_v37  ;;  %v3912_v26 = vpop.f32.mrb[185].mxu1 }
 0x7c6   :  { %v3913_v2 = vadd.f32 %v3912_v26, %v3559_v37  ;;  %v3914_v54 = vpop.f32.mrb[186].mxu1  ;;  %4501 = vmatprep.subr.bf16.mxu0 %v4084_v47  ;;  %v3599_v37 = vpop.permute.xlu0 %3598 }
 0x7c7   :  { %v3915_v29 = vadd.f32 %v3914_v54, %v3564_v39  ;;  %v3916_v10 = vpop.f32.mrb[187].mxu1  ;;  %4502 = vmatpush1.bf16.msra.mxu0 %v4083_v44  ;;  %v4033_v7 = vmax.f32 %v3911_v17, 0.0 }
 0x7c8   :  { %v3917_v20 = vadd.f32 %v3916_v10, %v3564_v39  ;;  %v4034_v0 = vmax.f32 %v3913_v2, 0.0  ;;  %v3604_v39 = vpop.permute.xlu1 %3603 }
 0x7c9   :  { %v4035_v9 = vmax.f32 %v3915_v29, 0.0 }
 0x7ca   :  { %v4036_v24 = vmax.f32 %v3917_v20, 0.0 }
 0x7cb   :  { %v4085_v21 = vpack.c.bf16 %v4035_v9, %v4033_v7 }
 0x7cc   :  { %v4086_v53 = vpack.c.bf16 %v4036_v24, %v4034_v0  ;;  %v3920_v6 = vpop.f32.mrb[188].mxu1 }
 0x7cd   :  { %v3921_v48 = vadd.f32 %v3920_v6, %v3569_v55  ;;  %v3922_v49 = vpop.f32.mrb[189].mxu1 }
 0x7ce   :  { %v3923_v51 = vadd.f32 %v3922_v49, %v3569_v55  ;;  %v3924_v3 = vpop.f32.mrb[190].mxu1  ;;  %4503 = vmatprep.subr.bf16.mxu0 %v4086_v53  ;;  %v3609_v55 = vpop.permute.xlu0 %3608 }
 0x7cf   :  { %v3925_v57 = vadd.f32 %v3924_v3, %v3574_v4  ;;  %v3926_v18 = vpop.f32.mrb[191].mxu1  ;;  %4504 = vmatpush1.bf16.msra.mxu0 %v4085_v21  ;;  %v4037_v40 = vmax.f32 %v3921_v48, 0.0 }
 0x7d0   :  { %v3927_v59 = vadd.f32 %v3926_v18, %v3574_v4  ;;  %v4038_v35 = vmax.f32 %v3923_v51, 0.0  ;;  %v3614_v4 = vpop.permute.xlu1 %3613 }
 0x7d1   :  { %v4039_v34 = vmax.f32 %v3925_v57, 0.0 }
 0x7d2   :  { %v4040_v16 = vmax.f32 %v3927_v59, 0.0 }
 0x7d3   :  { %v4087_v13 = vpack.c.bf16 %v4039_v34, %v4037_v40 }
 0x7d4   :  { %v4088_v46 = vpack.c.bf16 %v4040_v16, %v4038_v35  ;;  %v3930_v60 = vpop.f32.mrb[192].mxu1 }
 0x7d5   :  { %v3931_v25 = vadd.f32 %v3930_v60, %v3579_v19  ;;  %v3932_v1 = vpop.f32.mrb[193].mxu1 }
 0x7d6   :  { %v3933_v5 = vadd.f32 %v3932_v1, %v3579_v19  ;;  %v3934_v15 = vpop.f32.mrb[194].mxu1  ;;  %4505 = vmatprep.subr.bf16.mxu0 %v4088_v46  ;;  %v3619_v19 = vpop.permute.xlu0 %3618 }
 0x7d7   :  { %v3935_v8 = vadd.f32 %v3934_v15, %v3584_v62  ;;  %v3936_v45 = vpop.f32.mrb[195].mxu1  ;;  %4506 = vmatpush1.bf16.msra.mxu0 %v4087_v13  ;;  %v4041_v52 = vmax.f32 %v3931_v25, 0.0 }
 0x7d8   :  { %v3937_v41 = vadd.f32 %v3936_v45, %v3584_v62  ;;  %v4042_v31 = vmax.f32 %v3933_v5, 0.0  ;;  %v3624_v62 = vpop.permute.xlu1 %3623 }
 0x7d9   :  { %v4043_v27 = vmax.f32 %v3935_v8, 0.0 }
 0x7da   :  { %v4044_v50 = vmax.f32 %v3937_v41, 0.0 }
 0x7db   :  { %v4089_v12 = vpack.c.bf16 %v4043_v27, %v4041_v52 }
 0x7dc   :  { %v4090_v36 = vpack.c.bf16 %v4044_v50, %v4042_v31  ;;  %v3940_v23 = vpop.f32.mrb[196].mxu1 }
 0x7dd   :  { %v3941_v14 = vadd.f32 %v3940_v23, %v3589_v61  ;;  %v3942_v22 = vpop.f32.mrb[197].mxu1 }
 0x7de   :  { %v3943_v33 = vadd.f32 %v3942_v22, %v3589_v61  ;;  %v3944_v28 = vpop.f32.mrb[198].mxu1  ;;  %4507 = vmatprep.subr.bf16.mxu0 %v4090_v36  ;;  %v3629_v61 = vpop.permute.xlu0 %3628 }
 0x7df   :  { %v3945_v32 = vadd.f32 %v3944_v28, %v3594_v30  ;;  %v3946_v11 = vpop.f32.mrb[199].mxu1  ;;  %4508 = vmatpush1.bf16.msra.mxu0 %v4089_v12  ;;  %v4045_v38 = vmax.f32 %v3941_v14, 0.0 }
 0x7e0   :  { %v3947_v58 = vadd.f32 %v3946_v11, %v3594_v30  ;;  %v4046_v56 = vmax.f32 %v3943_v33, 0.0  ;;  %v3634_v30 = vpop.permute.xlu1 %3633 }
 0x7e1   :  { %v4047_v63 = vmax.f32 %v3945_v32, 0.0 }
 0x7e2   :  { %v4048_v42 = vmax.f32 %v3947_v58, 0.0 }
 0x7e3   :  { %v4091_v44 = vpack.c.bf16 %v4047_v63, %v4045_v38 }
 0x7e4   :  { %v4092_v47 = vpack.c.bf16 %v4048_v42, %v4046_v56  ;;  %v3950_v43 = vpop.f32.mrb[200].mxu1 }
 0x7e5   :  { %v3951_v17 = vadd.f32 %v3950_v43, %v3599_v37  ;;  %v3952_v26 = vpop.f32.mrb[201].mxu1 }
 0x7e6   :  { %v3953_v2 = vadd.f32 %v3952_v26, %v3599_v37  ;;  %v3954_v54 = vpop.f32.mrb[202].mxu1  ;;  %4509 = vmatprep.subr.bf16.mxu0 %v4092_v47  ;;  %v3639_v37 = vpop.permute.xlu0 %3638 }
 0x7e7   :  { %v3955_v29 = vadd.f32 %v3954_v54, %v3604_v39  ;;  %v3956_v10 = vpop.f32.mrb[203].mxu1  ;;  %4510 = vmatpush1.bf16.msra.mxu0 %v4091_v44  ;;  %v4049_v7 = vmax.f32 %v3951_v17, 0.0 }
 0x7e8   :  { %v3957_v20 = vadd.f32 %v3956_v10, %v3604_v39  ;;  %v4050_v0 = vmax.f32 %v3953_v2, 0.0  ;;  %v3644_v39 = vpop.permute.xlu1 %3643 }
 0x7e9   :  { %v4051_v9 = vmax.f32 %v3955_v29, 0.0 }
 0x7ea   :  { %v4052_v24 = vmax.f32 %v3957_v20, 0.0 }
 0x7eb   :  { %v4093_v21 = vpack.c.bf16 %v4051_v9, %v4049_v7 }
 0x7ec   :  { %v4094_v53 = vpack.c.bf16 %v4052_v24, %v4050_v0  ;;  %v3960_v6 = vpop.f32.mrb[204].mxu1 }
 0x7ed   :  { %v3961_v48 = vadd.f32 %v3960_v6, %v3609_v55  ;;  %v3962_v49 = vpop.f32.mrb[205].mxu1 }
 0x7ee   :  { %v3963_v51 = vadd.f32 %v3962_v49, %v3609_v55  ;;  %v3964_v3 = vpop.f32.mrb[206].mxu1  ;;  %4511 = vmatprep.subr.bf16.mxu0 %v4094_v53  ;;  %v3649_v55 = vpop.permute.xlu0 %3648 }
 0x7ef   :  { %v3965_v57 = vadd.f32 %v3964_v3, %v3614_v4  ;;  %v3966_v18 = vpop.f32.mrb[207].mxu1  ;;  %4512 = vmatpush1.bf16.msra.mxu0 %v4093_v21  ;;  %v4053_v40 = vmax.f32 %v3961_v48, 0.0 }
 0x7f0   :  { %v3967_v59 = vadd.f32 %v3966_v18, %v3614_v4  ;;  %v4054_v35 = vmax.f32 %v3963_v51, 0.0  ;;  %v3654_v4 = vpop.permute.xlu1 %3653 }
 0x7f1   :  { %v4055_v34 = vmax.f32 %v3965_v57, 0.0 }
 0x7f2   :  { %v4056_v16 = vmax.f32 %v3967_v59, 0.0 }
 0x7f3   :  { %v4095_v13 = vpack.c.bf16 %v4055_v34, %v4053_v40 }
 0x7f4   :  { %v4096_v46 = vpack.c.bf16 %v4056_v16, %v4054_v35  ;;  %v3970_v60 = vpop.f32.mrb[208].mxu1 }
 0x7f5   :  { %v3971_v25 = vadd.f32 %v3970_v60, %v3619_v19  ;;  %v3972_v1 = vpop.f32.mrb[209].mxu1  ;;  %v5689_v60 = vld [vmem:[%s7714_s3 + $0x514] ss:$8 sps:$4 sm:$0xff]  }
 0x7f6   :  { %v3973_v5 = vadd.f32 %v3972_v1, %v3619_v19  ;;  %v3974_v15 = vpop.f32.mrb[210].mxu1  ;;  %4513 = vmatprep.subr.bf16.mxu0 %v4096_v46  ;;  %v5686_v46 = vld [vmem:[%s7714_s3 + $0x500] ss:$8 sps:$4 sm:$0xff]   ;;  %v5692_v1 = vld [vmem:[%s7714_s3 + $0x524] ss:$8 sps:$4 sm:$0xff]  }
 0x7f7   :  { %v3975_v8 = vadd.f32 %v3974_v15, %v3624_v62  ;;  %v3976_v45 = vpop.f32.mrb[211].mxu1  ;;  %4514 = vmatpush1.bf16.msra.mxu0 %v4095_v13  ;;  %v4057_v52 = vmax.f32 %v3971_v25, 0.0  ;;  %v5691_v25 = vld [vmem:[%s7714_s3 + $0x510] ss:$8 sps:$4 sm:$0xff]  }
 0x7f8   :  { %v3977_v41 = vadd.f32 %v3976_v45, %v3624_v62  ;;  %v4058_v31 = vmax.f32 %v3973_v5, 0.0  ;;  %v5694_v62 = vld [vmem:[%s7714_s3 + $0x520] ss:$8 sps:$4 sm:$0xff]   ;;  %v5695_v5 = vld [vmem:[%s7714_s3 + $0x534] ss:$8 sps:$4 sm:$0xff]  }
 0x7f9   :  { %v4059_v27 = vmax.f32 %v3975_v8, 0.0  ;;  %v5697_v15 = vld [vmem:[%s7714_s3 + $0x530] ss:$8 sps:$4 sm:$0xff]   ;;  %v5698_v8 = vld [vmem:[%s7714_s3 + $0x544] ss:$8 sps:$4 sm:$0xff]  }
 0x7fa   :  { %v4060_v50 = vmax.f32 %v3977_v41, 0.0  ;;  %v5700_v45 = vld [vmem:[%s7714_s3 + $0x540] ss:$8 sps:$4 sm:$0xff]   ;;  %v5701_v41 = vld [vmem:[%s7714_s3 + $0x554] ss:$8 sps:$4 sm:$0xff]  }
 0x7fb   :  { %v4097_v12 = vpack.c.bf16 %v4059_v27, %v4057_v52  ;;  %v5703_v52 = vld [vmem:[%s7714_s3 + $0x550] ss:$8 sps:$4 sm:$0xff]   ;;  %v5704_v27 = vld [vmem:[%s7714_s3 + $0x564] ss:$8 sps:$4 sm:$0xff]  }
 0x7fc   :  { %v4098_v36 = vpack.c.bf16 %v4060_v50, %v4058_v31  ;;  %v3980_v23 = vpop.f32.mrb[212].mxu1  ;;  %v5706_v31 = vld [vmem:[%s7714_s3 + $0x560] ss:$8 sps:$4 sm:$0xff]   ;;  %v5707_v50 = vld [vmem:[%s7714_s3 + $0x574] ss:$8 sps:$4 sm:$0xff]  }
 0x7fd   :  { %v3981_v14 = vadd.f32 %v3980_v23, %v3629_v61  ;;  %v3982_v22 = vpop.f32.mrb[213].mxu1  ;;  %v5713_v23 = vld [vmem:[%s7714_s3 + $0x594] ss:$8 sps:$4 sm:$0xff]  }
 0x7fe   :  { %v3983_v33 = vadd.f32 %v3982_v22, %v3629_v61  ;;  %v3984_v28 = vpop.f32.mrb[214].mxu1  ;;  %4515 = vmatprep.subr.bf16.mxu0 %v4098_v36  ;;  %v5710_v61 = vld [vmem:[%s7714_s3 + $0x584] ss:$8 sps:$4 sm:$0xff]   ;;  %v5712_v36 = vld [vmem:[%s7714_s3 + $0x580] ss:$8 sps:$4 sm:$0xff]  }
 0x7ff   :  { %v3985_v32 = vadd.f32 %v3984_v28, %v3634_v30  ;;  %v3986_v11 = vpop.f32.mrb[215].mxu1  ;;  %4516 = vmatpush1.bf16.msra.mxu0 %v4097_v12  ;;  %v4061_v38 = vmax.f32 %v3981_v14, 0.0  ;;  %v5709_v12 = vld [vmem:[%s7714_s3 + $0x570] ss:$8 sps:$4 sm:$0xff]   ;;  %v5716_v22 = vld [vmem:[%s7714_s3 + $0x5a4] ss:$8 sps:$4 sm:$0xff]  }
 0x800   :  { %v3987_v58 = vadd.f32 %v3986_v11, %v3634_v30  ;;  %v4062_v56 = vmax.f32 %v3983_v33, 0.0  ;;  %v5715_v14 = vld [vmem:[%s7714_s3 + $0x590] ss:$8 sps:$4 sm:$0xff]   ;;  %v5718_v30 = vld [vmem:[%s7714_s3 + $0x5a0] ss:$8 sps:$4 sm:$0xff]  }
 0x801   :  { %v4063_v63 = vmax.f32 %v3985_v32, 0.0  ;;  %v5719_v33 = vld [vmem:[%s7714_s3 + $0x5b4] ss:$8 sps:$4 sm:$0xff]   ;;  %v5721_v28 = vld [vmem:[%s7714_s3 + $0x5b0] ss:$8 sps:$4 sm:$0xff]  }
 0x802   :  { %v4064_v42 = vmax.f32 %v3987_v58, 0.0  ;;  %v5722_v32 = vld [vmem:[%s7714_s3 + $0x5c4] ss:$8 sps:$4 sm:$0xff]   ;;  %v5724_v11 = vld [vmem:[%s7714_s3 + $0x5c0] ss:$8 sps:$4 sm:$0xff]  }
 0x803   :  { %v4099_v44 = vpack.c.bf16 %v4063_v63, %v4061_v38  ;;  %v5725_v58 = vld [vmem:[%s7714_s3 + $0x5d4] ss:$8 sps:$4 sm:$0xff]   ;;  %v5727_v38 = vld [vmem:[%s7714_s3 + $0x5d0] ss:$8 sps:$4 sm:$0xff]   ;;  %v5728_v63 = vld [vmem:[%s7714_s3 + $0x5e4] ss:$8 sps:$4 sm:$0xff]  }
 0x804   :  { %v4100_v47 = vpack.c.bf16 %v4064_v42, %v4062_v56  ;;  %v3990_v43 = vpop.f32.mrb[216].mxu1  ;;  %v5730_v56 = vld [vmem:[%s7714_s3 + $0x5e0] ss:$8 sps:$4 sm:$0xff]   ;;  %v5731_v42 = vld [vmem:[%s7714_s3 + $0x5f4] ss:$8 sps:$4 sm:$0xff]  }
 0x805   :  { %v3991_v17 = vadd.f32 %v3990_v43, %v3639_v37  ;;  %v3992_v26 = vpop.f32.mrb[217].mxu1 }
 0x806   :  { %v3993_v2 = vadd.f32 %v3992_v26, %v3639_v37  ;;  %v3994_v54 = vpop.f32.mrb[218].mxu1  ;;  %4517 = vmatprep.subr.bf16.mxu0 %v4100_v47  ;;  %v4174_v37 = vpop.permute.xlu0 %4173 }
 0x807   :  { %v3995_v29 = vadd.f32 %v3994_v54, %v3644_v39  ;;  %v3996_v10 = vpop.f32.mrb[219].mxu1  ;;  %4518 = vmatpush1.bf16.msra.mxu0 %v4099_v44  ;;  %v4065_v7 = vmax.f32 %v3991_v17, 0.0  ;;  %v5733_v44 = vld [vmem:[%s7714_s3 + $0x5f0] ss:$8 sps:$4 sm:$0xff]   ;;  %v4179_v26 = vpop.permute.xlu1 %4178  ;;  %v7698_v54 = vld [vmem:[%s7716_s5] sm:$0xff] }
 0x808   :  { %v3997_v20 = vadd.f32 %v3996_v10, %v3644_v39  ;;  %v4066_v0 = vmax.f32 %v3993_v2, 0.0 }
 0x809   :  { %v4067_v9 = vmax.f32 %v3995_v29, 0.0 }
 0x80a   :  { %v4068_v24 = vmax.f32 %v3997_v20, 0.0  ;;  %v5386_v20 = vcombine.high %v7698_v54, %v7698_v54 }
 0x80b   :  { %v4101_v21 = vpack.c.bf16 %v4067_v9, %v4065_v7 }
 0x80c   :  { %v4102_v53 = vpack.c.bf16 %v4068_v24, %v4066_v0  ;;  %v4000_v6 = vpop.f32.mrb[220].mxu1  ;;  %4826 = vmatprep.mubr.bf16.mxu1 %v5386_v20 }
 0x80d   :  { %v4001_v48 = vadd.f32 %v4000_v6, %v3649_v55  ;;  %v4002_v49 = vpop.f32.mrb[221].mxu1 }
 0x80e   :  { %v4003_v51 = vadd.f32 %v4002_v49, %v3649_v55  ;;  %v4004_v3 = vpop.f32.mrb[222].mxu1  ;;  %4519 = vmatprep.subr.bf16.mxu0 %v4102_v53  ;;  %v4184_v53 = vpop.permute.xlu0 %4183 }
 0x80f   :  { %v4005_v57 = vadd.f32 %v4004_v3, %v3654_v4  ;;  %v4006_v18 = vpop.f32.mrb[223].mxu1  ;;  %4520 = vmatpush1.bf16.msra.mxu0 %v4101_v21  ;;  %v4069_v40 = vmax.f32 %v4001_v48, 0.0 }
 0x810   :  { %v4007_v59 = vadd.f32 %v4006_v18, %v3654_v4  ;;  %v4070_v35 = vmax.f32 %v4003_v51, 0.0  ;;  %v4189_v51 = vpop.permute.xlu1 %4188 }
 0x811   :  { %v4071_v34 = vmax.f32 %v4005_v57, 0.0 }
 0x812   :  { %v4072_v16 = vmax.f32 %v4007_v59, 0.0 }
 0x813   :  { %v4103_v13 = vpack.c.bf16 %v4071_v34, %v4069_v40 }
 0x814   :  { %v4104_v19 = vpack.c.bf16 %v4072_v16, %v4070_v35 }
 0x816   :  { %4521 = vmatprep.subr.bf16.mxu0 %v4104_v19 }
 0x817   :  { %4522 = vmatpush1.bf16.msra.mxu0 %v4103_v13 }
 0x81a   :  { %4524 = vmatmul.mubr.bf16.vlgmr.msra.gmra.mrb[160].mxu0 %v5686_v46  ;;  %v4194_v46 = vpop.permute.xlu0 %4193 }
 0x81b   :  { %4533 = vmatprep.mubr.bf16.mxu0 %v5689_v60 }
 0x822   :  { %4534 = vmatmul.mubr.bf16.gmra.mrb[164].mxu0 %v5691_v25 }
 0x823   :  { %4543 = vmatprep.mubr.bf16.mxu0 %v5692_v1 }
 0x82a   :  { %4544 = vmatmul.mubr.bf16.gmra.mrb[168].mxu0 %v5694_v62 }
 0x82b   :  { %4553 = vmatprep.mubr.bf16.mxu0 %v5695_v5  ;;  %v4199_v5 = vpop.permute.xlu1 %4198 }
 0x832   :  { %4554 = vmatmul.mubr.bf16.gmra.mrb[172].mxu0 %v5697_v15 }
 0x833   :  { %4563 = vmatprep.mubr.bf16.mxu0 %v5698_v8 }
 0x83a   :  { %4564 = vmatmul.mubr.bf16.gmra.mrb[176].mxu0 %v5700_v45 }
 0x83b   :  { %4573 = vmatprep.mubr.bf16.mxu0 %v5701_v41 }
 0x842   :  { %4574 = vmatmul.mubr.bf16.gmra.mrb[180].mxu0 %v5703_v52 }
 0x843   :  { %4583 = vmatprep.mubr.bf16.mxu0 %v5704_v27 }
 0x84a   :  { %4584 = vmatmul.mubr.bf16.gmra.mrb[184].mxu0 %v5706_v31 }
 0x84b   :  { %4593 = vmatprep.mubr.bf16.mxu0 %v5707_v50 }
 0x852   :  { %4594 = vmatmul.mubr.bf16.gmra.mrb[188].mxu0 %v5709_v12 }
 0x853   :  { %4603 = vmatprep.mubr.bf16.mxu0 %v5710_v61 }
 0x85a   :  { %4604 = vmatmul.mubr.bf16.gmra.mrb[192].mxu0 %v5712_v36  ;;  %v4204_v36 = vpop.permute.xlu0 %4203 }
 0x85b   :  { %4613 = vmatprep.mubr.bf16.mxu0 %v5713_v23 }
 0x862   :  { %4614 = vmatmul.mubr.bf16.gmra.mrb[196].mxu0 %v5715_v14 }
 0x863   :  { %4623 = vmatprep.mubr.bf16.mxu0 %v5716_v22 }
 0x86a   :  { %4624 = vmatmul.mubr.bf16.gmra.mrb[200].mxu0 %v5718_v30 }
 0x86b   :  { %4633 = vmatprep.mubr.bf16.mxu0 %v5719_v33  ;;  %v4209_v33 = vpop.permute.xlu1 %4208 }
 0x872   :  { %4634 = vmatmul.mubr.bf16.gmra.mrb[204].mxu0 %v5721_v28 }
 0x873   :  { %4643 = vmatprep.mubr.bf16.mxu0 %v5722_v32 }
 0x87a   :  { %4644 = vmatmul.mubr.bf16.gmra.mrb[208].mxu0 %v5724_v11 }
 0x87b   :  { %4653 = vmatprep.mubr.bf16.mxu0 %v5725_v58 }
 0x882   :  { %4654 = vmatmul.mubr.bf16.gmra.mrb[212].mxu0 %v5727_v38 }
 0x883   :  { %4663 = vmatprep.mubr.bf16.mxu0 %v5728_v63 }
 0x88a   :  { %4664 = vmatmul.mubr.bf16.gmra.mrb[216].mxu0 %v5730_v56 }
 0x88b   :  { %4673 = vmatprep.mubr.bf16.mxu0 %v5731_v42 }
 0x892   :  { %4674 = vmatmul.mubr.bf16.gmra.mrb[220].mxu0 %v5733_v44 }
 0x8ed   :  { %v4525_v47 = vpop.f32.mrb[160].mxu0 }
 0x8ee   :  { %v4526_v43 = vadd.f32 %v4525_v47, %v4174_v37  ;;  %v4527_v17 = vpop.f32.mrb[161].mxu0  ;;  %v4214_v47 = vpop.permute.xlu0 %4213 }
 0x8ef   :  { %v4528_v39 = vadd.f32 %v4527_v17, %v4174_v37  ;;  %v4529_v2 = vpop.f32.mrb[162].mxu0 }
 0x8f0   :  { %v4530_v29 = vadd.f32 %v4529_v2, %v4179_v26  ;;  %v4531_v10 = vpop.f32.mrb[163].mxu0  ;;  %v4684_v9 = vmax.f32 %v4526_v43, 0.0  ;;  %v4219_v2 = vpop.permute.xlu1 %4218 }
 0x8f1   :  { %v4532_v7 = vadd.f32 %v4531_v10, %v4179_v26  ;;  %v4685_v24 = vmax.f32 %v4528_v39, 0.0 }
 0x8f2   :  { %v4686_v0 = vmax.f32 %v4530_v29, 0.0 }
 0x8f3   :  { %v4687_v21 = vmax.f32 %v4532_v7, 0.0 }
 0x8f4   :  { %v4748_v55 = vpack.c.bf16 %v4686_v0, %v4684_v9 }
 0x8f5   :  { %v4749_v6 = vpack.c.bf16 %v4687_v21, %v4685_v24  ;;  %v4535_v48 = vpop.f32.mrb[164].mxu0 }
 0x8f6   :  { %v4536_v49 = vadd.f32 %v4535_v48, %v4184_v53  ;;  %v4537_v4 = vpop.f32.mrb[165].mxu0 }
 0x8f7   :  { %v4538_v3 = vadd.f32 %v4537_v4, %v4184_v53  ;;  %v4539_v57 = vpop.f32.mrb[166].mxu0  ;;  %4794 = vmatprep.subr.bf16.mxu1 %v4749_v6  ;;  %v4224_v6 = vpop.permute.xlu0 %4223 }
 0x8f8   :  { %v4540_v18 = vadd.f32 %v4539_v57, %v4189_v51  ;;  %v4541_v59 = vpop.f32.mrb[167].mxu0  ;;  %4795 = vmatpush1.bf16.msra.mxu1 %v4748_v55  ;;  %v4688_v34 = vmax.f32 %v4536_v49, 0.0 }
 0x8f9   :  { %v4542_v40 = vadd.f32 %v4541_v59, %v4189_v51  ;;  %v4689_v16 = vmax.f32 %v4538_v3, 0.0  ;;  %v4229_v3 = vpop.permute.xlu1 %4228 }
 0x8fa   :  { %v4690_v35 = vmax.f32 %v4540_v18, 0.0 }
 0x8fb   :  { %v4691_v13 = vmax.f32 %v4542_v40, 0.0 }
 0x8fc   :  { %v4750_v19 = vpack.c.bf16 %v4690_v35, %v4688_v34 }
 0x8fd   :  { %v4751_v60 = vpack.c.bf16 %v4691_v13, %v4689_v16  ;;  %v4545_v25 = vpop.f32.mrb[168].mxu0 }
 0x8fe   :  { %v4546_v1 = vadd.f32 %v4545_v25, %v4194_v46  ;;  %v4547_v62 = vpop.f32.mrb[169].mxu0 }
 0x8ff   :  { %v4548_v15 = vadd.f32 %v4547_v62, %v4194_v46  ;;  %v4549_v8 = vpop.f32.mrb[170].mxu0  ;;  %4796 = vmatprep.subr.bf16.mxu1 %v4751_v60  ;;  %v4234_v60 = vpop.permute.xlu0 %4233 }
 0x900   :  { %v4550_v45 = vadd.f32 %v4549_v8, %v4199_v5  ;;  %v4551_v41 = vpop.f32.mrb[171].mxu0  ;;  %4797 = vmatpush1.bf16.msra.mxu1 %v4750_v19  ;;  %v4692_v27 = vmax.f32 %v4546_v1, 0.0 }
 0x901   :  { %v4552_v52 = vadd.f32 %v4551_v41, %v4199_v5  ;;  %v4693_v50 = vmax.f32 %v4548_v15, 0.0  ;;  %v4239_v15 = vpop.permute.xlu1 %4238 }
 0x902   :  { %v4694_v31 = vmax.f32 %v4550_v45, 0.0 }
 0x903   :  { %v4695_v12 = vmax.f32 %v4552_v52, 0.0 }
 0x904   :  { %v4752_v61 = vpack.c.bf16 %v4694_v31, %v4692_v27 }
 0x905   :  { %v4753_v23 = vpack.c.bf16 %v4695_v12, %v4693_v50  ;;  %v4555_v14 = vpop.f32.mrb[172].mxu0 }
 0x906   :  { %v4556_v22 = vadd.f32 %v4555_v14, %v4204_v36  ;;  %v4557_v30 = vpop.f32.mrb[173].mxu0 }
 0x907   :  { %v4558_v28 = vadd.f32 %v4557_v30, %v4204_v36  ;;  %v4559_v32 = vpop.f32.mrb[174].mxu0  ;;  %4798 = vmatprep.subr.bf16.mxu1 %v4753_v23  ;;  %v4244_v23 = vpop.permute.xlu0 %4243 }
 0x908   :  { %v4560_v11 = vadd.f32 %v4559_v32, %v4209_v33  ;;  %v4561_v58 = vpop.f32.mrb[175].mxu0  ;;  %4799 = vmatpush1.bf16.msra.mxu1 %v4752_v61  ;;  %v4696_v63 = vmax.f32 %v4556_v22, 0.0 }
 0x909   :  { %v4562_v38 = vadd.f32 %v4561_v58, %v4209_v33  ;;  %v4697_v42 = vmax.f32 %v4558_v28, 0.0  ;;  %v4249_v28 = vpop.permute.xlu1 %4248 }
 0x90a   :  { %v4698_v56 = vmax.f32 %v4560_v11, 0.0 }
 0x90b   :  { %v4699_v44 = vmax.f32 %v4562_v38, 0.0 }
 0x90c   :  { %v4754_v37 = vpack.c.bf16 %v4698_v56, %v4696_v63 }
 0x90d   :  { %v4755_v43 = vpack.c.bf16 %v4699_v44, %v4697_v42  ;;  %v4565_v17 = vpop.f32.mrb[176].mxu0 }
 0x90e   :  { %v4566_v26 = vadd.f32 %v4565_v17, %v4214_v47  ;;  %v4567_v39 = vpop.f32.mrb[177].mxu0 }
 0x90f   :  { %v4568_v29 = vadd.f32 %v4567_v39, %v4214_v47  ;;  %v4569_v10 = vpop.f32.mrb[178].mxu0  ;;  %4800 = vmatprep.subr.bf16.mxu1 %v4755_v43  ;;  %v4254_v43 = vpop.permute.xlu0 %4253 }
 0x910   :  { %v4570_v20 = vadd.f32 %v4569_v10, %v4219_v2  ;;  %v4571_v7 = vpop.f32.mrb[179].mxu0  ;;  %4801 = vmatpush1.bf16.msra.mxu1 %v4754_v37  ;;  %v4700_v0 = vmax.f32 %v4566_v26, 0.0 }
 0x911   :  { %v4572_v9 = vadd.f32 %v4571_v7, %v4219_v2  ;;  %v4701_v21 = vmax.f32 %v4568_v29, 0.0  ;;  %v4259_v29 = vpop.permute.xlu1 %4258 }
 0x912   :  { %v4702_v24 = vmax.f32 %v4570_v20, 0.0 }
 0x913   :  { %v4703_v55 = vmax.f32 %v4572_v9, 0.0 }
 0x914   :  { %v4756_v53 = vpack.c.bf16 %v4702_v24, %v4700_v0 }
 0x915   :  { %v4757_v48 = vpack.c.bf16 %v4703_v55, %v4701_v21  ;;  %v4575_v49 = vpop.f32.mrb[180].mxu0 }
 0x916   :  { %v4576_v4 = vadd.f32 %v4575_v49, %v4224_v6  ;;  %v4577_v51 = vpop.f32.mrb[181].mxu0 }
 0x917   :  { %v4578_v57 = vadd.f32 %v4577_v51, %v4224_v6  ;;  %v4579_v18 = vpop.f32.mrb[182].mxu0  ;;  %4802 = vmatprep.subr.bf16.mxu1 %v4757_v48  ;;  %v4264_v48 = vpop.permute.xlu0 %4263 }
 0x918   :  { %v4580_v59 = vadd.f32 %v4579_v18, %v4229_v3  ;;  %v4581_v40 = vpop.f32.mrb[183].mxu0  ;;  %4803 = vmatpush1.bf16.msra.mxu1 %v4756_v53  ;;  %v4704_v35 = vmax.f32 %v4576_v4, 0.0 }
 0x919   :  { %v4582_v34 = vadd.f32 %v4581_v40, %v4229_v3  ;;  %v4705_v13 = vmax.f32 %v4578_v57, 0.0  ;;  %v4269_v57 = vpop.permute.xlu1 %4268 }
 0x91a   :  { %v4706_v16 = vmax.f32 %v4580_v59, 0.0 }
 0x91b   :  { %v4707_v19 = vmax.f32 %v4582_v34, 0.0 }
 0x91c   :  { %v4758_v46 = vpack.c.bf16 %v4706_v16, %v4704_v35 }
 0x91d   :  { %v4759_v25 = vpack.c.bf16 %v4707_v19, %v4705_v13  ;;  %v4585_v1 = vpop.f32.mrb[184].mxu0 }
 0x91e   :  { %v4586_v62 = vadd.f32 %v4585_v1, %v4234_v60  ;;  %v4587_v5 = vpop.f32.mrb[185].mxu0 }
 0x91f   :  { %v4588_v8 = vadd.f32 %v4587_v5, %v4234_v60  ;;  %v4589_v45 = vpop.f32.mrb[186].mxu0  ;;  %4804 = vmatprep.subr.bf16.mxu1 %v4759_v25  ;;  %v4274_v25 = vpop.permute.xlu0 %4273 }
 0x920   :  { %v4590_v41 = vadd.f32 %v4589_v45, %v4239_v15  ;;  %v4591_v52 = vpop.f32.mrb[187].mxu0  ;;  %4805 = vmatpush1.bf16.msra.mxu1 %v4758_v46  ;;  %v4708_v31 = vmax.f32 %v4586_v62, 0.0 }
 0x921   :  { %v4592_v27 = vadd.f32 %v4591_v52, %v4239_v15  ;;  %v4709_v12 = vmax.f32 %v4588_v8, 0.0  ;;  %v4279_v8 = vpop.permute.xlu1 %4278 }
 0x922   :  { %v4710_v50 = vmax.f32 %v4590_v41, 0.0 }
 0x923   :  { %v4711_v61 = vmax.f32 %v4592_v27, 0.0 }
 0x924   :  { %v4760_v36 = vpack.c.bf16 %v4710_v50, %v4708_v31 }
 0x925   :  { %v4761_v14 = vpack.c.bf16 %v4711_v61, %v4709_v12  ;;  %v4595_v22 = vpop.f32.mrb[188].mxu0 }
 0x926   :  { %v4596_v30 = vadd.f32 %v4595_v22, %v4244_v23  ;;  %v4597_v33 = vpop.f32.mrb[189].mxu0 }
 0x927   :  { %v4598_v32 = vadd.f32 %v4597_v33, %v4244_v23  ;;  %v4599_v11 = vpop.f32.mrb[190].mxu0  ;;  %4806 = vmatprep.subr.bf16.mxu1 %v4761_v14  ;;  %v4284_v14 = vpop.permute.xlu0 %4283 }
 0x928   :  { %v4600_v58 = vadd.f32 %v4599_v11, %v4249_v28  ;;  %v4601_v38 = vpop.f32.mrb[191].mxu0  ;;  %4807 = vmatpush1.bf16.msra.mxu1 %v4760_v36  ;;  %v4712_v56 = vmax.f32 %v4596_v30, 0.0 }
 0x929   :  { %v4602_v63 = vadd.f32 %v4601_v38, %v4249_v28  ;;  %v4713_v44 = vmax.f32 %v4598_v32, 0.0  ;;  %v4289_v32 = vpop.permute.xlu1 %4288 }
 0x92a   :  { %v4714_v42 = vmax.f32 %v4600_v58, 0.0 }
 0x92b   :  { %v4715_v37 = vmax.f32 %v4602_v63, 0.0 }
 0x92c   :  { %v4762_v47 = vpack.c.bf16 %v4714_v42, %v4712_v56 }
 0x92d   :  { %v4763_v17 = vpack.c.bf16 %v4715_v37, %v4713_v44  ;;  %v4605_v26 = vpop.f32.mrb[192].mxu0 }
 0x92e   :  { %v4606_v39 = vadd.f32 %v4605_v26, %v4254_v43  ;;  %v4607_v2 = vpop.f32.mrb[193].mxu0 }
 0x92f   :  { %v4608_v10 = vadd.f32 %v4607_v2, %v4254_v43  ;;  %v4609_v20 = vpop.f32.mrb[194].mxu0  ;;  %4808 = vmatprep.subr.bf16.mxu1 %v4763_v17  ;;  %v4294_v17 = vpop.permute.xlu0 %4293 }
 0x930   :  { %v4610_v7 = vadd.f32 %v4609_v20, %v4259_v29  ;;  %v4611_v9 = vpop.f32.mrb[195].mxu0  ;;  %4809 = vmatpush1.bf16.msra.mxu1 %v4762_v47  ;;  %v4716_v24 = vmax.f32 %v4606_v39, 0.0 }
 0x931   :  { %v4612_v0 = vadd.f32 %v4611_v9, %v4259_v29  ;;  %v4717_v55 = vmax.f32 %v4608_v10, 0.0  ;;  %v4299_v10 = vpop.permute.xlu1 %4298 }
 0x932   :  { %v4718_v21 = vmax.f32 %v4610_v7, 0.0 }
 0x933   :  { %v4719_v53 = vmax.f32 %v4612_v0, 0.0 }
 0x934   :  { %v4764_v6 = vpack.c.bf16 %v4718_v21, %v4716_v24 }
 0x935   :  { %v4765_v49 = vpack.c.bf16 %v4719_v53, %v4717_v55  ;;  %v4615_v4 = vpop.f32.mrb[196].mxu0 }
 0x936   :  { %v4616_v51 = vadd.f32 %v4615_v4, %v4264_v48  ;;  %v4617_v3 = vpop.f32.mrb[197].mxu0 }
 0x937   :  { %v4618_v18 = vadd.f32 %v4617_v3, %v4264_v48  ;;  %v4619_v59 = vpop.f32.mrb[198].mxu0  ;;  %4810 = vmatprep.subr.bf16.mxu1 %v4765_v49  ;;  %v4304_v49 = vpop.permute.xlu0 %4303 }
 0x938   :  { %v4620_v40 = vadd.f32 %v4619_v59, %v4269_v57  ;;  %v4621_v34 = vpop.f32.mrb[199].mxu0  ;;  %4811 = vmatpush1.bf16.msra.mxu1 %v4764_v6  ;;  %v4720_v16 = vmax.f32 %v4616_v51, 0.0 }
 0x939   :  { %v4622_v35 = vadd.f32 %v4621_v34, %v4269_v57  ;;  %v4721_v19 = vmax.f32 %v4618_v18, 0.0  ;;  %v4309_v18 = vpop.permute.xlu1 %4308 }
 0x93a   :  { %v4722_v13 = vmax.f32 %v4620_v40, 0.0 }
 0x93b   :  { %v4723_v46 = vmax.f32 %v4622_v35, 0.0 }
 0x93c   :  { %v4766_v60 = vpack.c.bf16 %v4722_v13, %v4720_v16 }
 0x93d   :  { %v4767_v1 = vpack.c.bf16 %v4723_v46, %v4721_v19  ;;  %v4625_v62 = vpop.f32.mrb[200].mxu0 }
 0x93e   :  { %v4626_v5 = vadd.f32 %v4625_v62, %v4274_v25  ;;  %v4627_v15 = vpop.f32.mrb[201].mxu0 }
 0x93f   :  { %v4628_v45 = vadd.f32 %v4627_v15, %v4274_v25  ;;  %v4629_v41 = vpop.f32.mrb[202].mxu0  ;;  %4812 = vmatprep.subr.bf16.mxu1 %v4767_v1  ;;  %v4314_v1 = vpop.permute.xlu0 %4313 }
 0x940   :  { %v4630_v52 = vadd.f32 %v4629_v41, %v4279_v8  ;;  %v4631_v27 = vpop.f32.mrb[203].mxu0  ;;  %4813 = vmatpush1.bf16.msra.mxu1 %v4766_v60  ;;  %v4724_v50 = vmax.f32 %v4626_v5, 0.0 }
 0x941   :  { %v4632_v31 = vadd.f32 %v4631_v27, %v4279_v8  ;;  %v4725_v61 = vmax.f32 %v4628_v45, 0.0  ;;  %v4319_v45 = vpop.permute.xlu1 %4318 }
 0x942   :  { %v4726_v12 = vmax.f32 %v4630_v52, 0.0 }
 0x943   :  { %v4727_v36 = vmax.f32 %v4632_v31, 0.0 }
 0x944   :  { %v4768_v23 = vpack.c.bf16 %v4726_v12, %v4724_v50 }
 0x945   :  { %v4769_v22 = vpack.c.bf16 %v4727_v36, %v4725_v61  ;;  %v4635_v30 = vpop.f32.mrb[204].mxu0 }
 0x946   :  { %v4636_v33 = vadd.f32 %v4635_v30, %v4284_v14  ;;  %v4637_v28 = vpop.f32.mrb[205].mxu0 }
 0x947   :  { %v4638_v11 = vadd.f32 %v4637_v28, %v4284_v14  ;;  %v4639_v58 = vpop.f32.mrb[206].mxu0  ;;  %4814 = vmatprep.subr.bf16.mxu1 %v4769_v22  ;;  %v4324_v22 = vpop.permute.xlu0 %4323 }
 0x948   :  { %v4640_v38 = vadd.f32 %v4639_v58, %v4289_v32  ;;  %v4641_v63 = vpop.f32.mrb[207].mxu0  ;;  %4815 = vmatpush1.bf16.msra.mxu1 %v4768_v23  ;;  %v4728_v42 = vmax.f32 %v4636_v33, 0.0 }
 0x949   :  { %v4642_v56 = vadd.f32 %v4641_v63, %v4289_v32  ;;  %v4729_v37 = vmax.f32 %v4638_v11, 0.0  ;;  %v4329_v11 = vpop.permute.xlu1 %4328 }
 0x94a   :  { %v4730_v44 = vmax.f32 %v4640_v38, 0.0 }
 0x94b   :  { %v4731_v47 = vmax.f32 %v4642_v56, 0.0 }
 0x94c   :  { %v4770_v43 = vpack.c.bf16 %v4730_v44, %v4728_v42 }
 0x94d   :  { %v4771_v26 = vpack.c.bf16 %v4731_v47, %v4729_v37  ;;  %v4645_v39 = vpop.f32.mrb[208].mxu0 }
 0x94e   :  { %v4646_v2 = vadd.f32 %v4645_v39, %v4294_v17  ;;  %v4647_v29 = vpop.f32.mrb[209].mxu0  ;;  %v5385_v39 = vcombine.low %v7698_v54, %v7698_v54 }
 0x94f   :  { %v4648_v20 = vadd.f32 %v4647_v29, %v4294_v17  ;;  %v4649_v7 = vpop.f32.mrb[210].mxu0  ;;  %4816 = vmatprep.subr.bf16.mxu1 %v4771_v26 }
 0x950   :  { %v4650_v9 = vadd.f32 %v4649_v7, %v4299_v10  ;;  %v4651_v0 = vpop.f32.mrb[211].mxu0  ;;  %4817 = vmatpush1.bf16.msra.mxu1 %v4770_v43  ;;  %v4732_v21 = vmax.f32 %v4646_v2, 0.0  ;;  %v4785_v2 = vpop.permute.xlu0 %4784 }
 0x951   :  { %v4652_v24 = vadd.f32 %v4651_v0, %v4299_v10  ;;  %v4733_v53 = vmax.f32 %v4648_v20, 0.0 }
 0x952   :  { %v4734_v55 = vmax.f32 %v4650_v9, 0.0 }
 0x953   :  { %v4735_v6 = vmax.f32 %v4652_v24, 0.0 }
 0x954   :  { %v4772_v48 = vpack.c.bf16 %v4734_v55, %v4732_v21 }
 0x955   :  { %v4773_v4 = vpack.c.bf16 %v4735_v6, %v4733_v53  ;;  %v4655_v51 = vpop.f32.mrb[212].mxu0 }
 0x956   :  { %v4656_v3 = vadd.f32 %v4655_v51, %v4304_v49  ;;  %v4657_v57 = vpop.f32.mrb[213].mxu0 }
 0x957   :  { %v4658_v59 = vadd.f32 %v4657_v57, %v4304_v49  ;;  %v4659_v40 = vpop.f32.mrb[214].mxu0  ;;  %4818 = vmatprep.subr.bf16.mxu1 %v4773_v4 }
 0x958   :  { %v4660_v34 = vadd.f32 %v4659_v40, %v4309_v18  ;;  %v4661_v35 = vpop.f32.mrb[215].mxu0  ;;  %4819 = vmatpush1.bf16.msra.mxu1 %v4772_v48  ;;  %v4736_v13 = vmax.f32 %v4656_v3, 0.0 }
 0x959   :  { %v4662_v16 = vadd.f32 %v4661_v35, %v4309_v18  ;;  %v4737_v46 = vmax.f32 %v4658_v59, 0.0 }
 0x95a   :  { %v4738_v19 = vmax.f32 %v4660_v34, 0.0 }
 0x95b   :  { %v4739_v60 = vmax.f32 %v4662_v16, 0.0 }
 0x95c   :  { %v4774_v25 = vpack.c.bf16 %v4738_v19, %v4736_v13 }
 0x95d   :  { %v4775_v62 = vpack.c.bf16 %v4739_v60, %v4737_v46  ;;  %v4665_v5 = vpop.f32.mrb[216].mxu0 }
 0x95e   :  { %v4666_v15 = vadd.f32 %v4665_v5, %v4314_v1  ;;  %v4667_v8 = vpop.f32.mrb[217].mxu0 }
 0x95f   :  { %v4668_v41 = vadd.f32 %v4667_v8, %v4314_v1  ;;  %v4669_v52 = vpop.f32.mrb[218].mxu0  ;;  %4820 = vmatprep.subr.bf16.mxu1 %v4775_v62 }
 0x960   :  { %v4670_v27 = vadd.f32 %v4669_v52, %v4319_v45  ;;  %v4671_v31 = vpop.f32.mrb[219].mxu0  ;;  %4821 = vmatpush1.bf16.msra.mxu1 %v4774_v25  ;;  %v4740_v12 = vmax.f32 %v4666_v15, 0.0 }
 0x961   :  { %v4672_v50 = vadd.f32 %v4671_v31, %v4319_v45  ;;  %v4741_v36 = vmax.f32 %v4668_v41, 0.0 }
 0x962   :  { %v4742_v61 = vmax.f32 %v4670_v27, 0.0 }
 0x963   :  { %v4743_v23 = vmax.f32 %v4672_v50, 0.0 }
 0x964   :  { %v4776_v14 = vpack.c.bf16 %v4742_v61, %v4740_v12 }
 0x965   :  { %v4777_v30 = vpack.c.bf16 %v4743_v23, %v4741_v36  ;;  %v4675_v33 = vpop.f32.mrb[220].mxu0 }
 0x966   :  { %v4676_v28 = vadd.f32 %v4675_v33, %v4324_v22  ;;  %v4677_v32 = vpop.f32.mrb[221].mxu0 }
 0x967   :  { %v4678_v58 = vadd.f32 %v4677_v32, %v4324_v22  ;;  %v4679_v38 = vpop.f32.mrb[222].mxu0  ;;  %4822 = vmatprep.subr.bf16.mxu1 %v4777_v30 }
 0x968   :  { %v4680_v63 = vadd.f32 %v4679_v38, %v4329_v11  ;;  %v4681_v56 = vpop.f32.mrb[223].mxu0  ;;  %4823 = vmatpush1.bf16.msra.mxu1 %v4776_v14  ;;  %v4744_v44 = vmax.f32 %v4676_v28, 0.0 }
 0x969   :  { %v4682_v42 = vadd.f32 %v4681_v56, %v4329_v11  ;;  %v4745_v47 = vmax.f32 %v4678_v58, 0.0 }
 0x96a   :  { %v4746_v37 = vmax.f32 %v4680_v63, 0.0 }
 0x96b   :  { %v4747_v43 = vmax.f32 %v4682_v42, 0.0 }
 0x96c   :  { %v4778_v17 = vpack.c.bf16 %v4746_v37, %v4744_v44 }
 0x96d   :  { %v4779_v26 = vpack.c.bf16 %v4747_v43, %v4745_v47 }
 0x96f   :  { %4824 = vmatprep.subr.bf16.mxu1 %v4779_v26 }
 0x970   :  { %4825 = vmatpush1.bf16.msra.mxu1 %v4778_v17 }
 0x973   :  { %4827 = vmatmul.mubr.bf16.vlgmr.msra.gmra.mrb[224].mxu1 %v5385_v39 }
 0xa46   :  { %v4828_v29 = vpop.f32.mrb[224].mxu1 }
 0xa47   :  { %v4829_v10 = vadd.f32 %v4828_v29, %v4785_v2  ;;  %v4830_v20 = vpop.f32.mrb[225].mxu1 }
 0xa48   :  { %v4831_v7 = vadd.f32 %v4830_v20, %v4785_v2  ;;  %v4832_v9 = vpop.f32.mrb[226].mxu1 }
 0xa49   :  { %4835 = vst [vmem:[%s7717_s7] sm:$0xff] %v4829_v10  ;;  %v4833_v0 = vpop.f32.mrb[227].mxu1 }
 0xa4a   :  { %4836 = vst [vmem:[%s7717_s7 + $0x8] sm:$0xff] %v4831_v7 }

</bundles_post_ra>
